<compile_context>
chip_gen: v7x
topology: tpu7x:2x2x1
jax: 0.10.0
libtpu: 0.0.40
codegen_flags: <defaults>
</compile_context>

<pallas_src>
import jax
import jax.numpy as jnp
from jax import lax
from jax.experimental import pallas as pl
from jax.experimental.pallas import tpu as pltpu

K = 3  # kernel size (3x3, stride 1, pad 1 — the module defaults)


def _conv_elu_g_kernel(x_ref, w_ref, b_ref, o_ref, xpad_ref, slab_ref):
    """Fused dual-conv(3x3) + sigmoid-gate * ELU for one batch element.

    x_ref    : (1, H, W, Cin)      bf16  un-padded input tile
    w_ref    : (K*K*Cin, 2*Cout)   bf16  [conv1 | conv_mask] im2col weights
    b_ref    : (1, 2*Cout)         f32   [b1 | b_mask]
    o_ref    : (1, H, W, Cout)     f32   gated output tile
    xpad_ref : (H+2, W+2, Cin)     f32   VMEM scratch, zero halo
    slab_ref : (H*W, K*K*Cin)      f32   VMEM scratch, im2col slab
    """
    _, H, W, Cin = x_ref.shape
    Cout = o_ref.shape[-1]

    # ---- 1-pixel halo built in VMEM (no wrapper-side jnp.pad / extra HBM pass).
    xpad_ref[...] = jnp.zeros(xpad_ref.shape, xpad_ref.dtype)
    xpad_ref[1:H + 1, 1:W + 1, :] = x_ref[0].astype(jnp.float32)

    # ---- im2col: pack the 9 taps along the contraction axis -> (H*W, 9*Cin).
    for kh in range(K):
        for kw in range(K):
            t = kh * K + kw
            slab_ref[:, t * Cin:(t + 1) * Cin] = (
                xpad_ref[kh:kh + H, kw:kw + W, :].reshape(H * W, Cin))

    # ---- One MXU matmul for BOTH convolutions (K-dim = 9*Cin, N-dim = 2*Cout).
    z = jnp.dot(slab_ref[...].astype(jnp.bfloat16), w_ref[...],
                preferred_element_type=jnp.float32)
    z = z + b_ref[...]                       # (H*W, 2*Cout) f32

    z1 = z[:, :Cout]                         # conv1 logits
    zm = z[:, Cout:]                         # conv_mask logits

    # ELU (alpha=1): clamp the exp argument so the untaken positive branch
    # never produces inf / wasted EUP work.
    elu = jnp.where(z1 > 0, z1, jnp.exp(jnp.minimum(z1, 0.0)) - 1.0)
    mask = jax.nn.sigmoid(zm)

    o_ref[...] = (mask * elu).reshape(1, H, W, Cout).astype(o_ref.dtype)


def conv_elu_g_nhwc(x_nhwc, w1_hwio, b1, wm_hwio, bm):
    """Channels-last fast path.

    x_nhwc : (N, H, W, Cin); w*_hwio : (K, K, Cin, Cout); b* : (Cout,)
    Returns (N, H, W, Cout) float32.
    """
    N, H, W, Cin = x_nhwc.shape
    Cout = w1_hwio.shape[-1]

    # Fuse the two convs: one (9*Cin, 2*Cout) weight, one (1, 2*Cout) bias.
    w_cat = jnp.concatenate([w1_hwio, wm_hwio], axis=-1)          # (K,K,Cin,2*Cout)
    w_cat = w_cat.reshape(K * K * Cin, 2 * Cout).astype(jnp.bfloat16)
    b_cat = jnp.concatenate([b1, bm], axis=-1).reshape(1, 2 * Cout)
    b_cat = b_cat.astype(jnp.float32)
    x_bf16 = x_nhwc.astype(jnp.bfloat16)                          # halve input HBM traffic

    # NOTE: whole-image block per batch element. For large H/W add an H-tile
    # grid axis with a 2-row halo DMA (pl.ANY input + pltpu.make_async_copy)
    # and re-derive tile sizes against v7x's 64 MiB VMEM.
    return pl.pallas_call(
        _conv_elu_g_kernel,
        out_shape=jax.ShapeDtypeStruct((N, H, W, Cout), jnp.float32),
        grid_spec=pltpu.PrefetchScalarGridSpec(
            num_scalar_prefetch=0,
            grid=(N,),
            in_specs=[
                pl.BlockSpec((1, H, W, Cin), lambda n: (n, 0, 0, 0)),
                pl.BlockSpec((K * K * Cin, 2 * Cout), lambda n: (0, 0)),
                pl.BlockSpec((1, 2 * Cout), lambda n: (0, 0)),
            ],
            out_specs=pl.BlockSpec((1, H, W, Cout), lambda n: (n, 0, 0, 0)),
            scratch_shapes=[
                pltpu.VMEM((H + 2, W + 2, Cin), jnp.float32),     # halo tile
                pltpu.VMEM((H * W, K * K * Cin), jnp.float32),    # im2col slab
            ],
        ),
        compiler_params=pltpu.CompilerParams(
            dimension_semantics=("parallel",),   # batch across TCs (v7x has 2)
            vmem_limit_bytes=32 * 1024 * 1024,
        ),
    )(x_bf16, w_cat, b_cat)


def conv_elu_g(x_nchw, w1_oihw, b1, wm_oihw, bm):
    """PyTorch-compatible entry point (matches conv_elu_g.forward).

    x_nchw  : (N, Cin, H, W)      — like the nn.Module input
    w*_oihw : (Cout, Cin, K, K)   — nn.Conv2d weight layout
    b*      : (Cout,)
    Returns (N, Cout, H, W) float32.
    """
    x = jnp.transpose(x_nchw, (0, 2, 3, 1))       # NCHW -> NHWC
    w1 = jnp.transpose(w1_oihw, (2, 3, 1, 0))     # OIHW -> HWIO
    wm = jnp.transpose(wm_oihw, (2, 3, 1, 0))
    y = conv_elu_g_nhwc(x, w1, b1, wm, bm)
    return jnp.transpose(y, (0, 3, 1, 2))         # NHWC -> NCHW


def _reference_nchw(x, w1, b1, wm, bm):
    """Plain-JAX NCHW reference mirroring the PyTorch forward.

    Inputs/weights are rounded to bf16 first so the reference matches the
    kernel's bf16-operand / f32-accumulate arithmetic.
    """
    xq = x.astype(jnp.bfloat16).astype(jnp.float32)
    w1q = w1.astype(jnp.bfloat16).astype(jnp.float32)
    wmq = wm.astype(jnp.bfloat16).astype(jnp.float32)
    dn = lax.conv_dimension_numbers(x.shape, w1.shape, ("NCHW", "OIHW", "NCHW"))
    c1 = lax.conv_general_dilated(xq, w1q, (1, 1), ((1, 1), (1, 1)),
                                  dimension_numbers=dn) + b1[None, :, None, None]
    cm = lax.conv_general_dilated(xq, wmq, (1, 1), ((1, 1), (1, 1)),
                                  dimension_numbers=dn) + bm[None, :, None, None]
    elu = jnp.where(c1 > 0, c1, jnp.exp(jnp.minimum(c1, 0.0)) - 1.0)
    return jax.nn.sigmoid(cm) * elu


if __name__ == "__main__":
    # Small shapes matching the module: N=2, in_planes=4, out_planes=8, 16x16.
    N, Cin, Cout, H, W = 2, 4, 8, 16, 16

    key = jax.random.PRNGKey(0)
    kx, kw1, kb1, kwm, kbm = jax.random.split(key, 5)

    # PyTorch-native layouts: NCHW activations, (Cout, Cin, kh, kw) weights.
    x = jax.random.normal(kx, (N, Cin, H, W), jnp.float32)
    w1 = jax.random.normal(kw1, (Cout, Cin, K, K), jnp.float32) * 0.1
    b1 = jax.random.normal(kb1, (Cout,), jnp.float32) * 0.1
    wm = jax.random.normal(kwm, (Cout, Cin, K, K), jnp.float32) * 0.1
    bm = jax.random.normal(kbm, (Cout,), jnp.float32) * 0.1

    out = jax.jit(conv_elu_g)(x, w1, b1, wm, bm)
    out = jax.block_until_ready(out)

    ref = _reference_nchw(x, w1, b1, wm, bm)
    assert out.shape == (N, Cout, H, W), out.shape
    max_err = float(jnp.max(jnp.abs(out - ref)))
    assert jnp.allclose(out, ref, atol=5e-3, rtol=5e-3), max_err

    print("KERNEL_OK")
</pallas_src>

<mosaic_0001>
module attributes {stable_mosaic.version = 11 : i64} {
  func.func @_conv_elu_g_kernel(%arg0: i32, %arg1: memref<1x16x16x4xbf16, #tpu.memory_space<vmem>>, %arg2: memref<36x16xbf16, #tpu.memory_space<vmem>>, %arg3: memref<1x16xf32, #tpu.memory_space<vmem>>, %arg4: memref<1x16x16x8xf32, #tpu.memory_space<vmem>>, %arg5: memref<18x18x4xf32, #tpu.memory_space<vmem>>, %arg6: memref<256x36xf32, #tpu.memory_space<vmem>>) attributes {dimension_semantics = [#tpu.dimension_semantics<parallel>], iteration_bounds = array<i64: 2>, scalar_prefetch = 0 : i64, scratch_operands = 2 : i64, tpu.core_type = #tpu.core_type<tc>, window_params = [{transform_indices = @transform_0, window_bounds = array<i64: 1, 16, 16, 4>}, {pipeline_mode = #tpu.pipeline_mode<synchronous>, transform_indices = @transform_1, window_bounds = array<i64: 36, 16>}, {pipeline_mode = #tpu.pipeline_mode<synchronous>, transform_indices = @transform_2, window_bounds = array<i64: 1, 16>}, {transform_indices = @transform_3, window_bounds = array<i64: 1, 16, 16, 8>}]} {
    %cst = arith.constant 0.000000e+00 : f32
    %0 = vector.broadcast %cst : f32 to vector<18x18x4xf32>
    %c0 = arith.constant 0 : index
    %c0_0 = arith.constant 0 : index
    %c0_1 = arith.constant 0 : index
    %1 = vector.load %arg5[%c0, %c0_0, %c0_1] : memref<18x18x4xf32, #tpu.memory_space<vmem>>, vector<18x18x4xf32>
    tpu.vector_store %arg5[%c0, %c0_0, %c0_1], %0 {strides = array<i32>} : memref<18x18x4xf32, #tpu.memory_space<vmem>>, vector<18x18x4xf32>,
    %c0_2 = arith.constant 0 : index
    %c0_3 = arith.constant 0 : index
    %c0_4 = arith.constant 0 : index
    %c0_5 = arith.constant 0 : index
    %2 = vector.load %arg1[%c0_2, %c0_3, %c0_4, %c0_5] : memref<1x16x16x4xbf16, #tpu.memory_space<vmem>>, vector<1x16x16x4xbf16>
    %3 = vector.shape_cast %2 : vector<1x16x16x4xbf16> to vector<16x16x4xbf16>
    %4 = arith.extf %3 : vector<16x16x4xbf16> to vector<16x16x4xf32>
    %c1 = arith.constant 1 : index
    %c1_6 = arith.constant 1 : index
    %c0_7 = arith.constant 0 : index
    %5 = vector.load %arg5[%c1, %c1_6, %c0_7] : memref<18x18x4xf32, #tpu.memory_space<vmem>>, vector<16x16x4xf32>
    tpu.vector_store %arg5[%c1, %c1_6, %c0_7], %4 {strides = array<i32>} : memref<18x18x4xf32, #tpu.memory_space<vmem>>, vector<16x16x4xf32>,
    %c0_8 = arith.constant 0 : index
    %c0_9 = arith.constant 0 : index
    %c0_10 = arith.constant 0 : index
    %6 = vector.load %arg5[%c0_8, %c0_9, %c0_10] : memref<18x18x4xf32, #tpu.memory_space<vmem>>, vector<16x16x4xf32>
    %7 = vector.shape_cast %6 : vector<16x16x4xf32> to vector<256x4xf32>
    %c0_11 = arith.constant 0 : index
    %c0_12 = arith.constant 0 : index
    %8 = vector.load %arg6[%c0_11, %c0_12] : memref<256x36xf32, #tpu.memory_space<vmem>>, vector<256x4xf32>
    tpu.vector_store %arg6[%c0_11, %c0_12], %7 {strides = array<i32>} : memref<256x36xf32, #tpu.memory_space<vmem>>, vector<256x4xf32>,
    %c0_13 = arith.constant 0 : index
    %c1_14 = arith.constant 1 : index
    %c0_15 = arith.constant 0 : index
    %9 = vector.load %arg5[%c0_13, %c1_14, %c0_15] : memref<18x18x4xf32, #tpu.memory_space<vmem>>, vector<16x16x4xf32>
    %10 = vector.shape_cast %9 : vector<16x16x4xf32> to vector<256x4xf32>
    %c0_16 = arith.constant 0 : index
    %c4 = arith.constant 4 : index
    %11 = vector.load %arg6[%c0_16, %c4] : memref<256x36xf32, #tpu.memory_space<vmem>>, vector<256x4xf32>
    tpu.vector_store %arg6[%c0_16, %c4], %10 {strides = array<i32>} : memref<256x36xf32, #tpu.memory_space<vmem>>, vector<256x4xf32>,
    %c0_17 = arith.constant 0 : index
    %c2 = arith.constant 2 : index
    %c0_18 = arith.constant 0 : index
    %12 = vector.load %arg5[%c0_17, %c2, %c0_18] : memref<18x18x4xf32, #tpu.memory_space<vmem>>, vector<16x16x4xf32>
    %13 = vector.shape_cast %12 : vector<16x16x4xf32> to vector<256x4xf32>
    %c0_19 = arith.constant 0 : index
    %c8 = arith.constant 8 : index
    %14 = vector.load %arg6[%c0_19, %c8] : memref<256x36xf32, #tpu.memory_space<vmem>>, vector<256x4xf32>
    tpu.vector_store %arg6[%c0_19, %c8], %13 {strides = array<i32>} : memref<256x36xf32, #tpu.memory_space<vmem>>, vector<256x4xf32>,
    %c1_20 = arith.constant 1 : index
    %c0_21 = arith.constant 0 : index
    %c0_22 = arith.constant 0 : index
    %15 = vector.load %arg5[%c1_20, %c0_21, %c0_22] : memref<18x18x4xf32, #tpu.memory_space<vmem>>, vector<16x16x4xf32>
    %16 = vector.shape_cast %15 : vector<16x16x4xf32> to vector<256x4xf32>
    %c0_23 = arith.constant 0 : index
    %c12 = arith.constant 12 : index
    %17 = vector.load %arg6[%c0_23, %c12] : memref<256x36xf32, #tpu.memory_space<vmem>>, vector<256x4xf32>
    tpu.vector_store %arg6[%c0_23, %c12], %16 {strides = array<i32>} : memref<256x36xf32, #tpu.memory_space<vmem>>, vector<256x4xf32>,
    %c1_24 = arith.constant 1 : index
    %c1_25 = arith.constant 1 : index
    %c0_26 = arith.constant 0 : index
    %18 = vector.load %arg5[%c1_24, %c1_25, %c0_26] : memref<18x18x4xf32, #tpu.memory_space<vmem>>, vector<16x16x4xf32>
    %19 = vector.shape_cast %18 : vector<16x16x4xf32> to vector<256x4xf32>
    %c0_27 = arith.constant 0 : index
    %c16 = arith.constant 16 : index
    %20 = vector.load %arg6[%c0_27, %c16] : memref<256x36xf32, #tpu.memory_space<vmem>>, vector<256x4xf32>
    tpu.vector_store %arg6[%c0_27, %c16], %19 {strides = array<i32>} : memref<256x36xf32, #tpu.memory_space<vmem>>, vector<256x4xf32>,
    %c1_28 = arith.constant 1 : index
    %c2_29 = arith.constant 2 : index
    %c0_30 = arith.constant 0 : index
    %21 = vector.load %arg5[%c1_28, %c2_29, %c0_30] : memref<18x18x4xf32, #tpu.memory_space<vmem>>, vector<16x16x4xf32>
    %22 = vector.shape_cast %21 : vector<16x16x4xf32> to vector<256x4xf32>
    %c0_31 = arith.constant 0 : index
    %c20 = arith.constant 20 : index
    %23 = vector.load %arg6[%c0_31, %c20] : memref<256x36xf32, #tpu.memory_space<vmem>>, vector<256x4xf32>
    tpu.vector_store %arg6[%c0_31, %c20], %22 {strides = array<i32>} : memref<256x36xf32, #tpu.memory_space<vmem>>, vector<256x4xf32>,
    %c2_32 = arith.constant 2 : index
    %c0_33 = arith.constant 0 : index
    %c0_34 = arith.constant 0 : index
    %24 = vector.load %arg5[%c2_32, %c0_33, %c0_34] : memref<18x18x4xf32, #tpu.memory_space<vmem>>, vector<16x16x4xf32>
    %25 = vector.shape_cast %24 : vector<16x16x4xf32> to vector<256x4xf32>
    %c0_35 = arith.constant 0 : index
    %c24 = arith.constant 24 : index
    %26 = vector.load %arg6[%c0_35, %c24] : memref<256x36xf32, #tpu.memory_space<vmem>>, vector<256x4xf32>
    tpu.vector_store %arg6[%c0_35, %c24], %25 {strides = array<i32>} : memref<256x36xf32, #tpu.memory_space<vmem>>, vector<256x4xf32>,
    %c2_36 = arith.constant 2 : index
    %c1_37 = arith.constant 1 : index
    %c0_38 = arith.constant 0 : index
    %27 = vector.load %arg5[%c2_36, %c1_37, %c0_38] : memref<18x18x4xf32, #tpu.memory_space<vmem>>, vector<16x16x4xf32>
    %28 = vector.shape_cast %27 : vector<16x16x4xf32> to vector<256x4xf32>
    %c0_39 = arith.constant 0 : index
    %c28 = arith.constant 28 : index
    %29 = vector.load %arg6[%c0_39, %c28] : memref<256x36xf32, #tpu.memory_space<vmem>>, vector<256x4xf32>
    tpu.vector_store %arg6[%c0_39, %c28], %28 {strides = array<i32>} : memref<256x36xf32, #tpu.memory_space<vmem>>, vector<256x4xf32>,
    %c2_40 = arith.constant 2 : index
    %c2_41 = arith.constant 2 : index
    %c0_42 = arith.constant 0 : index
    %30 = vector.load %arg5[%c2_40, %c2_41, %c0_42] : memref<18x18x4xf32, #tpu.memory_space<vmem>>, vector<16x16x4xf32>
    %31 = vector.shape_cast %30 : vector<16x16x4xf32> to vector<256x4xf32>
    %c0_43 = arith.constant 0 : index
    %c32 = arith.constant 32 : index
    %32 = vector.load %arg6[%c0_43, %c32] : memref<256x36xf32, #tpu.memory_space<vmem>>, vector<256x4xf32>
    tpu.vector_store %arg6[%c0_43, %c32], %31 {strides = array<i32>} : memref<256x36xf32, #tpu.memory_space<vmem>>, vector<256x4xf32>,
    %c0_44 = arith.constant 0 : index
    %c0_45 = arith.constant 0 : index
    %33 = vector.load %arg6[%c0_44, %c0_45] : memref<256x36xf32, #tpu.memory_space<vmem>>, vector<256x36xf32>
    %34 = arith.truncf %33 : vector<256x36xf32> to vector<256x36xbf16>
    %c0_46 = arith.constant 0 : index
    %c0_47 = arith.constant 0 : index
    %35 = vector.load %arg2[%c0_46, %c0_47] : memref<36x16xbf16, #tpu.memory_space<vmem>>, vector<36x16xbf16>
    %cst_48 = arith.constant dense<0.000000e+00> : vector<256x16xf32>
    %36 = tpu.matmul %34, %35, %cst_48 {dimension_numbers = #tpu.dot_dimension_numbers<[1], [0], [0], [1], [0, 0, 1, 1], [], []>} : vector<256x36xbf16>, vector<36x16xbf16>, vector<256x16xf32> -> vector<256x16xf32>
    %c0_49 = arith.constant 0 : index
    %c0_50 = arith.constant 0 : index
    %37 = vector.load %arg3[%c0_49, %c0_50] : memref<1x16xf32, #tpu.memory_space<vmem>>, vector<1x16xf32>
    %38 = vector.broadcast %37 : vector<1x16xf32> to vector<256x16xf32>
    %39 = arith.addf %36, %38 : vector<256x16xf32>
    %40 = vector.extract_strided_slice %39 {offsets = [0, 0], sizes = [256, 8], strides = [1, 1]} : vector<256x16xf32> to vector<256x8xf32>
    %41 = vector.extract_strided_slice %39 {offsets = [0, 8], sizes = [256, 8], strides = [1, 1]} : vector<256x16xf32> to vector<256x8xf32>
    %cst_51 = arith.constant 0.000000e+00 : f32
    %42 = vector.broadcast %cst_51 : f32 to vector<256x8xf32>
    %43 = arith.cmpf ogt, %40, %42 : vector<256x8xf32>
    %cst_52 = arith.constant 0.000000e+00 : f32
    %44 = vector.broadcast %cst_52 : f32 to vector<256x8xf32>
    %45 = arith.minimumf %40, %44 : vector<256x8xf32>
    %46 = math.exp %45 : vector<256x8xf32>
    %cst_53 = arith.constant 1.000000e+00 : f32
    %47 = vector.broadcast %cst_53 : f32 to vector<256x8xf32>
    %48 = arith.subf %46, %47 : vector<256x8xf32>
    %49 = arith.select %43, %40, %48 : vector<256x8xi1>, vector<256x8xf32>
    %50 = arith.negf %41 : vector<256x8xf32>
    %51 = math.exp %50 : vector<256x8xf32>
    %cst_54 = arith.constant 1.000000e+00 : f32
    %52 = vector.broadcast %cst_54 : f32 to vector<256x8xf32>
    %53 = arith.addf %52, %51 : vector<256x8xf32>
    %54 = arith.divf %52, %53 : vector<256x8xf32>
    %55 = arith.mulf %54, %49 : vector<256x8xf32>
    %56 = vector.shape_cast %55 : vector<256x8xf32> to vector<1x16x16x8xf32>
    %c0_55 = arith.constant 0 : index
    %c0_56 = arith.constant 0 : index
    %c0_57 = arith.constant 0 : index
    %c0_58 = arith.constant 0 : index
    %57 = vector.load %arg4[%c0_55, %c0_56, %c0_57, %c0_58] : memref<1x16x16x8xf32, #tpu.memory_space<vmem>>, vector<1x16x16x8xf32>
    tpu.vector_store %arg4[%c0_55, %c0_56, %c0_57, %c0_58], %56 {strides = array<i32>} : memref<1x16x16x8xf32, #tpu.memory_space<vmem>>, vector<1x16x16x8xf32>,
    return
  }
  func.func @transform_0(%arg0: i32) -> (i32, i32, i32, i32) {
    %c0_i32 = arith.constant 0 : i32
    %c0_i32_0 = arith.constant 0 : i32
    %c0_i32_1 = arith.constant 0 : i32
    %c0_i32_2 = arith.constant 0 : i32
    return %arg0, %c0_i32, %c0_i32_0, %c0_i32_1 : i32, i32, i32, i32
  }
  func.func @transform_1(%arg0: i32) -> (i32, i32) {
    %c0_i32 = arith.constant 0 : i32
    %c0_i32_0 = arith.constant 0 : i32
    %c0_i32_1 = arith.constant 0 : i32
    return %c0_i32, %c0_i32_0 : i32, i32
  }
  func.func @transform_2(%arg0: i32) -> (i32, i32) {
    %c0_i32 = arith.constant 0 : i32
    %c0_i32_0 = arith.constant 0 : i32
    %c0_i32_1 = arith.constant 0 : i32
    return %c0_i32, %c0_i32_0 : i32, i32
  }
  func.func @transform_3(%arg0: i32) -> (i32, i32, i32, i32) {
    %c0_i32 = arith.constant 0 : i32
    %c0_i32_0 = arith.constant 0 : i32
    %c0_i32_1 = arith.constant 0 : i32
    %c0_i32_2 = arith.constant 0 : i32
    return %arg0, %c0_i32, %c0_i32_0, %c0_i32_1 : i32, i32, i32, i32
  }
}

</mosaic_0001>

<bundles_post_ra>
// kernel: conv_elu_g.1
= control target key start
LH: loop header
LB: loop body
LE: loop exit
PB: predicated region body
PF: predicated region fallthrough
CT: control target
= control target key end

     0   :  { %s3475_s12 = smov 0   ;;  %s4937_s0 = inlined_call_operand.vmem [shape: bf16[2,16,16,4], index: 0, kind: input, shape index: {}]   ;;  %s4938_s1 = inlined_call_operand.vmem [shape: bf16[36,16], index: 1, kind: input, shape index: {}]   ;;  %s4939_s2 = inlined_call_operand.vmem [shape: f32[1,16], index: 2, kind: input, shape index: {}]   ;;  %s4940_s3 = inlined_call_operand.vmem [shape: f32[2,16,16,8], index: 3, kind: output, shape index: {}]  }
   0x1 LB: > { %s2983_s13 = sadd.s32 4294967295, %s3443_s12   ;;  %p2987_p0 = scmp.ge.s32.totalorder %s3443_s12, 1  ;;  %s3443_s12 = sphi %s3475_s12, %s13_s12  }
   0x2   : > { %p137_p1 = scmp.lt.s32.totalorder %s3443_s12, 3 }
   0x4   : > { %p138_p2 = pnand %p2987_p0, %p137_p1 }
   0x6   : > { %141 = sbr.rel (%p138_p2) target bundleno = 1182 (0x49e), region = 32 }
   0xd   : > { %vm172_vm0 = vcmask 31744   ;;  %vm175_vm1 = vcmask 25600   ;;  %p3485_p3 = scmp.lt.s32.totalorder %s2983_s13, 1  ;;  %v3445_v0 = vmov 0.0   ;;  %s3446_s19 = smov 4   ;;  %vm549_vm2 = vcmask 64544  }
   0xe   : > { %173 = vst.msk [vmem:[#allocation2] sm:$0xff] %vm172_vm0, %v3445_v0  ;;  %174 = vst.msk [vmem:[#allocation2 + $0x8] sm:$0xff] %vm172_vm0, %v3445_v0  ;;  %s3447_s20 = smov 8   ;;  %s3448_s21 = smov 12   ;;  %vm742_vm3 = vcmask 97344   ;;  %vm935_vm4 = vcmask 130144  }
   0xf   : > { %177 = vst.msk [vmem:[#allocation2 + $0x18] sm:$0xff] %vm172_vm0, %v3445_v0  ;;  %178 = vst.msk [vmem:[#allocation2 + $0x20] sm:$0xff] %vm172_vm0, %v3445_v0  ;;  %s4958_s13 = smov (!%p3485_p3, %s2983_s13), 1  ;;  %s3449_s22 = smov 16   ;;  %vm2058_vm5 = vcmask 1041408   ;;  %vm1128_vm6 = vcmask 162944  }
  0x10   : > { %180 = vst.msk [vmem:[#allocation2 + $0x30] sm:$0xff] %vm172_vm0, %v3445_v0  ;;  %181 = vst.msk [vmem:[#allocation2 + $0x38] sm:$0xff] %vm172_vm0, %v3445_v0  ;;  %s3078_s15 = sshll.u32 %s4958_s13, 7  ;;  %s3450_s23 = smov 20   ;;  %vm1321_vm7 = vcmask 195744   ;;  %vm1515_vm8 = vcmask 228544  }
  0x11   : > { %183 = vst.msk [vmem:[#allocation2 + $0x48] sm:$0xff] %vm172_vm0, %v3445_v0  ;;  %184 = vst.msk [vmem:[#allocation2 + $0x50] sm:$0xff] %vm172_vm0, %v3445_v0  ;;  %s3553_s18 = scalar_lea.vmem %s4937_s0, %s3078_s15  ;;  %s3451_s24 = smov 24   ;;  %vm1708_vm9 = vcmask 261344   ;;  %vm1901_vm10 = vcmask 294144   ;;  %vm2009_vm11 = vcmask 293888  }
  0x12   : > { %186 = vst.msk [vmem:[#allocation2 + $0x60] sm:$0xff] %vm172_vm0, %v3445_v0  ;;  %187 = vst.msk [vmem:[#allocation2 + $0x68] sm:$0xff] %vm172_vm0, %v3445_v0  ;;  %v3081_v1 = vld [vmem:[%s3553_s18] sm:$0xff]   ;;  %v3144_v2 = vld [vmem:[%s3553_s18 + $0x8] sm:$0xff]   ;;  %s3452_s25 = smov 28   ;;  %s3453_s30 = smov 32  }
  0x13   : > { %189 = vst.msk [vmem:[#allocation2 + $0x78] sm:$0xff] %vm172_vm0, %v3445_v0  ;;  %190 = vst.msk [vmem:[#allocation2 + $0x80] sm:$0xff] %vm172_vm0, %v3445_v0  ;;  %v3145_v3 = vld [vmem:[%s3553_s18 + $0x10] sm:$0xff]   ;;  %v3082_v4 = vunpack.c.l.bf16 %v3081_v1  ;;  %v3086_v5 = vunpack.c.l.bf16 %v3144_v2  ;;  %v3083_v6 = vunpack.c.h.bf16 %v3081_v1  ;;  %v3146_v8 = vld [vmem:[%s3553_s18 + $0x18] sm:$0xff]   ;;  %v3087_v13 = vunpack.c.h.bf16 %v3144_v2  ;;  %s3454_s8 = smov 120   ;;  %s3079_s9 = sshll.u32 %s4958_s13, 8 }
  0x14   : > { %192 = vst.msk [vmem:[#allocation2 + $0x90] sm:$0xff] %vm172_vm0, %v3445_v0  ;;  %193 = vst.msk [vmem:[#allocation2 + $0x98] sm:$0xff] %vm172_vm0, %v3445_v0  ;;  %v3090_v7 = vunpack.c.l.bf16 %v3145_v3  ;;  %v3147_v9 = vld [vmem:[%s3553_s18 + $0x20] sm:$0xff]   ;;  %v3148_v10 = vld [vmem:[%s3553_s18 + $0x28] sm:$0xff]   ;;  %v3094_v14 = vunpack.c.l.bf16 %v3146_v8  ;;  %v3091_v15 = vunpack.c.h.bf16 %v3145_v3  ;;  %v3095_v18 = vunpack.c.h.bf16 %v3146_v8  ;;  %s4866_s14 = scalar_lea.vmem %s4940_s3, %s3079_s9 }
  0x15   : > { %195 = vst.msk [vmem:[#allocation2 + $0xa8] sm:$0xff] %vm172_vm0, %v3445_v0  ;;  %196 = vst.msk [vmem:[#allocation2 + $0xb0] sm:$0xff] %vm172_vm0, %v3445_v0  ;;  %v389_v11 = vld [vmem:[#allocation2 + $0x1] sm:$0xff]  ;;  %v3098_v16 = vunpack.c.l.bf16 %v3147_v9  ;;  %v3149_v17 = vld [vmem:[%s3553_s18 + $0x30] sm:$0xff]   ;;  %v3102_v19 = vunpack.c.l.bf16 %v3148_v10  ;;  %v3099_v20 = vunpack.c.h.bf16 %v3147_v9  ;;  %v3103_v25 = vunpack.c.h.bf16 %v3148_v10 }
  0x16   : > { %198 = vst.msk [vmem:[#allocation2 + $0xc0] sm:$0xff] %vm172_vm0, %v3445_v0  ;;  %199 = vst.msk [vmem:[#allocation2 + $0xc8] sm:$0xff] %vm172_vm0, %v3445_v0  ;;  %453 = vrot.lane.b32.xlu0 %v389_v11, %s3446_s19  ;;  %v3106_v21 = vunpack.c.l.bf16 %v3149_v17  ;;  %v3150_v22 = vld [vmem:[%s3553_s18 + $0x38] sm:$0xff]   ;;  %v3151_v23 = vld [vmem:[%s3553_s18 + $0x40] sm:$0xff]   ;;  %v3107_v27 = vunpack.c.h.bf16 %v3149_v17 }
  0x17   : > { %201 = vst.msk [vmem:[#allocation2 + $0xd8] sm:$0xff] %vm172_vm0, %v3445_v0  ;;  %202 = vst.msk [vmem:[#allocation2 + $0xe0] sm:$0xff] %vm172_vm0, %v3445_v0  ;;  %v3152_v24 = vld [vmem:[%s3553_s18 + $0x48] sm:$0xff]   ;;  %v3110_v26 = vunpack.c.l.bf16 %v3150_v22  ;;  %v3114_v28 = vunpack.c.l.bf16 %v3151_v23  ;;  %v3153_v29 = vld [vmem:[%s3553_s18 + $0x50] sm:$0xff]   ;;  %v3111_v32 = vunpack.c.h.bf16 %v3150_v22  ;;  %v3115_v34 = vunpack.c.h.bf16 %v3151_v23 }
  0x18   : > { %204 = vst.msk [vmem:[#allocation2 + $0xf0] sm:$0xff] %vm172_vm0, %v3445_v0  ;;  %205 = vst.msk [vmem:[#allocation2 + $0xf8] sm:$0xff] %vm172_vm0, %v3445_v0  ;;  %v3154_v30 = vld [vmem:[%s3553_s18 + $0x58] sm:$0xff]   ;;  %v3155_v31 = vld [vmem:[%s3553_s18 + $0x60] sm:$0xff]   ;;  %v3118_v33 = vunpack.c.l.bf16 %v3152_v24  ;;  %v3122_v35 = vunpack.c.l.bf16 %v3153_v29  ;;  %v3119_v38 = vunpack.c.h.bf16 %v3152_v24  ;;  %v3123_v40 = vunpack.c.h.bf16 %v3153_v29 }
  0x19   : > { %207 = vst.msk [vmem:[#allocation2 + $0x108] sm:$0xff] %vm172_vm0, %v3445_v0  ;;  %208 = vst.msk [vmem:[#allocation2 + $0x110] sm:$0xff] %vm172_vm0, %v3445_v0  ;;  %v3156_v36 = vld [vmem:[%s3553_s18 + $0x68] sm:$0xff]   ;;  %v3157_v37 = vld [vmem:[%s3553_s18 + $0x70] sm:$0xff]   ;;  %v3126_v39 = vunpack.c.l.bf16 %v3154_v30  ;;  %v3130_v41 = vunpack.c.l.bf16 %v3155_v31  ;;  %v3127_v44 = vunpack.c.h.bf16 %v3154_v30  ;;  %v3131_v46 = vunpack.c.h.bf16 %v3155_v31 }
  0x1a   : > { %210 = vst.msk [vmem:[#allocation2 + $0x120] sm:$0xff] %vm172_vm0, %v3445_v0  ;;  %211 = vst.msk [vmem:[#allocation2 + $0x128] sm:$0xff] %vm172_vm0, %v3445_v0  ;;  %v325_v42 = vld [vmem:[#allocation2] sm:$0xff]  ;;  %v326_v43 = vld [vmem:[#allocation2 + $0x8] sm:$0xff]  ;;  %v3134_v45 = vunpack.c.l.bf16 %v3156_v36  ;;  %v3138_v47 = vunpack.c.l.bf16 %v3157_v37  ;;  %v3135_v48 = vunpack.c.h.bf16 %v3156_v36  ;;  %v3139_v49 = vunpack.c.h.bf16 %v3157_v37 }
  0x1b   : > { %213 = vst.msk [vmem:[#allocation2 + $0x138] sm:$0xff] %vm172_vm0, %v3445_v0  ;;  %214 = vst.msk [vmem:[#allocation2 + $0x140] sm:$0xff] %vm172_vm0, %v3445_v0 }
  0x1c   : > { %216 = vst.msk [vmem:[#allocation2 + $0x150] sm:$0xff] %vm172_vm0, %v3445_v0  ;;  %217 = vst.msk [vmem:[#allocation2 + $0x158] sm:$0xff] %vm172_vm0, %v3445_v0 }
  0x1d   : > { %219 = vst.msk [vmem:[#allocation2 + $0x168] sm:$0xff] %vm172_vm0, %v3445_v0  ;;  %220 = vst.msk [vmem:[#allocation2 + $0x170] sm:$0xff] %vm172_vm0, %v3445_v0 }
  0x1e   : > { %222 = vst.msk [vmem:[#allocation2 + $0x180] sm:$0xff] %vm172_vm0, %v3445_v0  ;;  %223 = vst.msk [vmem:[#allocation2 + $0x188] sm:$0xff] %vm172_vm0, %v3445_v0 }
  0x1f   : > { %225 = vst.msk [vmem:[#allocation2 + $0x198] sm:$0xff] %vm172_vm0, %v3445_v0  ;;  %226 = vst.msk [vmem:[#allocation2 + $0x1a0] sm:$0xff] %vm172_vm0, %v3445_v0 }
  0x20   : > { %176 = vst.msk [vmem:[#allocation2 + $0x10] sm:$0x3] %vm175_vm1, %v3445_v0  ;;  %179 = vst.msk [vmem:[#allocation2 + $0x28] sm:$0x3] %vm175_vm1, %v3445_v0 }
  0x21   : > { %182 = vst.msk [vmem:[#allocation2 + $0x40] sm:$0x3] %vm175_vm1, %v3445_v0  ;;  %185 = vst.msk [vmem:[#allocation2 + $0x58] sm:$0x3] %vm175_vm1, %v3445_v0 }
  0x22   : > { %188 = vst.msk [vmem:[#allocation2 + $0x70] sm:$0x3] %vm175_vm1, %v3445_v0  ;;  %191 = vst.msk [vmem:[#allocation2 + $0x88] sm:$0x3] %vm175_vm1, %v3445_v0 }
  0x23   : > { %194 = vst.msk [vmem:[#allocation2 + $0xa0] sm:$0x3] %vm175_vm1, %v3445_v0  ;;  %197 = vst.msk [vmem:[#allocation2 + $0xb8] sm:$0x3] %vm175_vm1, %v3445_v0 }
  0x24   : > { %200 = vst.msk [vmem:[#allocation2 + $0xd0] sm:$0x3] %vm175_vm1, %v3445_v0  ;;  %203 = vst.msk [vmem:[#allocation2 + $0xe8] sm:$0x3] %vm175_vm1, %v3445_v0 }
  0x25   : > { %206 = vst.msk [vmem:[#allocation2 + $0x100] sm:$0x3] %vm175_vm1, %v3445_v0  ;;  %209 = vst.msk [vmem:[#allocation2 + $0x118] sm:$0x3] %vm175_vm1, %v3445_v0 }
  0x26   : > { %212 = vst.msk [vmem:[#allocation2 + $0x130] sm:$0x3] %vm175_vm1, %v3445_v0  ;;  %215 = vst.msk [vmem:[#allocation2 + $0x148] sm:$0x3] %vm175_vm1, %v3445_v0 }
  0x27   : > { %218 = vst.msk [vmem:[#allocation2 + $0x160] sm:$0x3] %vm175_vm1, %v3445_v0  ;;  %221 = vst.msk [vmem:[#allocation2 + $0x178] sm:$0x3] %vm175_vm1, %v3445_v0  ;;  %v390_v12 = vld [vmem:[#allocation2 + $0x9] sm:$0xff] }
  0x28   : > { %224 = vst.msk [vmem:[#allocation2 + $0x190] sm:$0x3] %vm175_vm1, %v3445_v0  ;;  %227 = vst.msk [vmem:[#allocation2 + $0x1a8] sm:$0x3] %vm175_vm1, %v3445_v0  ;;  %455 = vrot.lane.b32.xlu0 %v390_v12, %s3446_s19 }
  0x29   : > { %293 = vst.msk [vmem:[#allocation2 + $0x19] sm:$0xff] %vm172_vm0, %v3082_v4  ;;  %295 = vst.msk [vmem:[#allocation2 + $0x31] sm:$0xff] %vm172_vm0, %v3086_v5 }
  0x2a   : > { %294 = vst.msk [vmem:[#allocation2 + $0x21] sm:$0xff] %vm172_vm0, %v3083_v6  ;;  %297 = vst.msk [vmem:[#allocation2 + $0x49] sm:$0xff] %vm172_vm0, %v3090_v7 }
  0x2b   : > { %296 = vst.msk [vmem:[#allocation2 + $0x39] sm:$0xff] %vm172_vm0, %v3087_v13  ;;  %299 = vst.msk [vmem:[#allocation2 + $0x61] sm:$0xff] %vm172_vm0, %v3094_v14 }
  0x2c   : > { %298 = vst.msk [vmem:[#allocation2 + $0x51] sm:$0xff] %vm172_vm0, %v3091_v15  ;;  %301 = vst.msk [vmem:[#allocation2 + $0x79] sm:$0xff] %vm172_vm0, %v3098_v16 }
  0x2d   : > { %300 = vst.msk [vmem:[#allocation2 + $0x69] sm:$0xff] %vm172_vm0, %v3095_v18  ;;  %303 = vst.msk [vmem:[#allocation2 + $0x91] sm:$0xff] %vm172_vm0, %v3102_v19 }
  0x2e   : > { %302 = vst.msk [vmem:[#allocation2 + $0x81] sm:$0xff] %vm172_vm0, %v3099_v20  ;;  %305 = vst.msk [vmem:[#allocation2 + $0xa9] sm:$0xff] %vm172_vm0, %v3106_v21 }
  0x2f   : > { %304 = vst.msk [vmem:[#allocation2 + $0x99] sm:$0xff] %vm172_vm0, %v3103_v25  ;;  %307 = vst.msk [vmem:[#allocation2 + $0xc1] sm:$0xff] %vm172_vm0, %v3110_v26 }
  0x30   : > { %306 = vst.msk [vmem:[#allocation2 + $0xb1] sm:$0xff] %vm172_vm0, %v3107_v27  ;;  %309 = vst.msk [vmem:[#allocation2 + $0xd9] sm:$0xff] %vm172_vm0, %v3114_v28  ;;  %v3602_v50 = vld [vmem:[#allocation2 + $0x19] sm:$0xff]  ;;  %v3604_v51 = vld [vmem:[#allocation2 + $0x31] sm:$0xff] }
  0x31   : > { %308 = vst.msk [vmem:[#allocation2 + $0xc9] sm:$0xff] %vm172_vm0, %v3111_v32  ;;  %311 = vst.msk [vmem:[#allocation2 + $0xf1] sm:$0xff] %vm172_vm0, %v3118_v33  ;;  %457 = vrot.lane.b32.xlu1 %v3602_v50, %s3446_s19  ;;  %461 = vrot.lane.b32.xlu0 %v3604_v51, %s3446_s19  ;;  %v3612_v52 = vld [vmem:[#allocation2 + $0x21] sm:$0xff]  ;;  %v3614_v53 = vld [vmem:[#allocation2 + $0x49] sm:$0xff] }
  0x32   : > { %310 = vst.msk [vmem:[#allocation2 + $0xe1] sm:$0xff] %vm172_vm0, %v3115_v34  ;;  %313 = vst.msk [vmem:[#allocation2 + $0x109] sm:$0xff] %vm172_vm0, %v3122_v35  ;;  %v3620_v54 = vld [vmem:[#allocation2 + $0x39] sm:$0xff]  ;;  %v397_v55 = vld [vmem:[#allocation2 + $0x61] sm:$0xff] }
  0x33   : > { %357 = vst.msk [vmem:[#allocation3] sm:$0xff] %vm172_vm0, %v325_v42  ;;  %358 = vst.msk [vmem:[#allocation3 + $0x8] sm:$0xff] %vm172_vm0, %v326_v43  ;;  %v3625_v56 = vld [vmem:[#allocation2 + $0x51] sm:$0xff]  ;;  %v399_v57 = vld [vmem:[#allocation2 + $0x79] sm:$0xff] }
  0x34   : > { %312 = vst.msk [vmem:[#allocation2 + $0xf9] sm:$0xff] %vm172_vm0, %v3119_v38  ;;  %315 = vst.msk [vmem:[#allocation2 + $0x121] sm:$0xff] %vm172_vm0, %v3126_v39  ;;  %v398_v58 = vld [vmem:[#allocation2 + $0x69] sm:$0xff]  ;;  %v401_v59 = vld [vmem:[#allocation2 + $0x91] sm:$0xff] }
  0x35   : > { %314 = vst.msk [vmem:[#allocation2 + $0x111] sm:$0xff] %vm172_vm0, %v3123_v40  ;;  %317 = vst.msk [vmem:[#allocation2 + $0x139] sm:$0xff] %vm172_vm0, %v3130_v41  ;;  %459 = vrot.lane.b32.xlu1 %v3612_v52, %s3446_s19  ;;  %465 = vrot.lane.b32.xlu0 %v3614_v53, %s3446_s19  ;;  %v400_v60 = vld [vmem:[#allocation2 + $0x81] sm:$0xff]  ;;  %v403_v61 = vld [vmem:[#allocation2 + $0xa9] sm:$0xff] }
  0x36   : > { %316 = vst.msk [vmem:[#allocation2 + $0x129] sm:$0xff] %vm172_vm0, %v3127_v44  ;;  %319 = vst.msk [vmem:[#allocation2 + $0x151] sm:$0xff] %vm172_vm0, %v3134_v45  ;;  %v3632_v62 = vld [vmem:[#allocation2 + $0x18] sm:$0xff]  ;;  %v3636_v63 = vld [vmem:[#allocation2 + $0x30] sm:$0xff] }
  0x37   : > { %318 = vst.msk [vmem:[#allocation2 + $0x141] sm:$0xff] %vm172_vm0, %v3131_v46  ;;  %321 = vst.msk [vmem:[#allocation2 + $0x169] sm:$0xff] %vm172_vm0, %v3138_v47  ;;  %v3638_v0 = vld [vmem:[#allocation2 + $0x20] sm:$0xff]  ;;  %v3644_v2 = vld [vmem:[#allocation2 + $0x48] sm:$0xff] }
  0x38   : > { %320 = vst.msk [vmem:[#allocation2 + $0x159] sm:$0xff] %vm172_vm0, %v3135_v48  ;;  %322 = vst.msk [vmem:[#allocation2 + $0x171] sm:$0xff] %vm172_vm0, %v3139_v49  ;;  %v402_v1 = vld [vmem:[#allocation2 + $0x99] sm:$0xff]  ;;  %v405_v3 = vld [vmem:[#allocation2 + $0xc1] sm:$0xff] }
  0x39   : > { %463 = vrot.lane.b32.xlu1 %v3620_v54, %s3446_s19  ;;  %469 = vrot.lane.b32.xlu0 %v397_v55, %s3446_s19  ;;  %359 = vst.msk [vmem:[#allocation3 + $0x10] sm:$0xff] %vm172_vm0, %v3632_v62  ;;  %361 = vst.msk [vmem:[#allocation3 + $0x20] sm:$0xff] %vm172_vm0, %v3636_v63  ;;  %v3650_v4 = vld [vmem:[#allocation2 + $0x38] sm:$0xff]  ;;  %v3652_v5 = vld [vmem:[#allocation2 + $0x60] sm:$0xff] }
  0x3a   : > { %360 = vst.msk [vmem:[#allocation3 + $0x18] sm:$0xff] %vm172_vm0, %v3638_v0  ;;  %363 = vst.msk [vmem:[#allocation3 + $0x30] sm:$0xff] %vm172_vm0, %v3644_v2  ;;  %v3658_v6 = vld [vmem:[#allocation2 + $0x50] sm:$0xff]  ;;  %v3660_v7 = vld [vmem:[#allocation2 + $0x78] sm:$0xff] }
  0x3b   : > { %362 = vst.msk [vmem:[#allocation3 + $0x28] sm:$0xff] %vm172_vm0, %v3650_v4  ;;  %365 = vst.msk [vmem:[#allocation3 + $0x40] sm:$0xff] %vm172_vm0, %v3652_v5  ;;  %v3662_v8 = vld [vmem:[#allocation2 + $0x68] sm:$0xff]  ;;  %v3670_v9 = vld [vmem:[#allocation2 + $0x90] sm:$0xff] }
  0x3c   : > { %364 = vst.msk [vmem:[#allocation3 + $0x38] sm:$0xff] %vm172_vm0, %v3658_v6  ;;  %367 = vst.msk [vmem:[#allocation3 + $0x50] sm:$0xff] %vm172_vm0, %v3660_v7  ;;  %v3672_v10 = vld [vmem:[#allocation2 + $0x80] sm:$0xff]  ;;  %v3674_v11 = vld [vmem:[#allocation2 + $0xa8] sm:$0xff] }
  0x3d   : > { %467 = vrot.lane.b32.xlu1 %v3625_v56, %s3446_s19  ;;  %473 = vrot.lane.b32.xlu0 %v399_v57, %s3446_s19  ;;  %366 = vst.msk [vmem:[#allocation3 + $0x48] sm:$0xff] %vm172_vm0, %v3662_v8  ;;  %v404_v12 = vld [vmem:[#allocation2 + $0xb1] sm:$0xff]  ;;  %v3676_v13 = vld [vmem:[#allocation2 + $0xd9] sm:$0xff]  ;;  %369 = vst.msk [vmem:[#allocation3 + $0x60] sm:$0xff] %vm172_vm0, %v3670_v9 }
  0x3e   : > { %368 = vst.msk [vmem:[#allocation3 + $0x58] sm:$0xff] %vm172_vm0, %v3672_v10  ;;  %371 = vst.msk [vmem:[#allocation3 + $0x70] sm:$0xff] %vm172_vm0, %v3674_v11  ;;  %v3684_v14 = vld [vmem:[#allocation2 + $0x98] sm:$0xff]  ;;  %v3686_v15 = vld [vmem:[#allocation2 + $0xc0] sm:$0xff] }
  0x3f   : > { %v3688_v16 = vld [vmem:[#allocation2 + $0xb0] sm:$0xff]  ;;  %370 = vst.msk [vmem:[#allocation3 + $0x68] sm:$0xff] %vm172_vm0, %v3684_v14  ;;  %373 = vst.msk [vmem:[#allocation3 + $0x80] sm:$0xff] %vm172_vm0, %v3686_v15  ;;  %v3698_v17 = vld [vmem:[#allocation2 + $0xd8] sm:$0xff] }
  0x40   : > { %372 = vst.msk [vmem:[#allocation3 + $0x78] sm:$0xff] %vm172_vm0, %v3688_v16  ;;  %v3700_v18 = vld [vmem:[#allocation2 + $0xc8] sm:$0xff]  ;;  %v3702_v19 = vld [vmem:[#allocation2 + $0xf0] sm:$0xff]  ;;  %375 = vst.msk [vmem:[#allocation3 + $0x90] sm:$0xff] %vm172_vm0, %v3698_v17 }
  0x41   : > { %471 = vrot.lane.b32.xlu1 %v398_v58, %s3446_s19  ;;  %477 = vrot.lane.b32.xlu0 %v401_v59, %s3446_s19  ;;  %374 = vst.msk [vmem:[#allocation3 + $0x88] sm:$0xff] %vm172_vm0, %v3700_v18  ;;  %377 = vst.msk [vmem:[#allocation3 + $0xa0] sm:$0xff] %vm172_vm0, %v3702_v19  ;;  %v3710_v20 = vld [vmem:[#allocation2 + $0xe0] sm:$0xff]  ;;  %v3712_v21 = vld [vmem:[#allocation2 + $0x108] sm:$0xff] }
  0x42   : > { %v3714_v22 = vld [vmem:[#allocation2 + $0xf8] sm:$0xff]  ;;  %376 = vst.msk [vmem:[#allocation3 + $0x98] sm:$0xff] %vm172_vm0, %v3710_v20  ;;  %379 = vst.msk [vmem:[#allocation3 + $0xb0] sm:$0xff] %vm172_vm0, %v3712_v21  ;;  %v3725_v23 = vld [vmem:[#allocation2 + $0x120] sm:$0xff] }
  0x43   : > { %378 = vst.msk [vmem:[#allocation3 + $0xa8] sm:$0xff] %vm172_vm0, %v3714_v22  ;;  %v3727_v24 = vld [vmem:[#allocation2 + $0x110] sm:$0xff]  ;;  %381 = vst.msk [vmem:[#allocation3 + $0xc0] sm:$0xff] %vm172_vm0, %v3725_v23  ;;  %v3738_v27 = vld [vmem:[#allocation2 + $0x138] sm:$0xff] }
  0x44   : > { %v406_v25 = vld [vmem:[#allocation2 + $0xc9] sm:$0xff]  ;;  %v3729_v26 = vld [vmem:[#allocation2 + $0xf1] sm:$0xff]  ;;  %380 = vst.msk [vmem:[#allocation3 + $0xb8] sm:$0xff] %vm172_vm0, %v3727_v24  ;;  %v3742_v29 = vld [vmem:[#allocation2 + $0xe1] sm:$0xff] }
  0x45   : > { %475 = vrot.lane.b32.xlu1 %v400_v60, %s3446_s19  ;;  %481 = vrot.lane.b32.xlu0 %v403_v61, %s3446_s19  ;;  %v3740_v28 = vld [vmem:[#allocation2 + $0x128] sm:$0xff]  ;;  %383 = vst.msk [vmem:[#allocation3 + $0xd0] sm:$0xff] %vm172_vm0, %v3738_v27  ;;  %v3754_v31 = vld [vmem:[#allocation2 + $0x150] sm:$0xff]  ;;  %v3756_v32 = vld [vmem:[#allocation2 + $0x140] sm:$0xff] }
  0x46   : > { %v3744_v30 = vld [vmem:[#allocation2 + $0x109] sm:$0xff]  ;;  %382 = vst.msk [vmem:[#allocation3 + $0xc8] sm:$0xff] %vm172_vm0, %v3740_v28  ;;  %v3758_v33 = vld [vmem:[#allocation2 + $0xf9] sm:$0xff]  ;;  %v3760_v34 = vld [vmem:[#allocation2 + $0x121] sm:$0xff] }
  0x47   : > { %4947 = vst [vmem:[#allocation4_spill] sm:$0xff] %v3760_v34  ;;  %385 = vst.msk [vmem:[#allocation3 + $0xe0] sm:$0xff] %vm172_vm0, %v3754_v31  ;;  %v3770_v35 = vld [vmem:[#allocation2 + $0x168] sm:$0xff]  ;;  %v3772_v36 = vld [vmem:[#allocation2 + $0x158] sm:$0xff] }
  0x48   : > { %384 = vst.msk [vmem:[#allocation3 + $0xd8] sm:$0xff] %vm172_vm0, %v3756_v32  ;;  %v3774_v37 = vld [vmem:[#allocation2 + $0x111] sm:$0xff]  ;;  %v415_v38 = vld [vmem:[#allocation2 + $0x139] sm:$0xff]  ;;  %387 = vst.msk [vmem:[#allocation3 + $0xf0] sm:$0xff] %vm172_vm0, %v3770_v35 }
  0x49   : > { %479 = vrot.lane.b32.xlu1 %v402_v1, %s3446_s19  ;;  %485 = vrot.lane.b32.xlu0 %v405_v3, %s3446_s19  ;;  %386 = vst.msk [vmem:[#allocation3 + $0xe8] sm:$0xff] %vm172_vm0, %v3772_v36  ;;  %v3783_v39 = vld [vmem:[#allocation2 + $0x170] sm:$0xff]  ;;  %v3790_v42 = vld [vmem:[%s3553_s18 + $0x78] sm:$0xff]   ;;  %v416_v44 = vld [vmem:[#allocation2 + $0x141] sm:$0xff] }
  0x4a   : > { %v3785_v40 = vld [vmem:[#allocation2 + $0x129] sm:$0xff]  ;;  %v417_v41 = vld [vmem:[#allocation2 + $0x151] sm:$0xff]  ;;  %388 = vst.msk [vmem:[#allocation3 + $0xf8] sm:$0xff] %vm172_vm0, %v3783_v39  ;;  %4948 = vst [vmem:[#allocation5_spill] sm:$0xff] %v3790_v42  ;;  %v3142_v43 = vunpack.c.l.bf16 %v3790_v42 }
  0x4b   : > { %v419_v45 = vld [vmem:[#allocation2 + $0x169] sm:$0xff]  ;;  %v418_v46 = vld [vmem:[#allocation2 + $0x159] sm:$0xff]  ;;  %v420_v48 = vld [vmem:[#allocation2 + $0x171] sm:$0xff] }
  0x4c   : > { %323 = vst.msk [vmem:[#allocation2 + $0x181] sm:$0xff] %vm172_vm0, %v3142_v43  ;;  %v582_v47 = vld [vmem:[#allocation2 + $0x2] sm:$0xff]  ;;  %v3801_v49 = vld [vmem:[#allocation2 + $0x1a] sm:$0xff]  ;;  %v583_v55 = vld [vmem:[#allocation2 + $0xa] sm:$0xff] }
  0x4d   : > { %483 = vrot.lane.b32.xlu1 %v404_v12, %s3446_s19  ;;  %489 = vrot.lane.b32.xlu0 %v3676_v13, %s3446_s19  ;;  %v3806_v57 = vld [vmem:[#allocation2 + $0x32] sm:$0xff]  ;;  %v3811_v58 = vld [vmem:[#allocation2 + $0x22] sm:$0xff]  ;;  %v3813_v59 = vld [vmem:[#allocation2 + $0x4a] sm:$0xff] }
  0x4e   : > { %v3819_v60 = vld [vmem:[#allocation2 + $0x3a] sm:$0xff]  ;;  %v3821_v61 = vld [vmem:[#allocation2 + $0x62] sm:$0xff]  ;;  %v3827_v1 = vld [vmem:[#allocation2 + $0x52] sm:$0xff] }
  0x4f   : > { %4949 = vst [vmem:[#allocation6_spill] sm:$0xff] %v3821_v61  ;;  %v592_v3 = vld [vmem:[#allocation2 + $0x7a] sm:$0xff]  ;;  %v3832_v12 = vld [vmem:[#allocation2 + $0x6a] sm:$0xff] }
  0x50   : > { %4950 = vst [vmem:[#allocation7_spill] sm:$0xff] %v3832_v12  ;;  %v595_v43 = vld [vmem:[#allocation2 + $0x9a] sm:$0xff]  ;;  %v612_v42 = vld [vmem:[#allocation2 + $0x16a] sm:$0xff] }
  0x51   : > { %487 = vrot.lane.b32.xlu1 %v406_v25, %s3446_s19  ;;  %493 = vrot.lane.b32.xlu0 %v3729_v26, %s3446_s19  ;;  %v594_v25 = vld [vmem:[#allocation2 + $0x92] sm:$0xff] }
  0x55   : > { %491 = vrot.lane.b32.xlu1 %v3742_v29, %s3446_s19  ;;  %497 = vrot.lane.b32.xlu0 %v3744_v30, %s3446_s19 }
  0x59   : > { %495 = vrot.lane.b32.xlu1 %v3758_v33, %s3446_s19  ;;  %501 = vrot.lane.b32.xlu0 %v3760_v34, %s3446_s19 }
  0x5d   : > { %499 = vrot.lane.b32.xlu1 %v3774_v37, %s3446_s19  ;;  %505 = vrot.lane.b32.xlu0 %v415_v38, %s3446_s19  ;;  %v593_v38 = vld [vmem:[#allocation2 + $0x82] sm:$0xff] }
  0x61   : > { %503 = vrot.lane.b32.xlu1 %v3785_v40, %s3446_s19  ;;  %509 = vrot.lane.b32.xlu0 %v417_v41, %s3446_s19  ;;  %v596_v41 = vld [vmem:[#allocation2 + $0xaa] sm:$0xff] }
  0x65   : > { %507 = vrot.lane.b32.xlu1 %v416_v44, %s3446_s19  ;;  %513 = vrot.lane.b32.xlu0 %v419_v45, %s3446_s19  ;;  %v598_v44 = vld [vmem:[#allocation2 + $0xc2] sm:$0xff]  ;;  %v597_v45 = vld [vmem:[#allocation2 + $0xb2] sm:$0xff] }
  0x69   : > { %511 = vrot.lane.b32.xlu1 %v418_v46, %s3446_s19  ;;  %646 = vrot.lane.b32.xlu0 %v582_v47, %s3447_s20  ;;  %v3841_v46 = vld [vmem:[#allocation2 + $0xda] sm:$0xff]  ;;  %v599_v47 = vld [vmem:[#allocation2 + $0xca] sm:$0xff] }
  0x6d   : > { %515 = vrot.lane.b32.xlu1 %v420_v48, %s3446_s19  ;;  %650 = vrot.lane.b32.xlu0 %v3801_v49, %s3447_s20  ;;  %v3846_v48 = vld [vmem:[#allocation2 + $0xf2] sm:$0xff] }
  0x71   : > { %648 = vrot.lane.b32.xlu1 %v583_v55, %s3447_s20  ;;  %654 = vrot.lane.b32.xlu0 %v3806_v57, %s3447_s20  ;;  %v3851_v55 = vld [vmem:[#allocation2 + $0xe2] sm:$0xff] }
  0x75   : > { %652 = vrot.lane.b32.xlu1 %v3811_v58, %s3447_s20  ;;  %658 = vrot.lane.b32.xlu0 %v3813_v59, %s3447_s20 }
  0x79   : > { %656 = vrot.lane.b32.xlu1 %v3819_v60, %s3447_s20  ;;  %662 = vrot.lane.b32.xlu0 %v3821_v61, %s3447_s20 }
  0x7d   : > { %660 = vrot.lane.b32.xlu1 %v3827_v1, %s3447_s20  ;;  %666 = vrot.lane.b32.xlu0 %v592_v3, %s3447_s20  ;;  %v3853_v3 = vld [vmem:[#allocation2 + $0x10a] sm:$0xff] }
  0x81   : > { %664 = vrot.lane.b32.xlu1 %v3832_v12, %s3447_s20  ;;  %670 = vrot.lane.b32.xlu0 %v594_v25, %s3447_s20  ;;  %v3859_v25 = vld [vmem:[#allocation2 + $0xfa] sm:$0xff] }
  0x85   : > { %668 = vrot.lane.b32.xlu1 %v593_v38, %s3447_s20  ;;  %674 = vrot.lane.b32.xlu0 %v596_v41, %s3447_s20  ;;  %v3861_v38 = vld [vmem:[#allocation2 + $0x122] sm:$0xff]  ;;  %v3867_v41 = vld [vmem:[#allocation2 + $0x112] sm:$0xff] }
  0x86   : > { %4951 = vst [vmem:[#allocation8_spill] sm:$0xff] %v3861_v38 }
  0x89   : > { %672 = vrot.lane.b32.xlu1 %v595_v43, %s3447_s20  ;;  %678 = vrot.lane.b32.xlu0 %v598_v44, %s3447_s20  ;;  %v608_v43 = vld [vmem:[#allocation2 + $0x13a] sm:$0xff]  ;;  %v454_v44 = vpop.permute.xlu0 %453 }
  0x8a   : > { %550 = vst.msk [vmem:[#allocation3] sm:$0xff] %vm549_vm2, %v454_v44 }
  0x8d   : > { %676 = vrot.lane.b32.xlu1 %v597_v45, %s3447_s20  ;;  %682 = vrot.lane.b32.xlu0 %v3841_v46, %s3447_s20  ;;  %v3873_v45 = vld [vmem:[#allocation2 + $0x12a] sm:$0xff] }
  0x91   : > { %680 = vrot.lane.b32.xlu1 %v599_v47, %s3447_s20  ;;  %686 = vrot.lane.b32.xlu0 %v3846_v48, %s3447_s20  ;;  %v610_v47 = vld [vmem:[#allocation2 + $0x152] sm:$0xff] }
  0x95   : > { %684 = vrot.lane.b32.xlu1 %v3851_v55, %s3447_s20  ;;  %690 = vrot.lane.b32.xlu0 %v3853_v3, %s3447_s20 }
  0x99   : > { %688 = vrot.lane.b32.xlu1 %v3859_v25, %s3447_s20  ;;  %694 = vrot.lane.b32.xlu0 %v3861_v38, %s3447_s20  ;;  %v609_v38 = vld [vmem:[#allocation2 + $0x142] sm:$0xff] }
  0x9a   : > { %v456_v61 = vpop.permute.xlu0 %455 }
  0x9b   : > { %551 = vst.msk [vmem:[#allocation3 + $0x8] sm:$0xff] %vm549_vm2, %v456_v61 }
  0x9d   : > { %692 = vrot.lane.b32.xlu1 %v3867_v41, %s3447_s20  ;;  %698 = vrot.lane.b32.xlu0 %v608_v43, %s3447_s20  ;;  %v611_v43 = vld [vmem:[#allocation2 + $0x15a] sm:$0xff] }
  0xa1   : > { %696 = vrot.lane.b32.xlu1 %v3873_v45, %s3447_s20  ;;  %702 = vrot.lane.b32.xlu0 %v610_v47, %s3447_s20 }
  0xa3   : > { %v458_v12 = vpop.permute.xlu1 %457  ;;  %v462_v44 = vpop.permute.xlu0 %461 }
  0xa4   : > { %552 = vst.msk [vmem:[#allocation3 + $0x10] sm:$0xff] %vm549_vm2, %v458_v12  ;;  %554 = vst.msk [vmem:[#allocation3 + $0x20] sm:$0xff] %vm549_vm2, %v462_v44  ;;  %v613_v12 = vld [vmem:[#allocation2 + $0x172] sm:$0xff] }
  0xa5   : > { %700 = vrot.lane.b32.xlu1 %v609_v38, %s3447_s20  ;;  %706 = vrot.lane.b32.xlu0 %v612_v42, %s3447_s20 }
  0xa7   : > { %v460_v34 = vpop.permute.xlu1 %459  ;;  %v466_v61 = vpop.permute.xlu0 %465 }
  0xa8   : > { %553 = vst.msk [vmem:[#allocation3 + $0x18] sm:$0xff] %vm549_vm2, %v460_v34  ;;  %556 = vst.msk [vmem:[#allocation3 + $0x30] sm:$0xff] %vm549_vm2, %v466_v61 }
  0xa9   : > { %704 = vrot.lane.b32.xlu1 %v611_v43, %s3447_s20  ;;  %839 = vrot.lane.b32.xlu0 %v3632_v62, %s3448_s21 }
  0xab   : > { %v464_v47 = vpop.permute.xlu1 %463  ;;  %v470_v44 = vpop.permute.xlu0 %469 }
  0xac   : > { %555 = vst.msk [vmem:[#allocation3 + $0x28] sm:$0xff] %vm549_vm2, %v464_v47  ;;  %558 = vst.msk [vmem:[#allocation3 + $0x40] sm:$0xff] %vm549_vm2, %v470_v44 }
  0xad   : > { %708 = vrot.lane.b32.xlu1 %v613_v12, %s3447_s20  ;;  %843 = vrot.lane.b32.xlu0 %v3636_v63, %s3448_s21 }
  0xaf   : > { %v468_v34 = vpop.permute.xlu1 %467  ;;  %v474_v42 = vpop.permute.xlu0 %473 }
  0xb0   : > { %557 = vst.msk [vmem:[#allocation3 + $0x38] sm:$0xff] %vm549_vm2, %v468_v34  ;;  %560 = vst.msk [vmem:[#allocation3 + $0x50] sm:$0xff] %vm549_vm2, %v474_v42 }
  0xb1   : > { %841 = vrot.lane.b32.xlu1 %v3638_v0, %s3448_s21  ;;  %847 = vrot.lane.b32.xlu0 %v3644_v2, %s3448_s21 }
  0xb3   : > { %v472_v62 = vpop.permute.xlu1 %471  ;;  %v478_v38 = vpop.permute.xlu0 %477 }
  0xb4   : > { %559 = vst.msk [vmem:[#allocation3 + $0x48] sm:$0xff] %vm549_vm2, %v472_v62  ;;  %562 = vst.msk [vmem:[#allocation3 + $0x60] sm:$0xff] %vm549_vm2, %v478_v38 }
  0xb5   : > { %845 = vrot.lane.b32.xlu1 %v3650_v4, %s3448_s21  ;;  %851 = vrot.lane.b32.xlu0 %v3652_v5, %s3448_s21 }
  0xb7   : > { %v476_v43 = vpop.permute.xlu1 %475  ;;  %v482_v61 = vpop.permute.xlu0 %481 }
  0xb8   : > { %561 = vst.msk [vmem:[#allocation3 + $0x58] sm:$0xff] %vm549_vm2, %v476_v43  ;;  %564 = vst.msk [vmem:[#allocation3 + $0x70] sm:$0xff] %vm549_vm2, %v482_v61 }
  0xb9   : > { %849 = vrot.lane.b32.xlu1 %v3658_v6, %s3448_s21  ;;  %855 = vrot.lane.b32.xlu0 %v3660_v7, %s3448_s21 }
  0xbb   : > { %v480_v0 = vpop.permute.xlu1 %479  ;;  %v486_v12 = vpop.permute.xlu0 %485 }
  0xbc   : > { %563 = vst.msk [vmem:[#allocation3 + $0x68] sm:$0xff] %vm549_vm2, %v480_v0  ;;  %566 = vst.msk [vmem:[#allocation3 + $0x80] sm:$0xff] %vm549_vm2, %v486_v12 }
  0xbd   : > { %853 = vrot.lane.b32.xlu1 %v3662_v8, %s3448_s21  ;;  %859 = vrot.lane.b32.xlu0 %v3670_v9, %s3448_s21 }
  0xbf   : > { %v484_v47 = vpop.permute.xlu1 %483  ;;  %v490_v44 = vpop.permute.xlu0 %489 }
  0xc0   : > { %565 = vst.msk [vmem:[#allocation3 + $0x78] sm:$0xff] %vm549_vm2, %v484_v47  ;;  %568 = vst.msk [vmem:[#allocation3 + $0x90] sm:$0xff] %vm549_vm2, %v490_v44  ;;  %v805_v47 = vld [vmem:[#allocation2 + $0x180] sm:$0xff] }
  0xc1   : > { %857 = vrot.lane.b32.xlu1 %v3672_v10, %s3448_s21  ;;  %863 = vrot.lane.b32.xlu0 %v3674_v11, %s3448_s21 }
  0xc3   : > { %v488_v34 = vpop.permute.xlu1 %487  ;;  %v494_v42 = vpop.permute.xlu0 %493 }
  0xc4   : > { %567 = vst.msk [vmem:[#allocation3 + $0x88] sm:$0xff] %vm549_vm2, %v488_v34  ;;  %570 = vst.msk [vmem:[#allocation3 + $0xa0] sm:$0xff] %vm549_vm2, %v494_v42 }
  0xc5   : > { %861 = vrot.lane.b32.xlu1 %v3684_v14, %s3448_s21  ;;  %867 = vrot.lane.b32.xlu0 %v3686_v15, %s3448_s21 }
  0xc7   : > { %v492_v9 = vpop.permute.xlu1 %491  ;;  %v498_v62 = vpop.permute.xlu0 %497 }
  0xc8   : > { %569 = vst.msk [vmem:[#allocation3 + $0x98] sm:$0xff] %vm549_vm2, %v492_v9  ;;  %572 = vst.msk [vmem:[#allocation3 + $0xb0] sm:$0xff] %vm549_vm2, %v498_v62 }
  0xc9   : > { %865 = vrot.lane.b32.xlu1 %v3688_v16, %s3448_s21  ;;  %871 = vrot.lane.b32.xlu0 %v3698_v17, %s3448_s21 }
  0xcb   : > { %v496_v11 = vpop.permute.xlu1 %495  ;;  %v502_v38 = vpop.permute.xlu0 %501 }
  0xcc   : > { %571 = vst.msk [vmem:[#allocation3 + $0xa8] sm:$0xff] %vm549_vm2, %v496_v11  ;;  %574 = vst.msk [vmem:[#allocation3 + $0xc0] sm:$0xff] %vm549_vm2, %v502_v38 }
  0xcd   : > { %869 = vrot.lane.b32.xlu1 %v3700_v18, %s3448_s21  ;;  %875 = vrot.lane.b32.xlu0 %v3702_v19, %s3448_s21 }
  0xcf   : > { %v500_v14 = vpop.permute.xlu1 %499  ;;  %v506_v15 = vpop.permute.xlu0 %505 }
  0xd0   : > { %573 = vst.msk [vmem:[#allocation3 + $0xb8] sm:$0xff] %vm549_vm2, %v500_v14  ;;  %576 = vst.msk [vmem:[#allocation3 + $0xd0] sm:$0xff] %vm549_vm2, %v506_v15 }
  0xd1   : > { %873 = vrot.lane.b32.xlu1 %v3710_v20, %s3448_s21  ;;  %879 = vrot.lane.b32.xlu0 %v3712_v21, %s3448_s21 }
  0xd3   : > { %v504_v16 = vpop.permute.xlu1 %503  ;;  %v510_v17 = vpop.permute.xlu0 %509 }
  0xd4   : > { %575 = vst.msk [vmem:[#allocation3 + $0xc8] sm:$0xff] %vm549_vm2, %v504_v16  ;;  %578 = vst.msk [vmem:[#allocation3 + $0xe0] sm:$0xff] %vm549_vm2, %v510_v17 }
  0xd5   : > { %877 = vrot.lane.b32.xlu1 %v3714_v22, %s3448_s21  ;;  %883 = vrot.lane.b32.xlu0 %v3725_v23, %s3448_s21 }
  0xd7   : > { %v508_v18 = vpop.permute.xlu1 %507  ;;  %v514_v43 = vpop.permute.xlu0 %513 }
  0xd8   : > { %577 = vst.msk [vmem:[#allocation3 + $0xd8] sm:$0xff] %vm549_vm2, %v508_v18  ;;  %580 = vst.msk [vmem:[#allocation3 + $0xf0] sm:$0xff] %vm549_vm2, %v514_v43 }
  0xd9   : > { %881 = vrot.lane.b32.xlu1 %v3727_v24, %s3448_s21  ;;  %887 = vrot.lane.b32.xlu0 %v3738_v27, %s3448_s21 }
  0xdb   : > { %v512_v20 = vpop.permute.xlu1 %511  ;;  %v647_v61 = vpop.permute.xlu0 %646 }
  0xdc   : > { %579 = vst.msk [vmem:[#allocation3 + $0xe8] sm:$0xff] %vm549_vm2, %v512_v20 }
  0xdd   : > { %743 = vst.msk [vmem:[#allocation3] sm:$0xff] %vm742_vm3, %v647_v61  ;;  %885 = vrot.lane.b32.xlu1 %v3740_v28, %s3448_s21  ;;  %891 = vrot.lane.b32.xlu0 %v3754_v31, %s3448_s21 }
  0xdf   : > { %v516_v0 = vpop.permute.xlu1 %515  ;;  %v651_v12 = vpop.permute.xlu0 %650 }
  0xe0   : > { %581 = vst.msk [vmem:[#allocation3 + $0xf8] sm:$0xff] %vm549_vm2, %v516_v0 }
  0xe1   : > { %745 = vst.msk [vmem:[#allocation3 + $0x10] sm:$0xff] %vm742_vm3, %v651_v12  ;;  %889 = vrot.lane.b32.xlu1 %v3756_v32, %s3448_s21  ;;  %895 = vrot.lane.b32.xlu0 %v3770_v35, %s3448_s21 }
  0xe3   : > { %v649_v44 = vpop.permute.xlu1 %648  ;;  %v655_v34 = vpop.permute.xlu0 %654 }
  0xe4   : > { %744 = vst.msk [vmem:[#allocation3 + $0x8] sm:$0xff] %vm742_vm3, %v649_v44  ;;  %747 = vst.msk [vmem:[#allocation3 + $0x20] sm:$0xff] %vm742_vm3, %v655_v34  ;;  %v3244_v44 = vld [vmem:[%s4938_s1 + $0x10] ss:$0 sps:$4 sm:$0x33]  }
  0xe5   : > { %893 = vrot.lane.b32.xlu1 %v3772_v36, %s3448_s21  ;;  %899 = vrot.lane.b32.xlu0 %v805_v47, %s3448_s21 }
  0xe7   : > { %v653_v42 = vpop.permute.xlu1 %652  ;;  %v659_v9 = vpop.permute.xlu0 %658 }
  0xe8   : > { %746 = vst.msk [vmem:[#allocation3 + $0x18] sm:$0xff] %vm742_vm3, %v653_v42  ;;  %749 = vst.msk [vmem:[#allocation3 + $0x30] sm:$0xff] %vm742_vm3, %v659_v9  ;;  %v973_v9 = vld [vmem:[#allocation2 + $0x51] sm:$0xff] }
  0xe9   : > { %897 = vrot.lane.b32.xlu1 %v3783_v39, %s3448_s21  ;;  %1034 = vrot.lane.b32.xlu0 %v3612_v52, %s3449_s22 }
  0xeb   : > { %v657_v62 = vpop.permute.xlu1 %656  ;;  %v663_v11 = vpop.permute.xlu0 %662 }
  0xec   : > { %748 = vst.msk [vmem:[#allocation3 + $0x28] sm:$0xff] %vm742_vm3, %v657_v62  ;;  %751 = vst.msk [vmem:[#allocation3 + $0x40] sm:$0xff] %vm742_vm3, %v663_v11 }
  0xed   : > { %1032 = vrot.lane.b32.xlu1 %v3602_v50, %s3449_s22  ;;  %1066 = vrot.lane.b32.xlu0 %v3742_v29, %s3449_s22 }
  0xef   : > { %v661_v38 = vpop.permute.xlu1 %660  ;;  %v667_v14 = vpop.permute.xlu0 %666 }
  0xf0   : > { %750 = vst.msk [vmem:[#allocation3 + $0x38] sm:$0xff] %vm742_vm3, %v661_v38  ;;  %753 = vst.msk [vmem:[#allocation3 + $0x50] sm:$0xff] %vm742_vm3, %v667_v14 }
  0xf1   : > { %1064 = vrot.lane.b32.xlu1 %v3676_v13, %s3449_s22  ;;  %1038 = vrot.lane.b32.xlu0 %v3620_v54, %s3449_s22 }
  0xf3   : > { %v665_v52 = vpop.permute.xlu1 %664  ;;  %v671_v15 = vpop.permute.xlu0 %670 }
  0xf4   : > { %752 = vst.msk [vmem:[#allocation3 + $0x48] sm:$0xff] %vm742_vm3, %v665_v52  ;;  %755 = vst.msk [vmem:[#allocation3 + $0x60] sm:$0xff] %vm742_vm3, %v671_v15  ;;  %v4115_v52 = vld [vmem:[#allocation2 + $0x69] sm:$0xff] }
  0xf5   : > { %1036 = vrot.lane.b32.xlu1 %v3604_v51, %s3449_s22  ;;  %1070 = vrot.lane.b32.xlu0 %v3758_v33, %s3449_s22 }
  0xf7   : > { %v669_v50 = vpop.permute.xlu1 %668  ;;  %v675_v29 = vpop.permute.xlu0 %674 }
  0xf8   : > { %754 = vst.msk [vmem:[#allocation3 + $0x58] sm:$0xff] %vm742_vm3, %v669_v50  ;;  %757 = vst.msk [vmem:[#allocation3 + $0x70] sm:$0xff] %vm742_vm3, %v675_v29  ;;  %v4123_v29 = vld [vmem:[#allocation2 + $0x61] sm:$0xff] }
  0xf9   : > { %1068 = vrot.lane.b32.xlu1 %v3729_v26, %s3449_s22  ;;  %1227 = vrot.lane.b32.xlu0 %v3811_v58, %s3450_s23 }
  0xfb   : > { %v673_v13 = vpop.permute.xlu1 %672  ;;  %v679_v16 = vpop.permute.xlu0 %678 }
  0xfc   : > { %756 = vst.msk [vmem:[#allocation3 + $0x68] sm:$0xff] %vm742_vm3, %v673_v13  ;;  %759 = vst.msk [vmem:[#allocation3 + $0x80] sm:$0xff] %vm742_vm3, %v679_v16 }
  0xfd   : > { %1225 = vrot.lane.b32.xlu1 %v3801_v49, %s3450_s23  ;;  %1259 = vrot.lane.b32.xlu0 %v3851_v55, %s3450_s23 }
  0xff   : > { %v677_v17 = vpop.permute.xlu1 %676  ;;  %v683_v18 = vpop.permute.xlu0 %682 }
 0x100   : > { %758 = vst.msk [vmem:[#allocation3 + $0x78] sm:$0xff] %vm742_vm3, %v677_v17  ;;  %761 = vst.msk [vmem:[#allocation3 + $0x90] sm:$0xff] %vm742_vm3, %v683_v18 }
 0x101   : > { %1257 = vrot.lane.b32.xlu1 %v3841_v46, %s3450_s23  ;;  %1231 = vrot.lane.b32.xlu0 %v3819_v60, %s3450_s23 }
 0x103   : > { %v681_v58 = vpop.permute.xlu1 %680  ;;  %v687_v43 = vpop.permute.xlu0 %686 }
 0x104   : > { %760 = vst.msk [vmem:[#allocation3 + $0x88] sm:$0xff] %vm742_vm3, %v681_v58  ;;  %763 = vst.msk [vmem:[#allocation3 + $0xa0] sm:$0xff] %vm742_vm3, %v687_v43 }
 0x105   : > { %1229 = vrot.lane.b32.xlu1 %v3806_v57, %s3450_s23  ;;  %1263 = vrot.lane.b32.xlu0 %v3859_v25, %s3450_s23 }
 0x107   : > { %v685_v49 = vpop.permute.xlu1 %684  ;;  %v691_v55 = vpop.permute.xlu0 %690 }
 0x108   : > { %762 = vst.msk [vmem:[#allocation3 + $0x98] sm:$0xff] %vm742_vm3, %v685_v49  ;;  %765 = vst.msk [vmem:[#allocation3 + $0xb0] sm:$0xff] %vm742_vm3, %v691_v55 }
 0x109   : > { %1261 = vrot.lane.b32.xlu1 %v3846_v48, %s3450_s23  ;;  %1421 = vrot.lane.b32.xlu0 %v3650_v4, %s3451_s24 }
 0x10b   : > { %v689_v46 = vpop.permute.xlu1 %688  ;;  %v695_v20 = vpop.permute.xlu0 %694 }
 0x10c   : > { %764 = vst.msk [vmem:[#allocation3 + $0xa8] sm:$0xff] %vm742_vm3, %v689_v46  ;;  %767 = vst.msk [vmem:[#allocation3 + $0xc0] sm:$0xff] %vm742_vm3, %v695_v20  ;;  %v4954_v46 = vld [vmem:[#allocation5_spill] sm:$0xff] }
 0x10d   : > { %1419 = vrot.lane.b32.xlu1 %v3636_v63, %s3451_s24  ;;  %1453 = vrot.lane.b32.xlu0 %v3714_v22, %s3451_s24  ;;  %v3143_v20 = vunpack.c.h.bf16 %v4954_v46 }
 0x10f   : > { %v693_v61 = vpop.permute.xlu1 %692  ;;  %v699_v0 = vpop.permute.xlu0 %698  ;;  %324 = vst.msk [vmem:[#allocation2 + $0x189] sm:$0xff] %vm172_vm0, %v3143_v20  ;;  %v4259_v20 = vld [vmem:[#allocation2 + $0x92] sm:$0xff] }
 0x110   : > { %766 = vst.msk [vmem:[#allocation3 + $0xb8] sm:$0xff] %vm742_vm3, %v693_v61  ;;  %769 = vst.msk [vmem:[#allocation3 + $0xd0] sm:$0xff] %vm742_vm3, %v699_v0  ;;  %v4956_v61 = vld [vmem:[#allocation8_spill] sm:$0xff] }
 0x111   : > { %1451 = vrot.lane.b32.xlu1 %v3702_v19, %s3451_s24  ;;  %1425 = vrot.lane.b32.xlu0 %v3658_v6, %s3451_s24 }
 0x113   : > { %v697_v4 = vpop.permute.xlu1 %696  ;;  %v703_v12 = vpop.permute.xlu0 %702 }
 0x114   : > { %768 = vst.msk [vmem:[#allocation3 + $0xc8] sm:$0xff] %vm742_vm3, %v697_v4  ;;  %771 = vst.msk [vmem:[#allocation3 + $0xe0] sm:$0xff] %vm742_vm3, %v703_v12 }
 0x115   : > { %1423 = vrot.lane.b32.xlu1 %v3644_v2, %s3451_s24  ;;  %1457 = vrot.lane.b32.xlu0 %v3727_v24, %s3451_s24 }
 0x117   : > { %v701_v63 = vpop.permute.xlu1 %700  ;;  %v707_v22 = vpop.permute.xlu0 %706 }
 0x118   : > { %770 = vst.msk [vmem:[#allocation3 + $0xd8] sm:$0xff] %vm742_vm3, %v701_v63  ;;  %773 = vst.msk [vmem:[#allocation3 + $0xf0] sm:$0xff] %vm742_vm3, %v707_v22 }
 0x119   : > { %1455 = vrot.lane.b32.xlu1 %v3712_v21, %s3451_s24  ;;  %1614 = vrot.lane.b32.xlu0 %v3620_v54, %s3452_s25 }
 0x11b   : > { %v705_v6 = vpop.permute.xlu1 %704  ;;  %v840_v19 = vpop.permute.xlu0 %839 }
 0x11c   : > { %772 = vst.msk [vmem:[#allocation3 + $0xe8] sm:$0xff] %vm742_vm3, %v705_v6 }
 0x11d   : > { %936 = vst.msk [vmem:[#allocation3] sm:$0xff] %vm935_vm4, %v840_v19  ;;  %1612 = vrot.lane.b32.xlu1 %v3604_v51, %s3452_s25  ;;  %1646 = vrot.lane.b32.xlu0 %v3758_v33, %s3452_s25  ;;  %v3242_v51 = vld [vmem:[%s4938_s1] sm:$0xff]   ;;  %v3243_v33 = vld [vmem:[%s4938_s1 + $0x8] sm:$0xff]  }
 0x11e   : > { %3178 = vmatprep.subr.bf16.mxu0 %v3242_v51  ;;  %3216 = vmatprep.subr.bf16.mxu1 %v3242_v51  ;;  %v1554_v19 = vld [vmem:[#allocation2 + $0x79] sm:$0xff] }
 0x11f   : > { %v709_v2 = vpop.permute.xlu1 %708  ;;  %v844_v24 = vpop.permute.xlu0 %843  ;;  %3179 = vmatpush3.bf16.msra.mxu0 %v3242_v51  ;;  %3219 = vmatpush3.bf16.msra.mxu1 %v3242_v51  ;;  %v1746_v51 = vld [vmem:[#allocation2 + $0x6a] sm:$0xff] }
 0x120   : > { %774 = vst.msk [vmem:[#allocation3 + $0xf8] sm:$0xff] %vm742_vm3, %v709_v2  ;;  %3180 = vmatprep.subr.bf16.mxu0 %v3243_v33  ;;  %3217 = vmatprep.subr.bf16.mxu1 %v3243_v33  ;;  %v1571_v2 = vld [vmem:[#allocation2 + $0x141] sm:$0xff] }
 0x121   : > { %938 = vst.msk [vmem:[#allocation3 + $0x10] sm:$0xff] %vm935_vm4, %v844_v24  ;;  %1644 = vrot.lane.b32.xlu1 %v3729_v26, %s3452_s25  ;;  %1618 = vrot.lane.b32.xlu0 %v3625_v56, %s3452_s25 }
 0x123   : > { %v842_v54 = vpop.permute.xlu1 %841  ;;  %v848_v21 = vpop.permute.xlu0 %847  ;;  %3181 = vmatpush3.bf16.msra.mxu0 %v3243_v33  ;;  %3220 = vmatpush3.bf16.msra.mxu1 %v3243_v33  ;;  %v1745_v33 = vld [vmem:[#allocation2 + $0x62] sm:$0xff] }
 0x124   : > { %937 = vst.msk [vmem:[#allocation3 + $0x8] sm:$0xff] %vm935_vm4, %v842_v54  ;;  %940 = vst.msk [vmem:[#allocation3 + $0x20] sm:$0xff] %vm935_vm4, %v848_v21  ;;  %3222 = vmatprep.subr.msk.bf16.mxu0 %vm2058_vm5, %v3244_v44  ;;  %3223 = vmatprep.subr.msk.bf16.mxu1 %vm2058_vm5, %v3244_v44  ;;  %v1570_v21 = vld [vmem:[#allocation2 + $0x139] sm:$0xff] }
 0x125   : > { %1616 = vrot.lane.b32.xlu1 %v3614_v53, %s3452_s25  ;;  %1650 = vrot.lane.b32.xlu0 %v3774_v37, %s3452_s25 }
 0x127   : > { %v846_v26 = vpop.permute.xlu1 %845  ;;  %v852_v56 = vpop.permute.xlu0 %851 }
 0x128   : > { %939 = vst.msk [vmem:[#allocation3 + $0x18] sm:$0xff] %vm935_vm4, %v846_v26  ;;  %942 = vst.msk [vmem:[#allocation3 + $0x30] sm:$0xff] %vm935_vm4, %v852_v56 }
 0x129   : > { %1648 = vrot.lane.b32.xlu1 %v3744_v30, %s3452_s25  ;;  %1807 = vrot.lane.b32.xlu0 %v3819_v60, %s3453_s30  ;;  %v2060_v60 = vsel %vm2058_vm5, %v3244_v44, 0 }
 0x12a   : > { %3183 = vmatpush3.bf16.msra.mxu0 %v2060_v60  ;;  %3221 = vmatpush3.bf16.msra.mxu1 %v2060_v60  ;;  %v1761_v60 = vld [vmem:[#allocation2 + $0x122] sm:$0xff] }
 0x12b   : > { %v850_v53 = vpop.permute.xlu1 %849  ;;  %v856_v47 = vpop.permute.xlu0 %855 }
 0x12c   : > { %941 = vst.msk [vmem:[#allocation3 + $0x28] sm:$0xff] %vm935_vm4, %v850_v53  ;;  %944 = vst.msk [vmem:[#allocation3 + $0x40] sm:$0xff] %vm935_vm4, %v856_v47  ;;  %v1762_v53 = vld [vmem:[#allocation2 + $0x12a] sm:$0xff] }
 0x12d   : > { %1805 = vrot.lane.b32.xlu1 %v3806_v57, %s3453_s30  ;;  %1839 = vrot.lane.b32.xlu0 %v3859_v25, %s3453_s30 }
 0x12f   : > { %v854_v34 = vpop.permute.xlu1 %853  ;;  %v860_v42 = vpop.permute.xlu0 %859 }
 0x130   : > { %943 = vst.msk [vmem:[#allocation3 + $0x38] sm:$0xff] %vm935_vm4, %v854_v34  ;;  %946 = vst.msk [vmem:[#allocation3 + $0x50] sm:$0xff] %vm935_vm4, %v860_v42  ;;  %v1748_v34 = vld [vmem:[#allocation2 + $0x82] sm:$0xff] }
 0x131   : > { %1837 = vrot.lane.b32.xlu1 %v3846_v48, %s3453_s30  ;;  %1811 = vrot.lane.b32.xlu0 %v3827_v1, %s3453_s30  ;;  %v972_v48 = vld [vmem:[#allocation2 + $0x49] sm:$0xff] }
 0x133   : > { %v858_v57 = vpop.permute.xlu1 %857  ;;  %v864_v25 = vpop.permute.xlu0 %863 }
 0x134   : > { %945 = vst.msk [vmem:[#allocation3 + $0x48] sm:$0xff] %vm935_vm4, %v858_v57  ;;  %948 = vst.msk [vmem:[#allocation3 + $0x60] sm:$0xff] %vm935_vm4, %v864_v25  ;;  %v1747_v25 = vld [vmem:[#allocation2 + $0x7a] sm:$0xff] }
 0x135   : > { %1809 = vrot.lane.b32.xlu1 %v3813_v59, %s3453_s30  ;;  %1843 = vrot.lane.b32.xlu0 %v3867_v41, %s3453_s30 }
 0x137   : > { %v862_v62 = vpop.permute.xlu1 %861  ;;  %v868_v11 = vpop.permute.xlu0 %867 }
 0x138   : > { %947 = vst.msk [vmem:[#allocation3 + $0x58] sm:$0xff] %vm935_vm4, %v862_v62  ;;  %950 = vst.msk [vmem:[#allocation3 + $0x70] sm:$0xff] %vm935_vm4, %v868_v11 }
 0x139   : > { %1841 = vrot.lane.b32.xlu1 %v3853_v3, %s3453_s30  ;;  %1042 = vrot.lane.b32.xlu0 %v973_v9, %s3449_s22  ;;  %v1764_v9 = vld [vmem:[#allocation2 + $0x142] sm:$0xff] }
 0x13b   : > { %v866_v38 = vpop.permute.xlu1 %865  ;;  %v872_v14 = vpop.permute.xlu0 %871 }
 0x13c   : > { %949 = vst.msk [vmem:[#allocation3 + $0x68] sm:$0xff] %vm935_vm4, %v866_v38  ;;  %952 = vst.msk [vmem:[#allocation3 + $0x80] sm:$0xff] %vm935_vm4, %v872_v14 }
 0x13d   : > { %1040 = vrot.lane.b32.xlu1 %v972_v48, %s3449_s22  ;;  %1074 = vrot.lane.b32.xlu0 %v3774_v37, %s3449_s22  ;;  %v1763_v48 = vld [vmem:[#allocation2 + $0x13a] sm:$0xff] }
 0x13f   : > { %v870_v15 = vpop.permute.xlu1 %869  ;;  %v876_v50 = vpop.permute.xlu0 %875 }
 0x140   : > { %951 = vst.msk [vmem:[#allocation3 + $0x78] sm:$0xff] %vm935_vm4, %v870_v15  ;;  %954 = vst.msk [vmem:[#allocation3 + $0x90] sm:$0xff] %vm935_vm4, %v876_v50  ;;  %v4224_v50 = vld [vmem:[#allocation2 + $0x99] sm:$0xff] }
 0x141   : > { %1072 = vrot.lane.b32.xlu1 %v3744_v30, %s3449_s22  ;;  %1046 = vrot.lane.b32.xlu0 %v4115_v52, %s3449_s22  ;;  %v4952_v30 = vld [vmem:[#allocation4_spill] sm:$0xff] }
 0x143   : > { %v874_v13 = vpop.permute.xlu1 %873  ;;  %v880_v16 = vpop.permute.xlu0 %879 }
 0x144   : > { %953 = vst.msk [vmem:[#allocation3 + $0x88] sm:$0xff] %vm935_vm4, %v874_v13  ;;  %956 = vst.msk [vmem:[#allocation3 + $0xa0] sm:$0xff] %vm935_vm4, %v880_v16  ;;  %v4231_v16 = vld [vmem:[#allocation2 + $0x91] sm:$0xff] }
 0x145   : > { %1044 = vrot.lane.b32.xlu1 %v4123_v29, %s3449_s22  ;;  %1078 = vrot.lane.b32.xlu0 %v3785_v40, %s3449_s22 }
 0x147   : > { %v878_v37 = vpop.permute.xlu1 %877  ;;  %v884_v17 = vpop.permute.xlu0 %883 }
 0x148   : > { %955 = vst.msk [vmem:[#allocation3 + $0x98] sm:$0xff] %vm935_vm4, %v878_v37  ;;  %958 = vst.msk [vmem:[#allocation3 + $0xb0] sm:$0xff] %vm935_vm4, %v884_v17  ;;  %v4233_v37 = vld [vmem:[#allocation2 + $0x159] sm:$0xff] }
 0x149   : > { %1076 = vrot.lane.b32.xlu1 %v4952_v30, %s3449_s22  ;;  %1235 = vrot.lane.b32.xlu0 %v3827_v1, %s3450_s23  ;;  %v4953_v1 = vld [vmem:[#allocation7_spill] sm:$0xff] }
 0x14b   : > { %v882_v18 = vpop.permute.xlu1 %881  ;;  %v888_v58 = vpop.permute.xlu0 %887 }
 0x14c   : > { %957 = vst.msk [vmem:[#allocation3 + $0xa8] sm:$0xff] %vm935_vm4, %v882_v18  ;;  %960 = vst.msk [vmem:[#allocation3 + $0xc0] sm:$0xff] %vm935_vm4, %v888_v58  ;;  %v4241_v18 = vld [vmem:[#allocation2 + $0x151] sm:$0xff] }
 0x14d   : > { %1233 = vrot.lane.b32.xlu1 %v3813_v59, %s3450_s23  ;;  %1267 = vrot.lane.b32.xlu0 %v3867_v41, %s3450_s23  ;;  %v4955_v59 = vld [vmem:[#allocation6_spill] sm:$0xff] }
 0x14f   : > { %v886_v40 = vpop.permute.xlu1 %885  ;;  %v892_v43 = vpop.permute.xlu0 %891 }
 0x150   : > { %959 = vst.msk [vmem:[#allocation3 + $0xb8] sm:$0xff] %vm935_vm4, %v886_v40  ;;  %962 = vst.msk [vmem:[#allocation3 + $0xd0] sm:$0xff] %vm935_vm4, %v892_v43 }
 0x151   : > { %1265 = vrot.lane.b32.xlu1 %v3853_v3, %s3450_s23  ;;  %1239 = vrot.lane.b32.xlu0 %v4953_v1, %s3450_s23 }
 0x153   : > { %v890_v49 = vpop.permute.xlu1 %889  ;;  %v896_v55 = vpop.permute.xlu0 %895 }
 0x154   : > { %961 = vst.msk [vmem:[#allocation3 + $0xc8] sm:$0xff] %vm935_vm4, %v890_v49  ;;  %964 = vst.msk [vmem:[#allocation3 + $0xe0] sm:$0xff] %vm935_vm4, %v896_v55  ;;  %v4252_v49 = vld [vmem:[#allocation2 + $0x9a] sm:$0xff] }
 0x155   : > { %1237 = vrot.lane.b32.xlu1 %v4955_v59, %s3450_s23  ;;  %1271 = vrot.lane.b32.xlu0 %v3873_v45, %s3450_s23  ;;  %v4261_v59 = vld [vmem:[#allocation2 + $0x15a] sm:$0xff] }
 0x157   : > { %v894_v3 = vpop.permute.xlu1 %893  ;;  %v900_v41 = vpop.permute.xlu0 %899 }
 0x158   : > { %963 = vst.msk [vmem:[#allocation3 + $0xd8] sm:$0xff] %vm935_vm4, %v894_v3  ;;  %966 = vst.msk [vmem:[#allocation3 + $0xf0] sm:$0xff] %vm935_vm4, %v900_v41 }
 0x159   : > { %1269 = vrot.lane.b32.xlu1 %v4956_v61, %s3450_s23  ;;  %1429 = vrot.lane.b32.xlu0 %v3662_v8, %s3451_s24 }
 0x15b   : > { %v898_v0 = vpop.permute.xlu1 %897  ;;  %v1035_v4 = vpop.permute.xlu0 %1034 }
 0x15c   : > { %965 = vst.msk [vmem:[#allocation3 + $0xe8] sm:$0xff] %vm935_vm4, %v898_v0  ;;  %v4269_v0 = vld [vmem:[#allocation2 + $0x152] sm:$0xff] }
 0x15d   : > { %1130 = vst.msk [vmem:[#allocation3 + $0x8] sm:$0xff] %vm1128_vm6, %v1035_v4  ;;  %1427 = vrot.lane.b32.xlu1 %v3652_v5, %s3451_s24  ;;  %1461 = vrot.lane.b32.xlu0 %v3740_v28, %s3451_s24  ;;  %v1364_v4 = vld [vmem:[#allocation2 + $0x98] sm:$0xff] }
 0x15f   : > { %v1033_v45 = vpop.permute.xlu1 %1032  ;;  %v1067_v12 = vpop.permute.xlu0 %1066 }
 0x160   : > { %1129 = vst.msk [vmem:[#allocation3] sm:$0xff] %vm1128_vm6, %v1033_v45  ;;  %1146 = vst.msk [vmem:[#allocation3 + $0x88] sm:$0xff] %vm1128_vm6, %v1067_v12 }
 0x161   : > { %1459 = vrot.lane.b32.xlu1 %v3725_v23, %s3451_s24  ;;  %1433 = vrot.lane.b32.xlu0 %v3672_v10, %s3451_s24  ;;  %v1569_v10 = vld [vmem:[#allocation2 + $0x129] sm:$0xff] }
 0x163   : > { %v1065_v8 = vpop.permute.xlu1 %1064  ;;  %v1039_v63 = vpop.permute.xlu0 %1038 }
 0x164   : > { %1145 = vst.msk [vmem:[#allocation3 + $0x80] sm:$0xff] %vm1128_vm6, %v1065_v8  ;;  %1132 = vst.msk [vmem:[#allocation3 + $0x18] sm:$0xff] %vm1128_vm6, %v1039_v63 }
 0x165   : > { %1431 = vrot.lane.b32.xlu1 %v3660_v7, %s3451_s24  ;;  %1465 = vrot.lane.b32.xlu0 %v3756_v32, %s3451_s24  ;;  %v1568_v7 = vld [vmem:[#allocation2 + $0x121] sm:$0xff] }
 0x166   : > { %v1555_v32 = vld [vmem:[#allocation2 + $0x81] sm:$0xff] }
 0x167   : > { %v1037_v5 = vpop.permute.xlu1 %1036  ;;  %v1071_v28 = vpop.permute.xlu0 %1070 }
 0x168   : > { %1131 = vst.msk [vmem:[#allocation3 + $0x10] sm:$0xff] %vm1128_vm6, %v1037_v5  ;;  %1148 = vst.msk [vmem:[#allocation3 + $0x98] sm:$0xff] %vm1128_vm6, %v1071_v28  ;;  %v1363_v28 = vld [vmem:[#allocation2 + $0x90] sm:$0xff] }
 0x169   : > { %1463 = vrot.lane.b32.xlu1 %v3738_v27, %s3451_s24  ;;  %1622 = vrot.lane.b32.xlu0 %v4115_v52, %s3452_s25 }
 0x16b   : > { %v1069_v23 = vpop.permute.xlu1 %1068  ;;  %v1228_v22 = vpop.permute.xlu0 %1227 }
 0x16c   : > { %1147 = vst.msk [vmem:[#allocation3 + $0x90] sm:$0xff] %vm1128_vm6, %v1069_v23 }
 0x16d   : > { %1323 = vst.msk [vmem:[#allocation3 + $0x8] sm:$0xff] %vm1321_vm7, %v1228_v22  ;;  %1620 = vrot.lane.b32.xlu1 %v4123_v29, %s3452_s25  ;;  %1654 = vrot.lane.b32.xlu0 %v1569_v10, %s3452_s25 }
 0x16f   : > { %v1226_v6 = vpop.permute.xlu1 %1225  ;;  %v1260_v27 = vpop.permute.xlu0 %1259 }
 0x170   : > { %1322 = vst.msk [vmem:[#allocation3] sm:$0xff] %vm1321_vm7, %v1226_v6  ;;  %1339 = vst.msk [vmem:[#allocation3 + $0x88] sm:$0xff] %vm1321_vm7, %v1260_v27  ;;  %v1366_v6 = vld [vmem:[#allocation2 + $0xb0] sm:$0xff] }
 0x171   : > { %1652 = vrot.lane.b32.xlu1 %v1568_v7, %s3452_s25  ;;  %1626 = vrot.lane.b32.xlu0 %v1555_v32, %s3452_s25 }
 0x173   : > { %v1258_v24 = vpop.permute.xlu1 %1257  ;;  %v1232_v54 = vpop.permute.xlu0 %1231 }
 0x174   : > { %1338 = vst.msk [vmem:[#allocation3 + $0x80] sm:$0xff] %vm1321_vm7, %v1258_v24  ;;  %1325 = vst.msk [vmem:[#allocation3 + $0x18] sm:$0xff] %vm1321_vm7, %v1232_v54 }
 0x175   : > { %1624 = vrot.lane.b32.xlu1 %v1554_v19, %s3452_s25  ;;  %1658 = vrot.lane.b32.xlu0 %v1571_v2, %s3452_s25 }
 0x177   : > { %v1230_v26 = vpop.permute.xlu1 %1229  ;;  %v1264_v56 = vpop.permute.xlu0 %1263 }
 0x178   : > { %1324 = vst.msk [vmem:[#allocation3 + $0x10] sm:$0xff] %vm1321_vm7, %v1230_v26  ;;  %1341 = vst.msk [vmem:[#allocation3 + $0x98] sm:$0xff] %vm1321_vm7, %v1264_v56 }
 0x179   : > { %1656 = vrot.lane.b32.xlu1 %v1570_v21, %s3452_s25  ;;  %1815 = vrot.lane.b32.xlu0 %v1746_v51, %s3453_s30 }
 0x17b   : > { %v1262_v47 = vpop.permute.xlu1 %1261  ;;  %v1422_v44 = vpop.permute.xlu0 %1421 }
 0x17c   : > { %1340 = vst.msk [vmem:[#allocation3 + $0x90] sm:$0xff] %vm1321_vm7, %v1262_v47 }
 0x17d   : > { %1517 = vst.msk [vmem:[#allocation3 + $0x8] sm:$0xff] %vm1515_vm8, %v1422_v44  ;;  %1813 = vrot.lane.b32.xlu1 %v1745_v33, %s3453_s30  ;;  %1847 = vrot.lane.b32.xlu0 %v1762_v53, %s3453_s30 }
 0x17f   : > { %v1420_v42 = vpop.permute.xlu1 %1419  ;;  %v1454_v57 = vpop.permute.xlu0 %1453 }
 0x180   : > { %1516 = vst.msk [vmem:[#allocation3] sm:$0xff] %vm1515_vm8, %v1420_v42  ;;  %1533 = vst.msk [vmem:[#allocation3 + $0x88] sm:$0xff] %vm1515_vm8, %v1454_v57 }
 0x181   : > { %1845 = vrot.lane.b32.xlu1 %v1761_v60, %s3453_s30  ;;  %1819 = vrot.lane.b32.xlu0 %v1748_v34, %s3453_s30 }
 0x183   : > { %v1452_v62 = vpop.permute.xlu1 %1451  ;;  %v1426_v11 = vpop.permute.xlu0 %1425 }
 0x184   : > { %1532 = vst.msk [vmem:[#allocation3 + $0x80] sm:$0xff] %vm1515_vm8, %v1452_v62  ;;  %1519 = vst.msk [vmem:[#allocation3 + $0x18] sm:$0xff] %vm1515_vm8, %v1426_v11 }
 0x185   : > { %1817 = vrot.lane.b32.xlu1 %v1747_v25, %s3453_s30  ;;  %1851 = vrot.lane.b32.xlu0 %v1764_v9, %s3453_s30 }
 0x187   : > { %v1424_v38 = vpop.permute.xlu1 %1423  ;;  %v1458_v14 = vpop.permute.xlu0 %1457 }
 0x188   : > { %1518 = vst.msk [vmem:[#allocation3 + $0x10] sm:$0xff] %vm1515_vm8, %v1424_v38  ;;  %1535 = vst.msk [vmem:[#allocation3 + $0x98] sm:$0xff] %vm1515_vm8, %v1458_v14  ;;  %v1752_v38 = vld [vmem:[#allocation2 + $0xb2] sm:$0xff] }
 0x189   : > { %1849 = vrot.lane.b32.xlu1 %v1763_v48, %s3453_s30  ;;  %1050 = vrot.lane.b32.xlu0 %v1555_v32, %s3449_s22 }
 0x18b   : > { %v1456_v52 = vpop.permute.xlu1 %1455  ;;  %v1615_v15 = vpop.permute.xlu0 %1614 }
 0x18c   : > { %1534 = vst.msk [vmem:[#allocation3 + $0x90] sm:$0xff] %vm1515_vm8, %v1456_v52 }
 0x18d   : > { %1710 = vst.msk [vmem:[#allocation3 + $0x8] sm:$0xff] %vm1708_vm9, %v1615_v15  ;;  %1048 = vrot.lane.b32.xlu1 %v1554_v19, %s3449_s22  ;;  %1082 = vrot.lane.b32.xlu0 %v1571_v2, %s3449_s22  ;;  %v1751_v15 = vld [vmem:[#allocation2 + $0xaa] sm:$0xff] }
 0x18f   : > { %v1613_v29 = vpop.permute.xlu1 %1612  ;;  %v1647_v13 = vpop.permute.xlu0 %1646 }
 0x190   : > { %1709 = vst.msk [vmem:[#allocation3] sm:$0xff] %vm1708_vm9, %v1613_v29  ;;  %1726 = vst.msk [vmem:[#allocation3 + $0x88] sm:$0xff] %vm1708_vm9, %v1647_v13 }
 0x191   : > { %1080 = vrot.lane.b32.xlu1 %v1570_v21, %s3449_s22  ;;  %1054 = vrot.lane.b32.xlu0 %v4224_v50, %s3449_s22 }
 0x193   : > { %v1645_v17 = vpop.permute.xlu1 %1644  ;;  %v1619_v30 = vpop.permute.xlu0 %1618 }
 0x194   : > { %1725 = vst.msk [vmem:[#allocation3 + $0x80] sm:$0xff] %vm1708_vm9, %v1645_v17  ;;  %1712 = vst.msk [vmem:[#allocation3 + $0x18] sm:$0xff] %vm1708_vm9, %v1619_v30  ;;  %v4340_v30 = vld [vmem:[#allocation2 + $0x188] sm:$0xff] }
 0x195   : > { %1052 = vrot.lane.b32.xlu1 %v4231_v16, %s3449_s22  ;;  %1086 = vrot.lane.b32.xlu0 %v4233_v37, %s3449_s22 }
 0x197   : > { %v1617_v58 = vpop.permute.xlu1 %1616  ;;  %v1651_v40 = vpop.permute.xlu0 %1650 }
 0x198   : > { %1711 = vst.msk [vmem:[#allocation3 + $0x10] sm:$0xff] %vm1708_vm9, %v1617_v58  ;;  %1728 = vst.msk [vmem:[#allocation3 + $0x98] sm:$0xff] %vm1708_vm9, %v1651_v40  ;;  %v4347_v40 = vld [vmem:[#allocation2 + $0xc1] sm:$0xff] }
 0x199   : > { %1084 = vrot.lane.b32.xlu1 %v4241_v18, %s3449_s22  ;;  %1243 = vrot.lane.b32.xlu0 %v1748_v34, %s3450_s23  ;;  %v1575_v34 = vld [vmem:[#allocation2 + $0x171] sm:$0xff] }
 0x19b   : > { %v1649_v43 = vpop.permute.xlu1 %1648  ;;  %v1808_v1 = vpop.permute.xlu0 %1807 }
 0x19c   : > { %1727 = vst.msk [vmem:[#allocation3 + $0x90] sm:$0xff] %vm1708_vm9, %v1649_v43 }
 0x19d   : > { %1903 = vst.msk [vmem:[#allocation3 + $0x8] sm:$0xff] %vm1901_vm10, %v1808_v1  ;;  %1241 = vrot.lane.b32.xlu1 %v1747_v25, %s3450_s23  ;;  %1275 = vrot.lane.b32.xlu0 %v1764_v9, %s3450_s23  ;;  %v1574_v25 = vld [vmem:[#allocation2 + $0x169] sm:$0xff] }
 0x19f   : > { %v1806_v55 = vpop.permute.xlu1 %1805  ;;  %v1840_v46 = vpop.permute.xlu0 %1839 }
 0x1a0   : > { %1902 = vst.msk [vmem:[#allocation3] sm:$0xff] %vm1901_vm10, %v1806_v55  ;;  %1919 = vst.msk [vmem:[#allocation3 + $0x88] sm:$0xff] %vm1901_vm10, %v1840_v46 }
 0x1a1   : > { %1273 = vrot.lane.b32.xlu1 %v1763_v48, %s3450_s23  ;;  %1247 = vrot.lane.b32.xlu0 %v4252_v49, %s3450_s23 }
 0x1a3   : > { %v1838_v3 = vpop.permute.xlu1 %1837  ;;  %v1812_v41 = vpop.permute.xlu0 %1811 }
 0x1a4   : > { %1918 = vst.msk [vmem:[#allocation3 + $0x80] sm:$0xff] %vm1901_vm10, %v1838_v3  ;;  %1905 = vst.msk [vmem:[#allocation3 + $0x18] sm:$0xff] %vm1901_vm10, %v1812_v41  ;;  %v1935_v61 = vld [vmem:[#allocation3 + $0x8] sm:$0xff]  ;;  %v4368_v41 = vld [vmem:[#allocation2 + $0x189] sm:$0xff] }
 0x1a5   : > { %1245 = vrot.lane.b32.xlu1 %v4259_v20, %s3450_s23  ;;  %1279 = vrot.lane.b32.xlu0 %v4261_v59, %s3450_s23 }
 0x1a7   : > { %v1810_v45 = vpop.permute.xlu1 %1809  ;;  %v1934_v12 = vld [vmem:[#allocation3] sm:$0xff]  ;;  %v1844_v8 = vpop.permute.xlu0 %1843  ;;  %v1951_v5 = vld [vmem:[#allocation3 + $0x88] sm:$0xff] }
 0x1a8   : > { %1904 = vst.msk [vmem:[#allocation3 + $0x10] sm:$0xff] %vm1901_vm10, %v1810_v45  ;;  %v1966_v63 = vpack.c.bf16 %v1935_v61, %v1934_v12  ;;  %1921 = vst.msk [vmem:[#allocation3 + $0x98] sm:$0xff] %vm1901_vm10, %v1844_v8  ;;  %v4382_v8 = vld [vmem:[#allocation2 + $0x182] sm:$0xff] }
 0x1a9   : > { %1277 = vrot.lane.b32.xlu1 %v4269_v0, %s3450_s23  ;;  %1437 = vrot.lane.b32.xlu0 %v1364_v4, %s3451_s24  ;;  %v4375_v4 = vld [vmem:[#allocation2 + $0xc2] sm:$0xff] }
 0x1aa   : > { %3184 = vmatprep.mubr.msk.bf16.mxu0 %vm2009_vm11, %v1966_v63 }
 0x1ab   : > { %v1842_v10 = vpop.permute.xlu1 %1841  ;;  %v1950_v23 = vld [vmem:[#allocation3 + $0x80] sm:$0xff]  ;;  %v1043_v22 = vpop.permute.xlu0 %1042  ;;  %v1937_v32 = vld [vmem:[#allocation3 + $0x18] sm:$0xff] }
 0x1ac   : > { %1920 = vst.msk [vmem:[#allocation3 + $0x90] sm:$0xff] %vm1901_vm10, %v1842_v10  ;;  %v1974_v7 = vpack.c.bf16 %v1951_v5, %v1950_v23  ;;  %v4389_v10 = vld [vmem:[#allocation2 + $0xca] sm:$0xff]  ;;  %v1367_v23 = vld [vmem:[#allocation2 + $0xc0] sm:$0xff] }
 0x1ad   : > { %1134 = vst.msk [vmem:[#allocation3 + $0x28] sm:$0xff] %vm1128_vm6, %v1043_v22  ;;  %1435 = vrot.lane.b32.xlu1 %v1363_v28, %s3451_s24  ;;  %1469 = vrot.lane.b32.xlu0 %v3772_v36, %s3451_s24  ;;  %v1365_v36 = vld [vmem:[#allocation2 + $0xa8] sm:$0xff] }
 0x1ae   : > { %3200 = vmatprep.mubr.msk.bf16.mxu1 %vm2009_vm11, %v1974_v7 }
 0x1af   : > { %v1041_v27 = vpop.permute.xlu1 %1040  ;;  %v1936_v19 = vld [vmem:[#allocation3 + $0x10] sm:$0xff]  ;;  %v1075_v2 = vpop.permute.xlu0 %1074  ;;  %v1953_v54 = vld [vmem:[#allocation3 + $0x98] sm:$0xff] }
 0x1b0   : > { %1133 = vst.msk [vmem:[#allocation3 + $0x20] sm:$0xff] %vm1128_vm6, %v1041_v27  ;;  %v1967_v24 = vpack.c.bf16 %v1937_v32, %v1936_v19  ;;  %1150 = vst.msk [vmem:[#allocation3 + $0xa8] sm:$0xff] %vm1128_vm6, %v1075_v2  ;;  %v4397_v19 = vld [vmem:[#allocation2 + $0x18a] sm:$0xff]  ;;  %v1383_v2 = vld [vmem:[#allocation2 + $0x180] sm:$0xff] }
 0x1b1   : > { %1467 = vrot.lane.b32.xlu1 %v3754_v31, %s3451_s24  ;;  %1441 = vrot.lane.b32.xlu0 %v1366_v6, %s3451_s24 }
 0x1b2   : > { %3185 = vmatmul.mubr.msk.bf16.vlgmr.msra.gmra.mrb[0].mxu0 %vm2009_vm11, %v1967_v24 }
 0x1b3   : > { %v1073_v21 = vpop.permute.xlu1 %1072  ;;  %v1952_v51 = vld [vmem:[#allocation3 + $0x90] sm:$0xff]  ;;  %v1047_v26 = vpop.permute.xlu0 %1046 }
 0x1b4   : > { %1149 = vst.msk [vmem:[#allocation3 + $0xa0] sm:$0xff] %vm1128_vm6, %v1073_v21  ;;  %v1975_v56 = vpack.c.bf16 %v1953_v54, %v1952_v51  ;;  %1136 = vst.msk [vmem:[#allocation3 + $0x38] sm:$0xff] %vm1128_vm6, %v1047_v26  ;;  %v1368_v26 = vld [vmem:[#allocation2 + $0xc8] sm:$0xff] }
 0x1b5   : > { %1439 = vrot.lane.b32.xlu1 %v1365_v36, %s3451_s24  ;;  %1473 = vrot.lane.b32.xlu0 %v3783_v39, %s3451_s24  ;;  %v1559_v39 = vld [vmem:[#allocation2 + $0xb1] sm:$0xff] }
 0x1b6   : > { %3201 = vmatmul.mubr.msk.bf16.vlgmr.msra.gmra.mrb[0].mxu1 %vm2009_vm11, %v1975_v56  ;;  %v1369_v56 = vld [vmem:[#allocation2 + $0xd8] sm:$0xff] }
 0x1b7   : > { %v1045_v31 = vpop.permute.xlu1 %1044  ;;  %v1079_v33 = vpop.permute.xlu0 %1078 }
 0x1b8   : > { %1135 = vst.msk [vmem:[#allocation3 + $0x30] sm:$0xff] %vm1128_vm6, %v1045_v31  ;;  %1152 = vst.msk [vmem:[#allocation3 + $0xb8] sm:$0xff] %vm1128_vm6, %v1079_v33 }
 0x1b9   : > { %1471 = vrot.lane.b32.xlu1 %v3770_v35, %s3451_s24  ;;  %1630 = vrot.lane.b32.xlu0 %v4224_v50, %s3452_s25  ;;  %v1558_v35 = vld [vmem:[#allocation2 + $0xa9] sm:$0xff]  ;;  %v1768_v50 = vld [vmem:[#allocation2 + $0x172] sm:$0xff] }
 0x1bb   : > { %v1077_v53 = vpop.permute.xlu1 %1076  ;;  %v1236_v47 = vpop.permute.xlu0 %1235 }
 0x1bc   : > { %1151 = vst.msk [vmem:[#allocation3 + $0xb0] sm:$0xff] %vm1128_vm6, %v1077_v53 }
 0x1bd   : > { %1327 = vst.msk [vmem:[#allocation3 + $0x28] sm:$0xff] %vm1321_vm7, %v1236_v47  ;;  %1628 = vrot.lane.b32.xlu1 %v4231_v16, %s3452_s25  ;;  %1662 = vrot.lane.b32.xlu0 %v4233_v37, %s3452_s25  ;;  %v1767_v16 = vld [vmem:[#allocation2 + $0x16a] sm:$0xff] }
 0x1bf   : > { %v1234_v44 = vpop.permute.xlu1 %1233  ;;  %v1268_v60 = vpop.permute.xlu0 %1267 }
 0x1c0   : > { %1326 = vst.msk [vmem:[#allocation3 + $0x20] sm:$0xff] %vm1321_vm7, %v1234_v44  ;;  %1343 = vst.msk [vmem:[#allocation3 + $0xa8] sm:$0xff] %vm1321_vm7, %v1268_v60  ;;  %v1385_v44 = vld [vmem:[#allocation2 + $0x198] sm:$0xff] }
 0x1c1   : > { %1660 = vrot.lane.b32.xlu1 %v4241_v18, %s3452_s25  ;;  %1634 = vrot.lane.b32.xlu0 %v1559_v39, %s3452_s25 }
 0x1c3   : > { %v1266_v42 = vpop.permute.xlu1 %1265  ;;  %v1240_v57 = vpop.permute.xlu0 %1239 }
 0x1c4   : > { %1342 = vst.msk [vmem:[#allocation3 + $0xa0] sm:$0xff] %vm1321_vm7, %v1266_v42  ;;  %1329 = vst.msk [vmem:[#allocation3 + $0x38] sm:$0xff] %vm1321_vm7, %v1240_v57  ;;  %v1370_v57 = vld [vmem:[#allocation2 + $0xe0] sm:$0xff] }
 0x1c5   : > { %1632 = vrot.lane.b32.xlu1 %v1558_v35, %s3452_s25  ;;  %1666 = vrot.lane.b32.xlu0 %v1575_v34, %s3452_s25 }
 0x1c7   : > { %v1238_v9 = vpop.permute.xlu1 %1237  ;;  %v1272_v62 = vpop.permute.xlu0 %1271 }
 0x1c8   : > { %1328 = vst.msk [vmem:[#allocation3 + $0x30] sm:$0xff] %vm1321_vm7, %v1238_v9  ;;  %1345 = vst.msk [vmem:[#allocation3 + $0xb8] sm:$0xff] %vm1321_vm7, %v1272_v62  ;;  %v1386_v62 = vld [vmem:[#allocation2 + $0x1a0] sm:$0xff] }
 0x1c9   : > { %1664 = vrot.lane.b32.xlu1 %v1574_v25, %s3452_s25  ;;  %1823 = vrot.lane.b32.xlu0 %v4252_v49, %s3453_s30  ;;  %v4354_v49 = vld [vmem:[#allocation2 + $0x181] sm:$0xff] }
 0x1cb   : > { %v1270_v11 = vpop.permute.xlu1 %1269  ;;  %v1430_v48 = vpop.permute.xlu0 %1429 }
 0x1cc   : > { %1344 = vst.msk [vmem:[#allocation3 + $0xb0] sm:$0xff] %vm1321_vm7, %v1270_v11 }
 0x1cd   : > { %1521 = vst.msk [vmem:[#allocation3 + $0x28] sm:$0xff] %vm1515_vm8, %v1430_v48  ;;  %1821 = vrot.lane.b32.xlu1 %v4259_v20, %s3453_s30  ;;  %1855 = vrot.lane.b32.xlu0 %v4261_v59, %s3453_s30  ;;  %v4361_v20 = vld [vmem:[#allocation2 + $0xc9] sm:$0xff] }
 0x1cf   : > { %v1428_v14 = vpop.permute.xlu1 %1427  ;;  %v1462_v52 = vpop.permute.xlu0 %1461 }
 0x1d0   : > { %1520 = vst.msk [vmem:[#allocation3 + $0x20] sm:$0xff] %vm1515_vm8, %v1428_v14  ;;  %1537 = vst.msk [vmem:[#allocation3 + $0xa8] sm:$0xff] %vm1515_vm8, %v1462_v52 }
 0x1d1   : > { %1853 = vrot.lane.b32.xlu1 %v4269_v0, %s3453_s30  ;;  %1827 = vrot.lane.b32.xlu0 %v1752_v38, %s3453_s30 }
 0x1d3   : > { %v1460_v29 = vpop.permute.xlu1 %1459  ;;  %v1434_v13 = vpop.permute.xlu0 %1433 }
 0x1d4   : > { %1536 = vst.msk [vmem:[#allocation3 + $0xa0] sm:$0xff] %vm1515_vm8, %v1460_v29  ;;  %1523 = vst.msk [vmem:[#allocation3 + $0x38] sm:$0xff] %vm1515_vm8, %v1434_v13  ;;  %v1563_v13 = vld [vmem:[#allocation2 + $0xe1] sm:$0xff] }
 0x1d5   : > { %1825 = vrot.lane.b32.xlu1 %v1751_v15, %s3453_s30  ;;  %1859 = vrot.lane.b32.xlu0 %v1768_v50, %s3453_s30 }
 0x1d7   : > { %v1432_v37 = vpop.permute.xlu1 %1431  ;;  %v1466_v17 = vpop.permute.xlu0 %1465 }
 0x1d8   : > { %1522 = vst.msk [vmem:[#allocation3 + $0x30] sm:$0xff] %vm1515_vm8, %v1432_v37  ;;  %1539 = vst.msk [vmem:[#allocation3 + $0xb8] sm:$0xff] %vm1515_vm8, %v1466_v17  ;;  %v1579_v17 = vld [vmem:[#allocation2 + $0x1a1] sm:$0xff] }
 0x1d9   : > { %1857 = vrot.lane.b32.xlu1 %v1767_v16, %s3453_s30  ;;  %1056 = vrot.lane.b32.xlu0 %v1558_v35, %s3449_s22 }
 0x1db   : > { %v1464_v18 = vpop.permute.xlu1 %1463  ;;  %v1623_v58 = vpop.permute.xlu0 %1622 }
 0x1dc   : > { %1538 = vst.msk [vmem:[#allocation3 + $0xb0] sm:$0xff] %vm1515_vm8, %v1464_v18 }
 0x1dd   : > { %1714 = vst.msk [vmem:[#allocation3 + $0x28] sm:$0xff] %vm1708_vm9, %v1623_v58  ;;  %901 = vrot.lane.b32.xlu1 %v4340_v30, %s3448_s21  ;;  %1088 = vrot.lane.b32.xlu0 %v1574_v25, %s3449_s22  ;;  %v1755_v58 = vld [vmem:[#allocation2 + $0xda] sm:$0xff] }
 0x1df   : > { %v1621_v43 = vpop.permute.xlu1 %1620  ;;  %v1655_v1 = vpop.permute.xlu0 %1654 }
 0x1e0   : > { %1713 = vst.msk [vmem:[#allocation3 + $0x20] sm:$0xff] %vm1708_vm9, %v1621_v43  ;;  %1730 = vst.msk [vmem:[#allocation3 + $0xa8] sm:$0xff] %vm1708_vm9, %v1655_v1  ;;  %v1771_v1 = vld [vmem:[#allocation2 + $0x19a] sm:$0xff] }
 0x1e1   : > { %1058 = vrot.lane.b32.xlu1 %v1559_v39, %s3449_s22  ;;  %1060 = vrot.lane.b32.xlu0 %v4347_v40, %s3449_s22 }
 0x1e3   : > { %v1653_v55 = vpop.permute.xlu1 %1652  ;;  %v1627_v46 = vpop.permute.xlu0 %1626 }
 0x1e4   : > { %1729 = vst.msk [vmem:[#allocation3 + $0xa0] sm:$0xff] %vm1708_vm9, %v1653_v55  ;;  %1716 = vst.msk [vmem:[#allocation3 + $0x38] sm:$0xff] %vm1708_vm9, %v1627_v46  ;;  %v1756_v46 = vld [vmem:[#allocation2 + $0xe2] sm:$0xff] }
 0x1e5   : > { %1090 = vrot.lane.b32.xlu1 %v1575_v34, %s3449_s22  ;;  %1092 = vrot.lane.b32.xlu0 %v4354_v49, %s3449_s22 }
 0x1e7   : > { %v1625_v59 = vpop.permute.xlu1 %1624  ;;  %v1659_v3 = vpop.permute.xlu0 %1658 }
 0x1e8   : > { %1715 = vst.msk [vmem:[#allocation3 + $0x30] sm:$0xff] %vm1708_vm9, %v1625_v59  ;;  %1732 = vst.msk [vmem:[#allocation3 + $0xb8] sm:$0xff] %vm1708_vm9, %v1659_v3  ;;  %v1772_v3 = vld [vmem:[#allocation2 + $0x1a2] sm:$0xff] }
 0x1e9   : > { %1062 = vrot.lane.b32.xlu1 %v4361_v20, %s3449_s22  ;;  %1249 = vrot.lane.b32.xlu0 %v1751_v15, %s3450_s23  ;;  %v1578_v15 = vld [vmem:[#allocation2 + $0x199] sm:$0xff] }
 0x1eb   : > { %v1657_v61 = vpop.permute.xlu1 %1656  ;;  %v1816_v0 = vpop.permute.xlu0 %1815 }
 0x1ec   : > { %1731 = vst.msk [vmem:[#allocation3 + $0xb0] sm:$0xff] %vm1708_vm9, %v1657_v61 }
 0x1ed   : > { %1907 = vst.msk [vmem:[#allocation3 + $0x28] sm:$0xff] %vm1901_vm10, %v1816_v0  ;;  %1094 = vrot.lane.b32.xlu1 %v4368_v41, %s3449_s22  ;;  %1281 = vrot.lane.b32.xlu0 %v1767_v16, %s3450_s23 }
 0x1ef   : > { %v1814_v45 = vpop.permute.xlu1 %1813  ;;  %v1848_v12 = vpop.permute.xlu0 %1847 }
 0x1f0   : > { %1906 = vst.msk [vmem:[#allocation3 + $0x20] sm:$0xff] %vm1901_vm10, %v1814_v45  ;;  %1923 = vst.msk [vmem:[#allocation3 + $0xa8] sm:$0xff] %vm1901_vm10, %v1848_v12 }
 0x1f1   : > { %1251 = vrot.lane.b32.xlu1 %v1752_v38, %s3450_s23  ;;  %1253 = vrot.lane.b32.xlu0 %v4375_v4, %s3450_s23  ;;  %v1562_v38 = vld [vmem:[#allocation2 + $0xd9] sm:$0xff] }
 0x1f3   : > { %v1846_v63 = vpop.permute.xlu1 %1845  ;;  %v1820_v5 = vpop.permute.xlu0 %1819 }
 0x1f4   : > { %1922 = vst.msk [vmem:[#allocation3 + $0xa0] sm:$0xff] %vm1901_vm10, %v1846_v63  ;;  %1909 = vst.msk [vmem:[#allocation3 + $0x38] sm:$0xff] %vm1901_vm10, %v1820_v5  ;;  %v1939_v28 = vld [vmem:[#allocation3 + $0x28] sm:$0xff] }
 0x1f5   : > { %1283 = vrot.lane.b32.xlu1 %v1768_v50, %s3450_s23  ;;  %1285 = vrot.lane.b32.xlu0 %v4382_v8, %s3450_s23 }
 0x1f7   : > { %v1818_v22 = vpop.permute.xlu1 %1817  ;;  %v1938_v7 = vld [vmem:[#allocation3 + $0x20] sm:$0xff]  ;;  %v1852_v32 = vpop.permute.xlu0 %1851  ;;  %v1955_v27 = vld [vmem:[#allocation3 + $0xa8] sm:$0xff] }
 0x1f8   : > { %1908 = vst.msk [vmem:[#allocation3 + $0x30] sm:$0xff] %vm1901_vm10, %v1818_v22  ;;  %v1968_v6 = vpack.c.bf16 %v1939_v28, %v1938_v7  ;;  %1925 = vst.msk [vmem:[#allocation3 + $0xb8] sm:$0xff] %vm1901_vm10, %v1852_v32 }
 0x1f9   : > { %1255 = vrot.lane.b32.xlu1 %v4389_v10, %s3450_s23  ;;  %1443 = vrot.lane.b32.xlu0 %v1367_v23, %s3451_s24 }
 0x1fa   : > { %3188 = vmatprep.mubr.msk.bf16.mxu0 %vm2009_vm11, %v1968_v6 }
 0x1fb   : > { %v1850_v24 = vpop.permute.xlu1 %1849  ;;  %v1954_v54 = vld [vmem:[#allocation3 + $0xa0] sm:$0xff]  ;;  %v1051_v36 = vpop.permute.xlu0 %1050  ;;  %v1941_v51 = vld [vmem:[#allocation3 + $0x38] sm:$0xff] }
 0x1fc   : > { %1924 = vst.msk [vmem:[#allocation3 + $0xb0] sm:$0xff] %vm1901_vm10, %v1850_v24  ;;  %v1976_v21 = vpack.c.bf16 %v1955_v27, %v1954_v54 }
 0x1fd   : > { %1138 = vst.msk [vmem:[#allocation3 + $0x48] sm:$0xff] %vm1128_vm6, %v1051_v36  ;;  %1287 = vrot.lane.b32.xlu1 %v4397_v19, %s3450_s23  ;;  %1475 = vrot.lane.b32.xlu0 %v1383_v2, %s3451_s24 }
 0x1fe   : > { %3204 = vmatprep.mubr.msk.bf16.mxu1 %vm2009_vm11, %v1976_v21 }
 0x1ff   : > { %v1049_v31 = vpop.permute.xlu1 %1048  ;;  %v1940_v33 = vld [vmem:[#allocation3 + $0x30] sm:$0xff]  ;;  %v1083_v53 = vpop.permute.xlu0 %1082  ;;  %v1957_v39 = vld [vmem:[#allocation3 + $0xb8] sm:$0xff] }
 0x200   : > { %1137 = vst.msk [vmem:[#allocation3 + $0x40] sm:$0xff] %vm1128_vm6, %v1049_v31  ;;  %v1969_v47 = vpack.c.bf16 %v1941_v51, %v1940_v33  ;;  %1154 = vst.msk [vmem:[#allocation3 + $0xc8] sm:$0xff] %vm1128_vm6, %v1083_v53 }
 0x201   : > { %1445 = vrot.lane.b32.xlu1 %v1368_v26, %s3451_s24  ;;  %1447 = vrot.lane.b32.xlu0 %v1369_v56, %s3451_s24 }
 0x202   : > { %3189 = vmatmul.mubr.msk.bf16.gmra.mrb[4].mxu0 %vm2009_vm11, %v1969_v47 }
 0x203   : > { %v1081_v60 = vpop.permute.xlu1 %1080  ;;  %v1956_v35 = vld [vmem:[#allocation3 + $0xb0] sm:$0xff]  ;;  %v1055_v34 = vpop.permute.xlu0 %1054 }
 0x204   : > { %1153 = vst.msk [vmem:[#allocation3 + $0xc0] sm:$0xff] %vm1128_vm6, %v1081_v60  ;;  %v1977_v42 = vpack.c.bf16 %v1957_v39, %v1956_v35  ;;  %1140 = vst.msk [vmem:[#allocation3 + $0x58] sm:$0xff] %vm1128_vm6, %v1055_v34 }
 0x205   : > { %1477 = vrot.lane.b32.xlu1 %v4340_v30, %s3451_s24  ;;  %1479 = vrot.lane.b32.xlu0 %v1385_v44, %s3451_s24 }
 0x206   : > { %3205 = vmatmul.mubr.msk.bf16.gmra.mrb[4].mxu1 %vm2009_vm11, %v1977_v42 }
 0x207   : > { %v1053_v25 = vpop.permute.xlu1 %1052  ;;  %v1087_v9 = vpop.permute.xlu0 %1086 }
 0x208   : > { %1139 = vst.msk [vmem:[#allocation3 + $0x50] sm:$0xff] %vm1128_vm6, %v1053_v25  ;;  %1156 = vst.msk [vmem:[#allocation3 + $0xd8] sm:$0xff] %vm1128_vm6, %v1087_v9 }
 0x209   : > { %1449 = vrot.lane.b32.xlu1 %v1370_v57, %s3451_s24  ;;  %1636 = vrot.lane.b32.xlu0 %v4347_v40, %s3452_s25 }
 0x20b   : > { %v1085_v11 = vpop.permute.xlu1 %1084  ;;  %v1244_v48 = vpop.permute.xlu0 %1243 }
 0x20c   : > { %1155 = vst.msk [vmem:[#allocation3 + $0xd0] sm:$0xff] %vm1128_vm6, %v1085_v11 }
 0x20d   : > { %1331 = vst.msk [vmem:[#allocation3 + $0x48] sm:$0xff] %vm1321_vm7, %v1244_v48  ;;  %1481 = vrot.lane.b32.xlu1 %v1386_v62, %s3451_s24  ;;  %1668 = vrot.lane.b32.xlu0 %v4354_v49, %s3452_s25 }
 0x20f   : > { %v1242_v14 = vpop.permute.xlu1 %1241  ;;  %v1276_v52 = vpop.permute.xlu0 %1275 }
 0x210   : > { %1330 = vst.msk [vmem:[#allocation3 + $0x40] sm:$0xff] %vm1321_vm7, %v1242_v14  ;;  %1347 = vst.msk [vmem:[#allocation3 + $0xc8] sm:$0xff] %vm1321_vm7, %v1276_v52 }
 0x211   : > { %1638 = vrot.lane.b32.xlu1 %v4361_v20, %s3452_s25  ;;  %1640 = vrot.lane.b32.xlu0 %v1562_v38, %s3452_s25 }
 0x213   : > { %v1274_v50 = vpop.permute.xlu1 %1273  ;;  %v1248_v29 = vpop.permute.xlu0 %1247 }
 0x214   : > { %1346 = vst.msk [vmem:[#allocation3 + $0xc0] sm:$0xff] %vm1321_vm7, %v1274_v50  ;;  %1333 = vst.msk [vmem:[#allocation3 + $0x58] sm:$0xff] %vm1321_vm7, %v1248_v29 }
 0x215   : > { %1670 = vrot.lane.b32.xlu1 %v4368_v41, %s3452_s25  ;;  %1672 = vrot.lane.b32.xlu0 %v1578_v15, %s3452_s25 }
 0x217   : > { %v1246_v16 = vpop.permute.xlu1 %1245  ;;  %v1280_v37 = vpop.permute.xlu0 %1279 }
 0x218   : > { %1332 = vst.msk [vmem:[#allocation3 + $0x50] sm:$0xff] %vm1321_vm7, %v1246_v16  ;;  %1349 = vst.msk [vmem:[#allocation3 + $0xd8] sm:$0xff] %vm1321_vm7, %v1280_v37 }
 0x219   : > { %1642 = vrot.lane.b32.xlu1 %v1563_v13, %s3452_s25  ;;  %1829 = vrot.lane.b32.xlu0 %v4375_v4, %s3453_s30 }
 0x21b   : > { %v1278_v30 = vpop.permute.xlu1 %1277  ;;  %v1438_v18 = vpop.permute.xlu0 %1437 }
 0x21c   : > { %1348 = vst.msk [vmem:[#allocation3 + $0xd0] sm:$0xff] %vm1321_vm7, %v1278_v30 }
 0x21d   : > { %1525 = vst.msk [vmem:[#allocation3 + $0x48] sm:$0xff] %vm1515_vm8, %v1438_v18  ;;  %1674 = vrot.lane.b32.xlu1 %v1579_v17, %s3452_s25  ;;  %1861 = vrot.lane.b32.xlu0 %v4382_v8, %s3453_s30 }
 0x21f   : > { %v1436_v40 = vpop.permute.xlu1 %1435  ;;  %v1470_v43 = vpop.permute.xlu0 %1469 }
 0x220   : > { %1524 = vst.msk [vmem:[#allocation3 + $0x40] sm:$0xff] %vm1515_vm8, %v1436_v40  ;;  %1541 = vst.msk [vmem:[#allocation3 + $0xc8] sm:$0xff] %vm1515_vm8, %v1470_v43 }
 0x221   : > { %1831 = vrot.lane.b32.xlu1 %v4389_v10, %s3453_s30  ;;  %1833 = vrot.lane.b32.xlu0 %v1755_v58, %s3453_s30 }
 0x223   : > { %v1468_v49 = vpop.permute.xlu1 %1467  ;;  %v1442_v55 = vpop.permute.xlu0 %1441 }
 0x224   : > { %1540 = vst.msk [vmem:[#allocation3 + $0xc0] sm:$0xff] %vm1515_vm8, %v1468_v49  ;;  %1527 = vst.msk [vmem:[#allocation3 + $0x58] sm:$0xff] %vm1515_vm8, %v1442_v55 }
 0x225   : > { %1863 = vrot.lane.b32.xlu1 %v4397_v19, %s3453_s30  ;;  %1865 = vrot.lane.b32.xlu0 %v1771_v1, %s3453_s30  ;;  %v4511_v1 = vld [vmem:[%s4939_s2] ss:$0 sm:$0xff] }
 0x227   : > { %v1440_v20 = vpop.permute.xlu1 %1439  ;;  %v1474_v59 = vpop.permute.xlu0 %1473 }
 0x228   : > { %1526 = vst.msk [vmem:[#allocation3 + $0x50] sm:$0xff] %vm1515_vm8, %v1440_v20  ;;  %1543 = vst.msk [vmem:[#allocation3 + $0xd8] sm:$0xff] %vm1515_vm8, %v1474_v59 }
 0x229   : > { %1835 = vrot.lane.b32.xlu1 %v1756_v46, %s3453_s30 }
 0x22b   : > { %v1472_v41 = vpop.permute.xlu1 %1471  ;;  %v1631_v61 = vpop.permute.xlu0 %1630 }
 0x22c   : > { %1542 = vst.msk [vmem:[#allocation3 + $0xd0] sm:$0xff] %vm1515_vm8, %v1472_v41 }
 0x22d   : > { %1718 = vst.msk [vmem:[#allocation3 + $0x48] sm:$0xff] %vm1708_vm9, %v1631_v61  ;;  %1867 = vrot.lane.b32.xlu1 %v1772_v3, %s3453_s30 }
 0x22f   : > { %v1629_v0 = vpop.permute.xlu1 %1628  ;;  %v1663_v4 = vpop.permute.xlu0 %1662 }
 0x230   : > { %1717 = vst.msk [vmem:[#allocation3 + $0x40] sm:$0xff] %vm1708_vm9, %v1629_v0  ;;  %1734 = vst.msk [vmem:[#allocation3 + $0xc8] sm:$0xff] %vm1708_vm9, %v1663_v4 }
 0x233   : > { %v1661_v45 = vpop.permute.xlu1 %1660  ;;  %v1635_v12 = vpop.permute.xlu0 %1634 }
 0x234   : > { %1733 = vst.msk [vmem:[#allocation3 + $0xc0] sm:$0xff] %vm1708_vm9, %v1661_v45  ;;  %1720 = vst.msk [vmem:[#allocation3 + $0x58] sm:$0xff] %vm1708_vm9, %v1635_v12 }
 0x237   : > { %v1633_v8 = vpop.permute.xlu1 %1632  ;;  %v1667_v63 = vpop.permute.xlu0 %1666 }
 0x238   : > { %1719 = vst.msk [vmem:[#allocation3 + $0x50] sm:$0xff] %vm1708_vm9, %v1633_v8  ;;  %1736 = vst.msk [vmem:[#allocation3 + $0xd8] sm:$0xff] %vm1708_vm9, %v1667_v63 }
 0x23b   : > { %v1665_v5 = vpop.permute.xlu1 %1664  ;;  %v1824_v28 = vpop.permute.xlu0 %1823 }
 0x23c   : > { %1735 = vst.msk [vmem:[#allocation3 + $0xd0] sm:$0xff] %vm1708_vm9, %v1665_v5 }
 0x23d   : > { %1911 = vst.msk [vmem:[#allocation3 + $0x48] sm:$0xff] %vm1901_vm10, %v1824_v28 }
 0x23f   : > { %v1822_v10 = vpop.permute.xlu1 %1821  ;;  %v1856_v23 = vpop.permute.xlu0 %1855 }
 0x240   : > { %1910 = vst.msk [vmem:[#allocation3 + $0x40] sm:$0xff] %vm1901_vm10, %v1822_v10  ;;  %1927 = vst.msk [vmem:[#allocation3 + $0xc8] sm:$0xff] %vm1901_vm10, %v1856_v23 }
 0x243   : > { %v1854_v22 = vpop.permute.xlu1 %1853  ;;  %v1828_v7 = vpop.permute.xlu0 %1827 }
 0x244   : > { %1926 = vst.msk [vmem:[#allocation3 + $0xc0] sm:$0xff] %vm1901_vm10, %v1854_v22  ;;  %1913 = vst.msk [vmem:[#allocation3 + $0x58] sm:$0xff] %vm1901_vm10, %v1828_v7  ;;  %v1943_v32 = vld [vmem:[#allocation3 + $0x48] sm:$0xff] }
 0x247   : > { %v1826_v6 = vpop.permute.xlu1 %1825  ;;  %v1942_v27 = vld [vmem:[#allocation3 + $0x40] sm:$0xff]  ;;  %v1860_v19 = vpop.permute.xlu0 %1859  ;;  %v1959_v24 = vld [vmem:[#allocation3 + $0xc8] sm:$0xff] }
 0x248   : > { %1912 = vst.msk [vmem:[#allocation3 + $0x50] sm:$0xff] %vm1901_vm10, %v1826_v6  ;;  %v1970_v2 = vpack.c.bf16 %v1943_v32, %v1942_v27  ;;  %1929 = vst.msk [vmem:[#allocation3 + $0xd8] sm:$0xff] %vm1901_vm10, %v1860_v19 }
 0x24a   : > { %3192 = vmatprep.mubr.msk.bf16.mxu0 %vm2009_vm11, %v1970_v2 }
 0x24b   : > { %v1858_v54 = vpop.permute.xlu1 %1857  ;;  %v1958_v36 = vld [vmem:[#allocation3 + $0xc0] sm:$0xff]  ;;  %v1057_v21 = vpop.permute.xlu0 %1056  ;;  %v1945_v26 = vld [vmem:[#allocation3 + $0x58] sm:$0xff] }
 0x24c   : > { %1928 = vst.msk [vmem:[#allocation3 + $0xd0] sm:$0xff] %vm1901_vm10, %v1858_v54  ;;  %v1978_v51 = vpack.c.bf16 %v1959_v24, %v1958_v36 }
 0x24d   : > { %1141 = vst.msk [vmem:[#allocation3 + $0x60] sm:$0xff] %vm1128_vm6, %v1057_v21 }
 0x24e   : > { %3208 = vmatprep.mubr.msk.bf16.mxu1 %vm2009_vm11, %v1978_v51 }
 0x24f   : > { %v902_v56 = vpop.permute.xlu1 %901  ;;  %v1944_v31 = vld [vmem:[#allocation3 + $0x50] sm:$0xff]  ;;  %v1089_v33 = vpop.permute.xlu0 %1088  ;;  %v1961_v47 = vld [vmem:[#allocation3 + $0xd8] sm:$0xff] }
 0x250   : > { %967 = vst.msk [vmem:[#allocation3 + $0xf8] sm:$0xff] %vm935_vm4, %v902_v56  ;;  %v1971_v53 = vpack.c.bf16 %v1945_v26, %v1944_v31 }
 0x251   : > { %1157 = vst.msk [vmem:[#allocation3 + $0xe0] sm:$0xff] %vm1128_vm6, %v1089_v33 }
 0x252   : > { %3193 = vmatmul.mubr.msk.bf16.gmra.mrb[8].mxu0 %vm2009_vm11, %v1971_v53 }
 0x253   : > { %v1059_v39 = vpop.permute.xlu1 %1058  ;;  %v1960_v44 = vld [vmem:[#allocation3 + $0xd0] sm:$0xff]  ;;  %v1061_v60 = vpop.permute.xlu0 %1060 }
 0x254   : > { %1142 = vst.msk [vmem:[#allocation3 + $0x68] sm:$0xff] %vm1128_vm6, %v1059_v39  ;;  %v1979_v35 = vpack.c.bf16 %v1961_v47, %v1960_v44  ;;  %1143 = vst.msk [vmem:[#allocation3 + $0x70] sm:$0xff] %vm1128_vm6, %v1061_v60 }
 0x256   : > { %3209 = vmatmul.mubr.msk.bf16.gmra.mrb[8].mxu1 %vm2009_vm11, %v1979_v35 }
 0x257   : > { %v1091_v34 = vpop.permute.xlu1 %1090  ;;  %v1093_v42 = vpop.permute.xlu0 %1092 }
 0x258   : > { %1158 = vst.msk [vmem:[#allocation3 + $0xe8] sm:$0xff] %vm1128_vm6, %v1091_v34  ;;  %1159 = vst.msk [vmem:[#allocation3 + $0xf0] sm:$0xff] %vm1128_vm6, %v1093_v42 }
 0x25b   : > { %v1063_v57 = vpop.permute.xlu1 %1062  ;;  %v1250_v25 = vpop.permute.xlu0 %1249 }
 0x25c   : > { %1144 = vst.msk [vmem:[#allocation3 + $0x78] sm:$0xff] %vm1128_vm6, %v1063_v57 }
 0x25d   : > { %1334 = vst.msk [vmem:[#allocation3 + $0x60] sm:$0xff] %vm1321_vm7, %v1250_v25 }
 0x25f   : > { %v1095_v9 = vpop.permute.xlu1 %1094  ;;  %v1282_v62 = vpop.permute.xlu0 %1281 }
 0x260   : > { %1160 = vst.msk [vmem:[#allocation3 + $0xf8] sm:$0xff] %vm1128_vm6, %v1095_v9 }
 0x261   : > { %1350 = vst.msk [vmem:[#allocation3 + $0xe0] sm:$0xff] %vm1321_vm7, %v1282_v62 }
 0x263   : > { %v1252_v11 = vpop.permute.xlu1 %1251  ;;  %v1254_v48 = vpop.permute.xlu0 %1253 }
 0x264   : > { %1335 = vst.msk [vmem:[#allocation3 + $0x68] sm:$0xff] %vm1321_vm7, %v1252_v11  ;;  %1336 = vst.msk [vmem:[#allocation3 + $0x70] sm:$0xff] %vm1321_vm7, %v1254_v48 }
 0x267   : > { %v1284_v38 = vpop.permute.xlu1 %1283  ;;  %v1286_v14 = vpop.permute.xlu0 %1285 }
 0x268   : > { %1351 = vst.msk [vmem:[#allocation3 + $0xe8] sm:$0xff] %vm1321_vm7, %v1284_v38  ;;  %1352 = vst.msk [vmem:[#allocation3 + $0xf0] sm:$0xff] %vm1321_vm7, %v1286_v14 }
 0x26b   : > { %v1256_v52 = vpop.permute.xlu1 %1255  ;;  %v1444_v15 = vpop.permute.xlu0 %1443 }
 0x26c   : > { %1337 = vst.msk [vmem:[#allocation3 + $0x78] sm:$0xff] %vm1321_vm7, %v1256_v52 }
 0x26d   : > { %1528 = vst.msk [vmem:[#allocation3 + $0x60] sm:$0xff] %vm1515_vm8, %v1444_v15 }
 0x26f   : > { %v1288_v50 = vpop.permute.xlu1 %1287  ;;  %v1476_v29 = vpop.permute.xlu0 %1475 }
 0x270   : > { %1353 = vst.msk [vmem:[#allocation3 + $0xf8] sm:$0xff] %vm1321_vm7, %v1288_v50 }
 0x271   : > { %1544 = vst.msk [vmem:[#allocation3 + $0xe0] sm:$0xff] %vm1515_vm8, %v1476_v29 }
 0x273   : > { %v1446_v13 = vpop.permute.xlu1 %1445  ;;  %v1448_v16 = vpop.permute.xlu0 %1447 }
 0x274   : > { %1529 = vst.msk [vmem:[#allocation3 + $0x68] sm:$0xff] %vm1515_vm8, %v1446_v13  ;;  %1530 = vst.msk [vmem:[#allocation3 + $0x70] sm:$0xff] %vm1515_vm8, %v1448_v16 }
 0x277   : > { %v1478_v37 = vpop.permute.xlu1 %1477  ;;  %v1480_v17 = vpop.permute.xlu0 %1479 }
 0x278   : > { %1545 = vst.msk [vmem:[#allocation3 + $0xe8] sm:$0xff] %vm1515_vm8, %v1478_v37  ;;  %1546 = vst.msk [vmem:[#allocation3 + $0xf0] sm:$0xff] %vm1515_vm8, %v1480_v17 }
 0x27b   : > { %v1450_v30 = vpop.permute.xlu1 %1449  ;;  %v1637_v18 = vpop.permute.xlu0 %1636 }
 0x27c   : > { %1531 = vst.msk [vmem:[#allocation3 + $0x78] sm:$0xff] %vm1515_vm8, %v1450_v30 }
 0x27d   : > { %1721 = vst.msk [vmem:[#allocation3 + $0x60] sm:$0xff] %vm1708_vm9, %v1637_v18 }
 0x27f   : > { %v1482_v58 = vpop.permute.xlu1 %1481  ;;  %v1669_v40 = vpop.permute.xlu0 %1668 }
 0x280   : > { %1547 = vst.msk [vmem:[#allocation3 + $0xf8] sm:$0xff] %vm1515_vm8, %v1482_v58 }
 0x281   : > { %1737 = vst.msk [vmem:[#allocation3 + $0xe0] sm:$0xff] %vm1708_vm9, %v1669_v40 }
 0x283   : > { %v1639_v43 = vpop.permute.xlu1 %1638  ;;  %v1641_v49 = vpop.permute.xlu0 %1640 }
 0x284   : > { %1722 = vst.msk [vmem:[#allocation3 + $0x68] sm:$0xff] %vm1708_vm9, %v1639_v43  ;;  %1723 = vst.msk [vmem:[#allocation3 + $0x70] sm:$0xff] %vm1708_vm9, %v1641_v49 }
 0x285   : > { %v3186_v55 = vpop.f32.mrb[0].mxu0 }
 0x286   : > { %v4516_v46 = vadd.f32 %v3186_v55, %v4511_v1  ;;  %v2096_v20 = vpop.f32.mrb[1].mxu0 }
 0x287   : > { %v4519_v59 = vadd.f32 %v4511_v1, %v2096_v20  ;;  %v1671_v3 = vpop.permute.xlu1 %1670  ;;  %v3187_v41 = vpop.f32.mrb[2].mxu0 }
 0x288   : > { %v2257_v61 = vmin.f32 %v4516_v46, 0.0  ;;  %1738 = vst.msk [vmem:[#allocation3 + $0xe8] sm:$0xff] %vm1708_vm9, %v1671_v3  ;;  %v4524_v0 = vadd.f32 %v3187_v41, %v4511_v1  ;;  %v2099_v4 = vpop.f32.mrb[3].mxu0  ;;  %v1673_v45 = vpop.permute.xlu0 %1672  ;;  %vm2225_vm14 = vcmp.gt.f32.partialorder %v4516_v46, 0.0 }
 0x289   : > { %v2255_v12 = vmin.f32 %v4519_v59, 0.0  ;;  %v4528_v8 = vadd.f32 %v4511_v1, %v2099_v4  ;;  %v4530_v63 = vpop.f32.mrb[0].mxu1  ;;  %1739 = vst.msk [vmem:[#allocation3 + $0xf0] sm:$0xff] %vm1708_vm9, %v1673_v45  ;;  %vm2223_vm12 = vcmp.gt.f32.partialorder %v4519_v59, 0.0 }
 0x28a   : > { %v2291_v5 = vmul.f32 1.442695, %v2257_v61  ;;  %v2258_v28 = vmin.f32 %v4524_v0, 0.0  ;;  %v4534_v10 = vpop.f32.mrb[1].mxu1  ;;  %vm2226_vm15 = vcmp.gt.f32.partialorder %v4524_v0, 0.0 }
 0x28b   : > { %v2287_v23 = vmul.f32 1.442695, %v2255_v12  ;;  %v2256_v22 = vmin.f32 %v4528_v8, 0.0  ;;  %v4537_v7 = vpop.f32.mrb[2].mxu1  ;;  %v1643_v32 = vpop.permute.xlu1 %1642  ;;  %vm2224_vm13 = vcmp.gt.f32.partialorder %v4528_v8, 0.0 }
 0x28c   : > { %3245 = vpow2.f32 %v2291_v5  ;;  %v2293_v6 = vmul.f32 1.442695, %v2258_v28  ;;  %1724 = vst.msk [vmem:[#allocation3 + $0x78] sm:$0xff] %vm1708_vm9, %v1643_v32  ;;  %v4540_v27 = vpop.f32.mrb[3].mxu1  ;;  %v1830_v19 = vpop.permute.xlu0 %1829 }
 0x28d   : > { %3247 = vpow2.f32 %v2287_v23  ;;  %v2289_v2 = vmul.f32 1.442695, %v2256_v22  ;;  %1914 = vst.msk [vmem:[#allocation3 + $0x60] sm:$0xff] %vm1901_vm10, %v1830_v19 }
 0x28e   : > { %3249 = vpow2.f32 %v2293_v6 }
 0x28f   : > { %v1675_v24 = vpop.permute.xlu1 %1674  ;;  %3251 = vpow2.f32 %v2289_v2 }
 0x290   : > { %1740 = vst.msk [vmem:[#allocation3 + $0xf8] sm:$0xff] %vm1708_vm9, %v1675_v24  ;;  %v1862_v54 = vpop.permute.xlu0 %1861 }
 0x291   : > { %1930 = vst.msk [vmem:[#allocation3 + $0xe0] sm:$0xff] %vm1901_vm10, %v1862_v54 }
 0x293   : > { %v1832_v36 = vpop.permute.xlu1 %1831 }
 0x294   : > { %1915 = vst.msk [vmem:[#allocation3 + $0x68] sm:$0xff] %vm1901_vm10, %v1832_v36  ;;  %v1834_v21 = vpop.permute.xlu0 %1833  ;;  %v1946_v47 = vld [vmem:[#allocation3 + $0x60] sm:$0xff] }
 0x295   : > { %1916 = vst.msk [vmem:[#allocation3 + $0x70] sm:$0xff] %vm1901_vm10, %v1834_v21 }
 0x296   : > { %v3246_v51 = vpop.eup %3245 }
 0x297   : > { %v3248_v26 = vpop.eup %3247  ;;  %v1864_v56 = vpop.permute.xlu1 %1863  ;;  %v3014_v60 = vadd.f32 -1.0, %v3246_v51 }
 0x298   : > { %1931 = vst.msk [vmem:[#allocation3 + $0xe8] sm:$0xff] %vm1901_vm10, %v1864_v56  ;;  %v3012_v31 = vadd.f32 -1.0, %v3248_v26  ;;  %v1866_v33 = vpop.permute.xlu0 %1865  ;;  %v3250_v53 = vpop.eup %3249  ;;  %v1962_v62 = vld [vmem:[#allocation3 + $0xe0] sm:$0xff] }
 0x299   : > { %1932 = vst.msk [vmem:[#allocation3 + $0xf0] sm:$0xff] %vm1901_vm10, %v1866_v33  ;;  %v3252_v39 = vpop.eup %3251  ;;  %v3015_v9 = vadd.f32 -1.0, %v3250_v53  ;;  %v2385_v11 = vsel %vm2225_vm14, %v4516_v46, %v3014_v60 }
 0x29a   : > { %v2383_v44 = vsel %vm2223_vm12, %v4519_v59, %v3012_v31  ;;  %v3013_v34 = vadd.f32 -1.0, %v3252_v39 }
 0x29b   : > { %v1836_v35 = vpop.permute.xlu1 %1835  ;;  %2639 = vrot.lane.b32.xlu0 %v2383_v44, %s3447_s20  ;;  %v1947_v42 = vld [vmem:[#allocation3 + $0x68] sm:$0xff]  ;;  %v2386_v52 = vsel %vm2226_vm15, %v4524_v0, %v3015_v9 }
 0x29c   : > { %1917 = vst.msk [vmem:[#allocation3 + $0x78] sm:$0xff] %vm1901_vm10, %v1836_v35  ;;  %v1972_v57 = vpack.c.bf16 %v1947_v42, %v1946_v47  ;;  %v2384_v25 = vsel %vm2224_vm13, %v4528_v8, %v3013_v34  ;;  %v1948_v15 = vld [vmem:[#allocation3 + $0x70] sm:$0xff] }
 0x29d   : > { %2641 = vrot.lane.b32.xlu1 %v2384_v25, %s3447_s20 }
 0x29e   : > { %3196 = vmatprep.mubr.msk.bf16.mxu0 %vm2009_vm11, %v1972_v57 }
 0x29f   : > { %2643 = vrot.lane.b32.xlu0 %v2385_v11, %s3447_s20  ;;  %v1963_v48 = vld [vmem:[#allocation3 + $0xe8] sm:$0xff]  ;;  %v1868_v38 = vpop.permute.xlu1 %1867 }
 0x2a0   : > { %v1980_v14 = vpack.c.bf16 %v1963_v48, %v1962_v62  ;;  %1933 = vst.msk [vmem:[#allocation3 + $0xf8] sm:$0xff] %vm1901_vm10, %v1868_v38  ;;  %v1964_v13 = vld [vmem:[#allocation3 + $0xf0] sm:$0xff] }
 0x2a1   : > { %2645 = vrot.lane.b32.xlu1 %v2386_v52, %s3447_s20 }
 0x2a2   : > { %3212 = vmatprep.mubr.msk.bf16.mxu1 %vm2009_vm11, %v1980_v14 }
 0x2a3   : > { %v1949_v50 = vld [vmem:[#allocation3 + $0x78] sm:$0xff] }
 0x2a4   : > { %v1973_v29 = vpack.c.bf16 %v1949_v50, %v1948_v15 }
 0x2a6   : > { %3197 = vmatmul.mubr.msk.bf16.gmra.mrb[12].mxu0 %vm2009_vm11, %v1973_v29 }
 0x2a7   : > { %v1965_v16 = vld [vmem:[#allocation3 + $0xf8] sm:$0xff] }
 0x2a8   : > { %v1981_v37 = vpack.c.bf16 %v1965_v16, %v1964_v13 }
 0x2aa   : > { %3213 = vmatmul.mubr.msk.bf16.gmra.mrb[12].mxu1 %vm2009_vm11, %v1981_v37 }
 0x2d5   : > { %v3190_v17 = vpop.f32.mrb[4].mxu0 }
 0x2d6   : > { %v4568_v30 = vadd.f32 %v3190_v17, %v4511_v1  ;;  %v2112_v18 = vpop.f32.mrb[5].mxu0 }
 0x2d7   : > { %v4571_v58 = vadd.f32 %v4511_v1, %v2112_v18  ;;  %v3191_v40 = vpop.f32.mrb[6].mxu0 }
 0x2d8   : > { %v2261_v43 = vmin.f32 %v4568_v30, 0.0  ;;  %v4575_v49 = vadd.f32 %v3191_v40, %v4511_v1  ;;  %v2115_v55 = vpop.f32.mrb[7].mxu0  ;;  %vm2229_vm2 = vcmp.gt.f32.partialorder %v4568_v30, 0.0 }
 0x2d9   : > { %v2259_v20 = vmin.f32 %v4571_v58, 0.0  ;;  %v4579_v3 = vadd.f32 %v4511_v1, %v2115_v55  ;;  %v4581_v41 = vpop.f32.mrb[4].mxu1  ;;  %vm2227_vm0 = vcmp.gt.f32.partialorder %v4571_v58, 0.0 }
 0x2da   : > { %v2299_v61 = vmul.f32 1.442695, %v2261_v43  ;;  %v2262_v4 = vmin.f32 %v4575_v49, 0.0  ;;  %v4584_v45 = vpop.f32.mrb[5].mxu1  ;;  %vm2230_vm3 = vcmp.gt.f32.partialorder %v4575_v49, 0.0 }
 0x2db   : > { %v2295_v12 = vmul.f32 1.442695, %v2259_v20  ;;  %v2260_v5 = vmin.f32 %v4579_v3, 0.0  ;;  %v4587_v28 = vpop.f32.mrb[6].mxu1  ;;  %vm2228_vm1 = vcmp.gt.f32.partialorder %v4579_v3, 0.0 }
 0x2dc   : > { %3253 = vpow2.f32 %v2299_v61  ;;  %v2301_v23 = vmul.f32 1.442695, %v2262_v4  ;;  %v4589_v22 = vpop.f32.mrb[7].mxu1 }
 0x2dd   : > { %3255 = vpow2.f32 %v2295_v12  ;;  %v2297_v32 = vmul.f32 1.442695, %v2260_v5  ;;  %v4641_v5 = vadd.f32 %v4511_v1, %v4534_v10 }
 0x2de   : > { %3257 = vpow2.f32 %v2301_v23 }
 0x2df   : > { %3259 = vpow2.f32 %v2297_v32  ;;  %v4645_v32 = vadd.f32 %v4511_v1, %v4540_v27  ;;  %v2271_v27 = vmin.f32 %v4641_v5, 0.0  ;;  %vm2239_vm11 = vcmp.gt.f32.partialorder %v4641_v5, 0.0 }
 0x2e1   : > { %vm2240_vm13 = vcmp.gt.f32.partialorder %v4645_v32, 0.0 }
 0x2e6   : > { %v3254_v6 = vpop.eup %3253 }
 0x2e7   : > { %v3256_v19 = vpop.eup %3255  ;;  %v3018_v21 = vadd.f32 -1.0, %v3254_v6 }
 0x2e8   : > { %v3016_v2 = vadd.f32 -1.0, %v3256_v19  ;;  %v3258_v24 = vpop.eup %3257 }
 0x2e9   : > { %v3260_v54 = vpop.eup %3259  ;;  %v3019_v56 = vadd.f32 -1.0, %v3258_v24  ;;  %v2389_v31 = vsel %vm2229_vm2, %v4568_v30, %v3018_v21 }
 0x2ea   : > { %v2387_v36 = vsel %vm2227_vm0, %v4571_v58, %v3016_v2  ;;  %v3017_v51 = vadd.f32 -1.0, %v3260_v54  ;;  %v4655_v54 = vadd.f32 %v4530_v63, %v4511_v1  ;;  %v2272_v63 = vmin.f32 %v4645_v32, 0.0 }
 0x2eb   : > { %2647 = vrot.lane.b32.xlu0 %v2387_v36, %s3447_s20  ;;  %v2390_v33 = vsel %vm2230_vm3, %v4575_v49, %v3019_v56 }
 0x2ec   : > { %v2388_v26 = vsel %vm2228_vm1, %v4579_v3, %v3017_v51  ;;  %vm2241_vm14 = vcmp.gt.f32.partialorder %v4655_v54, 0.0 }
 0x2ed   : > { %2649 = vrot.lane.b32.xlu1 %v2388_v26, %s3447_s20 }
 0x2ef   : > { %2651 = vrot.lane.b32.xlu0 %v2389_v31, %s3447_s20  ;;  %v4670_v31 = vadd.f32 %v4537_v7, %v4511_v1  ;;  %v4682_v7 = vadd.f32 %v4511_v1, %v4584_v45 }
 0x2f1   : > { %2653 = vrot.lane.b32.xlu1 %v2390_v33, %s3447_s20  ;;  %v2275_v45 = vmin.f32 %v4682_v7, 0.0  ;;  %vm2242_vm15 = vcmp.gt.f32.partialorder %v4670_v31, 0.0  ;;  %vm2243_vm0 = vcmp.gt.f32.partialorder %v4682_v7, 0.0 }
 0x325   : > { %v3194_v53 = vpop.f32.mrb[8].mxu0 }
 0x326   : > { %v4604_v47 = vadd.f32 %v3194_v53, %v4511_v1  ;;  %v2128_v39 = vpop.f32.mrb[9].mxu0 }
 0x327   : > { %v4607_v44 = vadd.f32 %v4511_v1, %v2128_v39  ;;  %v3195_v60 = vpop.f32.mrb[10].mxu0 }
 0x328   : > { %v2265_v35 = vmin.f32 %v4604_v47, 0.0  ;;  %v4611_v34 = vadd.f32 %v3195_v60, %v4511_v1  ;;  %v2131_v42 = vpop.f32.mrb[11].mxu0  ;;  %vm2233_vm6 = vcmp.gt.f32.partialorder %v4604_v47, 0.0 }
 0x329   : > { %v2263_v57 = vmin.f32 %v4607_v44, 0.0  ;;  %v4615_v25 = vadd.f32 %v4511_v1, %v2131_v42  ;;  %v4617_v9 = vpop.f32.mrb[8].mxu1  ;;  %vm2231_vm4 = vcmp.gt.f32.partialorder %v4607_v44, 0.0 }
 0x32a   : > { %v2307_v62 = vmul.f32 1.442695, %v2265_v35  ;;  %v2266_v11 = vmin.f32 %v4611_v34, 0.0  ;;  %v4620_v48 = vpop.f32.mrb[9].mxu1  ;;  %vm2234_vm7 = vcmp.gt.f32.partialorder %v4611_v34, 0.0 }
 0x32b   : > { %v2303_v38 = vmul.f32 1.442695, %v2263_v57  ;;  %v2264_v14 = vmin.f32 %v4615_v25, 0.0  ;;  %v4623_v52 = vpop.f32.mrb[10].mxu1  ;;  %vm2232_vm5 = vcmp.gt.f32.partialorder %v4615_v25, 0.0  ;;  %v2273_v57 = vmin.f32 %v4655_v54, 0.0 }
 0x32c   : > { %3261 = vpow2.f32 %v2307_v62  ;;  %v2309_v15 = vmul.f32 1.442695, %v2266_v11  ;;  %v4625_v50 = vpop.f32.mrb[11].mxu1 }
 0x32d   : > { %3263 = vpow2.f32 %v2303_v38  ;;  %v2305_v29 = vmul.f32 1.442695, %v2264_v14  ;;  %v2319_v38 = vmul.f32 1.442695, %v2271_v27 }
 0x32e   : > { %3265 = vpow2.f32 %v2309_v15  ;;  %v2274_v15 = vmin.f32 %v4670_v31, 0.0 }
 0x32f   : > { %3267 = vpow2.f32 %v2305_v29  ;;  %v2321_v29 = vmul.f32 1.442695, %v2272_v63 }
 0x336   : > { %v3262_v13 = vpop.eup %3261 }
 0x337   : > { %v3264_v16 = vpop.eup %3263  ;;  %v3022_v43 = vadd.f32 -1.0, %v3262_v13  ;;  %v4687_v13 = vadd.f32 %v4581_v41, %v4511_v1 }
 0x338   : > { %v3020_v37 = vadd.f32 -1.0, %v3264_v16  ;;  %v3266_v17 = vpop.eup %3265  ;;  %v4691_v16 = vadd.f32 %v4511_v1, %v4589_v22  ;;  %v4702_v22 = vadd.f32 %v4511_v1, %v4620_v48 }
 0x339   : > { %v3268_v18 = vpop.eup %3267  ;;  %v3023_v61 = vadd.f32 -1.0, %v3266_v17  ;;  %v2393_v4 = vsel %vm2233_vm6, %v4604_v47, %v3022_v43  ;;  %v2325_v17 = vmul.f32 1.442695, %v2274_v15  ;;  %v2327_v43 = vmul.f32 1.442695, %v2275_v45 }
 0x33a   : > { %v2391_v40 = vsel %vm2231_vm4, %v4607_v44, %v3020_v37  ;;  %v3021_v55 = vadd.f32 -1.0, %v3268_v18  ;;  %v2323_v37 = vmul.f32 1.442695, %v2273_v57  ;;  %v2277_v18 = vmin.f32 %v4687_v13, 0.0 }
 0x33b   : > { %2655 = vrot.lane.b32.xlu0 %v2391_v40, %s3447_s20  ;;  %v2394_v12 = vsel %vm2234_vm7, %v4611_v34, %v3023_v61  ;;  %v4697_v40 = vadd.f32 %v4587_v28, %v4511_v1  ;;  %v2276_v41 = vmin.f32 %v4691_v16, 0.0  ;;  %v2279_v28 = vmin.f32 %v4702_v22, 0.0 }
 0x33c   : > { %v2392_v20 = vsel %vm2232_vm5, %v4615_v25, %v3021_v55  ;;  %vm2244_vm1 = vcmp.gt.f32.partialorder %v4691_v16, 0.0  ;;  %vm2245_vm2 = vcmp.gt.f32.partialorder %v4687_v13, 0.0  ;;  %vm2247_vm4 = vcmp.gt.f32.partialorder %v4702_v22, 0.0 }
 0x33d   : > { %2657 = vrot.lane.b32.xlu1 %v2392_v20, %s3447_s20  ;;  %v2331_v20 = vmul.f32 1.442695, %v2277_v18  ;;  %vm2246_vm3 = vcmp.gt.f32.partialorder %v4697_v40, 0.0 }
 0x33f   : > { %2659 = vrot.lane.b32.xlu0 %v2393_v4, %s3447_s20  ;;  %v2278_v4 = vmin.f32 %v4697_v40, 0.0 }
 0x341   : > { %2661 = vrot.lane.b32.xlu1 %v2394_v12, %s3447_s20  ;;  %v2329_v12 = vmul.f32 1.442695, %v2276_v41  ;;  %v2333_v63 = vmul.f32 1.442695, %v2278_v4 }
 0x379   : > { %v3198_v23 = vpop.f32.mrb[12].mxu0 }
 0x37a   : > { %v4648_v6 = vadd.f32 %v3198_v23, %v4511_v1  ;;  %v2144_v19 = vpop.f32.mrb[13].mxu0  ;;  %v4707_v23 = vadd.f32 %v4617_v9, %v4511_v1  ;;  %v4718_v9 = vadd.f32 %v4623_v52, %v4511_v1 }
 0x37b   : > { %v4651_v2 = vadd.f32 %v4511_v1, %v2144_v19  ;;  %v3199_v24 = vpop.f32.mrb[14].mxu0  ;;  %v4712_v19 = vadd.f32 %v4511_v1, %v4625_v50 }
 0x37c   : > { %v2269_v10 = vmin.f32 %v4648_v6, 0.0  ;;  %v4659_v36 = vadd.f32 %v3199_v24, %v4511_v1  ;;  %v2147_v21 = vpop.f32.mrb[15].mxu0  ;;  %vm2237_vm10 = vcmp.gt.f32.partialorder %v4648_v6, 0.0  ;;  %v2282_v45 = vmin.f32 %v4718_v9, 0.0 }
 0x37d   : > { %v2267_v51 = vmin.f32 %v4651_v2, 0.0  ;;  %v4664_v26 = vadd.f32 %v4511_v1, %v2147_v21  ;;  %v4666_v56 = vpop.f32.mrb[12].mxu1  ;;  %vm2235_vm8 = vcmp.gt.f32.partialorder %v4651_v2, 0.0  ;;  %vm2248_vm5 = vcmp.gt.f32.partialorder %v4712_v19, 0.0 }
 0x37e   : > { %v2315_v33 = vmul.f32 1.442695, %v2269_v10  ;;  %v2270_v53 = vmin.f32 %v4659_v36, 0.0  ;;  %v2208_v39 = vpop.f32.mrb[13].mxu1  ;;  %vm2238_vm12 = vcmp.gt.f32.partialorder %v4659_v36, 0.0  ;;  %vm2249_vm6 = vcmp.gt.f32.partialorder %v4707_v23, 0.0 }
 0x37f   : > { %v2311_v60 = vmul.f32 1.442695, %v2267_v51  ;;  %v2268_v35 = vmin.f32 %v4664_v26, 0.0  ;;  %v4675_v42 = vpop.f32.mrb[14].mxu1  ;;  %vm2236_vm9 = vcmp.gt.f32.partialorder %v4664_v26, 0.0  ;;  %v4725_v57 = vadd.f32 %v4511_v1, %v2208_v39 }
 0x380   : > { %3269 = vpow2.f32 %v2315_v33  ;;  %v2317_v62 = vmul.f32 1.442695, %v2270_v53  ;;  %v4678_v11 = vpop.f32.mrb[15].mxu1  ;;  %v2281_v53 = vmin.f32 %v4707_v23, 0.0 }
 0x381   : > { %3271 = vpow2.f32 %v2311_v60  ;;  %v2313_v14 = vmul.f32 1.442695, %v2268_v35  ;;  %v2335_v60 = vmul.f32 1.442695, %v2279_v28  ;;  %v2280_v35 = vmin.f32 %v4712_v19, 0.0 }
 0x382   : > { %3273 = vpow2.f32 %v2317_v62  ;;  %v2339_v18 = vmul.f32 1.442695, %v2281_v53  ;;  %v2341_v28 = vmul.f32 1.442695, %v2282_v45  ;;  %vm2251_vm7 = vcmp.gt.f32.partialorder %v4725_v57, 0.0 }
 0x383   : > { %3275 = vpow2.f32 %v2313_v14  ;;  %v3044_v14 = vmul.f32 -1.442695, %v4519_v59  ;;  %v2337_v41 = vmul.f32 1.442695, %v2280_v35  ;;  %v4743_v59 = vadd.f32 %v4666_v56, %v4511_v1 }
 0x384   : > { %3277 = vpow2.f32 %v2319_v38  ;;  %v3046_v38 = vmul.f32 -1.442695, %v4516_v46  ;;  %v4738_v46 = vadd.f32 %v4511_v1, %v4678_v11 }
 0x385   : > { %3279 = vpow2.f32 %v2321_v29 }
 0x386   : > { %3281 = vpow2.f32 %v2323_v37 }
 0x387   : > { %3283 = vpow2.f32 %v2325_v17 }
 0x388   : > { %3285 = vpow2.f32 %v2327_v43  ;;  %v2283_v43 = vmin.f32 %v4725_v57, 0.0 }
 0x389   : > { %3287 = vpow2.f32 %v2331_v20  ;;  %v3045_v20 = vmul.f32 -1.442695, %v4528_v8  ;;  %v4755_v8 = vadd.f32 %v4675_v42, %v4511_v1  ;;  %v3048_v1 = vmul.f32 -1.442695, %v4571_v58 }
 0x38a   : > { %v3270_v55 = vpop.eup %3269  ;;  %3289 = vpow2.f32 %v2329_v12 }
 0x38b   : > { %v3272_v61 = vpop.eup %3271  ;;  %v3026_v27 = vadd.f32 -1.0, %v3270_v55  ;;  %3291 = vpow2.f32 %v2333_v63  ;;  %v2286_v42 = vmin.f32 %v4755_v8, 0.0 }
 0x38c   : > { %v3024_v48 = vadd.f32 -1.0, %v3272_v61  ;;  %v3274_v24 = vpop.eup %3273  ;;  %3293 = vpow2.f32 %v2335_v60 }
 0x38d   : > { %v3276_v10 = vpop.eup %3275  ;;  %v3027_v52 = vadd.f32 -1.0, %v3274_v24  ;;  %v2397_v15 = vsel %vm2237_vm10, %v4648_v6, %v3026_v27  ;;  %3295 = vpow2.f32 %v3044_v14  ;;  %v3049_v14 = vmul.f32 -1.442695, %v4579_v3 }
 0x38e   : > { %v2395_v21 = vsel %vm2235_vm8, %v4651_v2, %v3024_v48  ;;  %v3278_v51 = vpop.eup %3277  ;;  %v3025_v50 = vadd.f32 -1.0, %v3276_v10  ;;  %3297 = vpow2.f32 %v3046_v38  ;;  %v2284_v48 = vmin.f32 %v4738_v46, 0.0 }
 0x38f   : > { %2663 = vrot.lane.b32.xlu0 %v2395_v21, %s3447_s20  ;;  %v3280_v33 = vpop.eup %3279  ;;  %v3028_v29 = vadd.f32 -1.0, %v3278_v51  ;;  %v2398_v55 = vsel %vm2238_vm12, %v4659_v36, %v3027_v52  ;;  %3299 = vpow2.f32 %v2337_v41  ;;  %v2285_v10 = vmin.f32 %v4743_v59, 0.0 }
 0x390   : > { %v2396_v62 = vsel %vm2236_vm9, %v4664_v26, %v3025_v50  ;;  %v3282_v37 = vpop.eup %3281  ;;  %v3029_v39 = vadd.f32 -1.0, %v3280_v33  ;;  %3301 = vpow2.f32 %v2339_v18  ;;  %v2343_v21 = vmul.f32 1.442695, %v2283_v43 }
 0x391   : > { %2665 = vrot.lane.b32.xlu1 %v2396_v62, %s3447_s20  ;;  %v3284_v17 = vpop.eup %3283  ;;  %v2399_v61 = vsel %vm2239_vm11, %v4641_v5, %v3028_v29  ;;  %v3030_v11 = vadd.f32 -1.0, %v3282_v37  ;;  %v3047_v51 = vmul.f32 -1.442695, %v4524_v0  ;;  %3303 = vpow2.f32 %v3045_v20 }
 0x392   : > { %v3286_v4 = vpop.eup %3285  ;;  %v3031_v56 = vadd.f32 -1.0, %v3284_v17  ;;  %v2400_v27 = vsel %vm2240_vm13, %v4645_v32, %v3029_v39  ;;  %3305 = vpow2.f32 %v2341_v28  ;;  %v2345_v33 = vmul.f32 1.442695, %v2284_v48 }
 0x393   : > { %2667 = vrot.lane.b32.xlu0 %v2397_v15, %s3447_s20  ;;  %v3288_v12 = vpop.eup %3287  ;;  %v2401_v63 = vsel %vm2241_vm14, %v4655_v54, %v3030_v11  ;;  %v3032_v50 = vadd.f32 -1.0, %v3286_v4  ;;  %v2347_v0 = vmul.f32 1.442695, %v2285_v10  ;;  %3307 = vpow2.f32 %v2343_v21 }
 0x394   : > { %v3290_v24 = vpop.eup %3289  ;;  %v2402_v53 = vsel %vm2242_vm15, %v4670_v31, %v3031_v56  ;;  %3309 = vpow2.f32 %v3047_v51  ;;  %v3050_v62 = vmul.f32 -1.442695, %v4568_v30  ;;  %v3034_v52 = vadd.f32 -1.0, %v3288_v12 }
 0x395   : > { %2669 = vrot.lane.b32.xlu1 %v2398_v55, %s3447_s20  ;;  %v3292_v60 = vpop.eup %3291  ;;  %v3033_v35 = vadd.f32 -1.0, %v3290_v24  ;;  %v2403_v58 = vsel %vm2243_vm0, %v4682_v7, %v3032_v50  ;;  %3311 = vpow2.f32 %v3048_v1  ;;  %v2349_v29 = vmul.f32 1.442695, %v2286_v42 }
 0x396   : > { %v3294_v38 = vpop.eup %3293  ;;  %3313 = vpow2.f32 %v2345_v33  ;;  %v3035_v45 = vadd.f32 -1.0, %v3292_v60  ;;  %v2405_v3 = vsel %vm2245_vm2, %v4687_v13, %v3034_v52  ;;  %v3051_v55 = vmul.f32 -1.442695, %v4575_v49 }
 0x397   : > { %2671 = vrot.lane.b32.xlu0 %v2399_v61, %s3447_s20  ;;  %v3296_v15 = vpop.eup %3295  ;;  %3315 = vpow2.f32 %v2347_v0  ;;  %v2404_v30 = vsel %vm2244_vm1, %v4691_v16, %v3033_v35  ;;  %v3036_v17 = vadd.f32 -1.0, %v3294_v38  ;;  %v3052_v20 = vmul.f32 -1.442695, %v4607_v44 }
 0x398   : > { %v3298_v37 = vpop.eup %3297  ;;  %3317 = vpow2.f32 %v3050_v62  ;;  %v2511_v41 = vadd.f32 1.0, %v3296_v15  ;;  %v2406_v61 = vsel %vm2246_vm3, %v4697_v40, %v3035_v45  ;;  %v3054_v44 = vmul.f32 -1.442695, %v4604_v47 }
 0x399   : > { %2673 = vrot.lane.b32.xlu1 %v2400_v27, %s3447_s20  ;;  %v3300_v39 = vpop.eup %3299  ;;  %3319 = vpow2.f32 %v3049_v14  ;;  %v2513_v56 = vadd.f32 1.0, %v3298_v37  ;;  %v2407_v12 = vsel %vm2247_vm4, %v4702_v22, %v3036_v17  ;;  %v3053_v10 = vmul.f32 -1.442695, %v4615_v25  ;;  %v2640_v25 = vpop.permute.xlu0 %2639 }
 0x39a   : > { %v3302_v18 = vpop.eup %3301  ;;  %3321 = vpow2.f32 %v2349_v29  ;;  %v3037_v11 = vadd.f32 -1.0, %v3300_v39  ;;  %v3055_v33 = vmul.f32 -1.442695, %v4611_v34  ;;  %vm2250_vm8 = vcmp.gt.f32.partialorder %v4718_v9, 0.0  ;;  %v2642_v14 = vpop.permute.xlu1 %2641 }
 0x39b   : > { %2675 = vrot.lane.b32.xlu0 %v2401_v63, %s3447_s20  ;;  %v3304_v43 = vpop.eup %3303  ;;  %v3038_v28 = vadd.f32 -1.0, %v3302_v18  ;;  %3323 = vrcp.f32 %v2511_v41  ;;  %vm2252_vm9 = vcmp.gt.f32.partialorder %v4738_v46, 0.0  ;;  %vm2253_vm10 = vcmp.gt.f32.partialorder %v4743_v59, 0.0 }
 0x39c   : > { %v3306_v4 = vpop.eup %3305  ;;  %v2512_v24 = vadd.f32 1.0, %v3304_v43  ;;  %3325 = vpow2.f32 %v3051_v55  ;;  %v2408_v27 = vsel %vm2248_vm5, %v4712_v19, %v3037_v11  ;;  %vm2254_vm11 = vcmp.gt.f32.partialorder %v4755_v8, 0.0 }
 0x39d   : > { %2677 = vrot.lane.b32.xlu1 %v2402_v53, %s3447_s20  ;;  %v3308_v48 = vpop.eup %3307  ;;  %3327 = vpow2.f32 %v3052_v20  ;;  %v3039_v51 = vadd.f32 -1.0, %v3306_v4  ;;  %v2409_v50 = vsel %vm2249_vm6, %v4707_v23, %v3038_v28  ;;  %v2644_v39 = vpop.permute.xlu0 %2643  ;;  %vm2895_vm12 = vcmask 64512  }
 0x39e   : > { %v3310_v49 = vpop.eup %3309  ;;  %3329 = vrcp.f32 %v2513_v56  ;;  %v3040_v1 = vadd.f32 -1.0, %v3308_v48  ;;  %v2646_v20 = vpop.permute.xlu1 %2645 }
 0x39f   : > { %2679 = vrot.lane.b32.xlu0 %v2403_v58, %s3447_s20  ;;  %v3312_v21 = vpop.eup %3311  ;;  %3331 = vrcp.f32 %v2512_v24  ;;  %v2514_v60 = vadd.f32 1.0, %v3310_v49  ;;  %v2410_v0 = vsel %vm2250_vm8, %v4718_v9, %v3039_v51 }
 0x3a0   : > { %v3314_v63 = vpop.eup %3313  ;;  %3333 = vpow2.f32 %v3053_v10  ;;  %v2515_v58 = vadd.f32 1.0, %v3312_v21  ;;  %v2411_v52 = vsel %vm2251_vm7, %v4725_v57, %v3040_v1 }
 0x3a1   : > { %2681 = vrot.lane.b32.xlu1 %v2404_v30, %s3447_s20  ;;  %v3316_v42 = vpop.eup %3315  ;;  %3335 = vpow2.f32 %v3054_v44  ;;  %v3041_v35 = vadd.f32 -1.0, %v3314_v63  ;;  %v2648_v56 = vpop.permute.xlu0 %2647 }
 0x3a2   : > { %v3318_v47 = vpop.eup %3317  ;;  %v3042_v38 = vadd.f32 -1.0, %v3316_v42  ;;  %3337 = vpow2.f32 %v3055_v33  ;;  %v2650_v49 = vpop.permute.xlu1 %2649 }
 0x3a3   : > { %2683 = vrot.lane.b32.xlu0 %v2405_v3, %s3447_s20  ;;  %v3320_v53 = vpop.eup %3319  ;;  %3339 = vrcp.f32 %v2514_v60  ;;  %v2412_v29 = vsel %vm2252_vm9, %v4738_v46, %v3041_v35  ;;  %v2517_v45 = vadd.f32 1.0, %v3318_v47 }
 0x3a4   : > { %v3322_v62 = vpop.eup %3321  ;;  %v2516_v15 = vadd.f32 1.0, %v3320_v53  ;;  %3341 = vrcp.f32 %v2515_v58  ;;  %v2413_v3 = vsel %vm2253_vm10, %v4743_v59, %v3042_v38 }
 0x3a5   : > { %2685 = vrot.lane.b32.xlu1 %v2406_v61, %s3447_s20  ;;  %v3324_v34 = vpop.eup %3323  ;;  %v3043_v37 = vadd.f32 -1.0, %v3322_v62  ;;  %v2652_v63 = vpop.permute.xlu0 %2651 }
 0x3a6   : > { %v3326_v30 = vpop.eup %3325  ;;  %v2735_v55 = vmul.f32 %v3324_v34, %v2640_v25  ;;  %3343 = vrcp.f32 %v2516_v15  ;;  %v2654_v47 = vpop.permute.xlu1 %2653 }
 0x3a7   : > { %2687 = vrot.lane.b32.xlu0 %v2407_v12, %s3447_s20  ;;  %v3328_v17 = vpop.eup %3327  ;;  %v2518_v43 = vadd.f32 1.0, %v3326_v30  ;;  %v2414_v61 = vsel %vm2254_vm11, %v4755_v8, %v3043_v37  ;;  %3345 = vrcp.f32 %v2517_v45 }
 0x3a8   : > { %v3330_v18 = vpop.eup %3329  ;;  %v2519_v4 = vadd.f32 1.0, %v3328_v17  ;;  %v3058_v17 = vmul.f32 -1.442695, %v4648_v6  ;;  %v3065_v6 = vmul.f32 -1.442695, %v4691_v16 }
 0x3a9   : > { %2689 = vrot.lane.b32.xlu1 %v2408_v27, %s3447_s20  ;;  %v3332_v41 = vpop.eup %3331  ;;  %v2737_v48 = vmul.f32 %v3330_v18, %v2644_v39  ;;  %3347 = vrcp.f32 %v2518_v43  ;;  %v3056_v39 = vmul.f32 -1.442695, %v4651_v2  ;;  %v3059_v18 = vmul.f32 -1.442695, %v4659_v36 }
 0x3aa   : > { %v3334_v11 = vpop.eup %3333  ;;  %v2736_v28 = vmul.f32 %v3332_v41, %v2642_v14  ;;  %3349 = vrcp.f32 %v2519_v4  ;;  %v3060_v41 = vmul.f32 -1.442695, %v4641_v5  ;;  %v3061_v43 = vmul.f32 -1.442695, %v4645_v32 }
 0x3ab   : > { %2691 = vrot.lane.b32.xlu0 %v2409_v50, %s3447_s20  ;;  %v3336_v12 = vpop.eup %3335  ;;  %v2520_v24 = vadd.f32 1.0, %v3334_v11  ;;  %v3066_v11 = vmul.f32 -1.442695, %v4687_v13 }
 0x3ac   : > { %v3338_v44 = vpop.eup %3337  ;;  %v2521_v10 = vadd.f32 1.0, %v3336_v12 }
 0x3ad   : > { %2693 = vrot.lane.b32.xlu1 %v2410_v0, %s3447_s20  ;;  %v3340_v21 = vpop.eup %3339  ;;  %v2522_v50 = vadd.f32 1.0, %v3338_v44  ;;  %3351 = vrcp.f32 %v2520_v24  ;;  %v2656_v53 = vpop.permute.xlu0 %2655  ;;  %v3070_v44 = vmul.f32 -1.442695, %v4707_v23 }
 0x3ae   : > { %v3342_v27 = vpop.eup %3341  ;;  %v2738_v51 = vmul.f32 %v3340_v21, %v2646_v20  ;;  %3353 = vrcp.f32 %v2521_v10  ;;  %v3063_v20 = vmul.f32 -1.442695, %v4670_v31 }
 0x3af   : > { %2695 = vrot.lane.b32.xlu0 %v2411_v52, %s3447_s20  ;;  %v2739_v1 = vmul.f32 %v3342_v27, %v2648_v56  ;;  %3355 = vrcp.f32 %v2522_v50  ;;  %v2658_v35 = vpop.permute.xlu1 %2657  ;;  %v3067_v56 = vmul.f32 -1.442695, %v4697_v40  ;;  %v3072_v50 = vmul.f32 -1.442695, %v4725_v57 }
 0x3b0   : > { %v3344_v42 = vpop.eup %3343  ;;  %3357 = vpow2.f32 %v3056_v39 }
 0x3b1   : > { %2697 = vrot.lane.b32.xlu1 %v2412_v29, %s3447_s20  ;;  %v3346_v25 = vpop.eup %3345  ;;  %v2740_v33 = vmul.f32 %v3344_v42, %v2650_v49  ;;  %v2660_v38 = vpop.permute.xlu0 %2659  ;;  %v3069_v49 = vmul.f32 -1.442695, %v4712_v19 }
 0x3b2   : > { %v2741_v60 = vmul.f32 %v3346_v25, %v2652_v63 }
 0x3b3   : > { %2699 = vrot.lane.b32.xlu0 %v2413_v3, %s3447_s20  ;;  %v3348_v0 = vpop.eup %3347  ;;  %v2662_v37 = vpop.permute.xlu1 %2661  ;;  %v3057_v3 = vmul.f32 -1.442695, %v4664_v26  ;;  %v3064_v26 = vmul.f32 -1.442695, %v4682_v7  ;;  %v3068_v7 = vmul.f32 -1.442695, %v4702_v22 }
 0x3b4   : > { %v3350_v62 = vpop.eup %3349  ;;  %v2742_v58 = vmul.f32 %v3348_v0, %v2654_v47 }
 0x3b5   : > { %2701 = vrot.lane.b32.xlu1 %v2414_v61, %s3447_s20  ;;  %v2743_v52 = vmul.f32 %v3350_v62, %v2656_v53  ;;  %3359 = vpow2.f32 %v3057_v3  ;;  %v3073_v53 = vmul.f32 -1.442695, %v4738_v46  ;;  %v3075_v46 = vmul.f32 -1.442695, %v4755_v8 }
 0x3b6   : > { %3361 = vpow2.f32 %v3058_v17 }
 0x3b7   : > { %2799 = vrot.lane.b32.xlu0 %v2735_v55, %s3454_s8  ;;  %v3352_v14 = vpop.eup %3351  ;;  %3363 = vpow2.f32 %v3059_v18  ;;  %v3062_v55 = vmul.f32 -1.442695, %v4655_v54 }
 0x3b8   : > { %v3354_v34 = vpop.eup %3353  ;;  %v2744_v15 = vmul.f32 %v3352_v14, %v2658_v35  ;;  %3365 = vpow2.f32 %v3060_v41  ;;  %v3074_v35 = vmul.f32 -1.442695, %v4743_v59 }
 0x3b9   : > { %2801 = vrot.lane.b32.xlu1 %v2736_v28, %s3454_s8  ;;  %v2745_v29 = vmul.f32 %v3354_v34, %v2660_v38  ;;  %v3356_v30 = vpop.eup %3355  ;;  %3367 = vpow2.f32 %v3061_v43 }
 0x3ba   : > { %v2746_v45 = vmul.f32 %v3356_v30, %v2662_v37  ;;  %v3358_v2 = vpop.eup %3357  ;;  %3369 = vpow2.f32 %v3062_v55 }
 0x3bb   : > { %2803 = vrot.lane.b32.xlu0 %v2737_v48, %s3454_s8  ;;  %3371 = vpow2.f32 %v3063_v20  ;;  %v2523_v61 = vadd.f32 1.0, %v3358_v2 }
 0x3bc   : > { %3373 = vpow2.f32 %v3064_v26 }
 0x3bd   : > { %2805 = vrot.lane.b32.xlu1 %v2738_v51, %s3454_s8  ;;  %3375 = vpow2.f32 %v3065_v6  ;;  %v3071_v51 = vmul.f32 -1.442695, %v4718_v9 }
 0x3be   : > { %3377 = vrcp.f32 %v2523_v61 }
 0x3bf   : > { %2807 = vrot.lane.b32.xlu0 %v2739_v1, %s3454_s8  ;;  %v3360_v36 = vpop.eup %3359  ;;  %3379 = vpow2.f32 %v3066_v11 }
 0x3c0   : > { %v3362_v5 = vpop.eup %3361  ;;  %v2524_v32 = vadd.f32 1.0, %v3360_v36 }
 0x3c1   : > { %2809 = vrot.lane.b32.xlu1 %v2740_v33, %s3454_s8  ;;  %v3364_v54 = vpop.eup %3363  ;;  %v2525_v4 = vadd.f32 1.0, %v3362_v5 }
 0x3c2   : > { %v3366_v31 = vpop.eup %3365  ;;  %v2526_v16 = vadd.f32 1.0, %v3364_v54  ;;  %3381 = vrcp.f32 %v2524_v32 }
 0x3c3   : > { %2811 = vrot.lane.b32.xlu0 %v2741_v60, %s3454_s8  ;;  %v3368_v12 = vpop.eup %3367  ;;  %v2527_v28 = vadd.f32 1.0, %v3366_v31  ;;  %3383 = vrcp.f32 %v2525_v4 }
 0x3c4   : > { %v3370_v48 = vpop.eup %3369  ;;  %v2528_v24 = vadd.f32 1.0, %v3368_v12  ;;  %3385 = vpow2.f32 %v3067_v56 }
 0x3c5   : > { %2813 = vrot.lane.b32.xlu1 %v2742_v58, %s3454_s8  ;;  %v3372_v13 = vpop.eup %3371  ;;  %3387 = vpow2.f32 %v3068_v7  ;;  %v2529_v40 = vadd.f32 1.0, %v3370_v48 }
 0x3c6   : > { %3389 = vrcp.f32 %v2526_v16  ;;  %v3374_v10 = vpop.eup %3373  ;;  %v2530_v27 = vadd.f32 1.0, %v3372_v13 }
 0x3c7   : > { %2815 = vrot.lane.b32.xlu0 %v2743_v52, %s3454_s8  ;;  %3391 = vrcp.f32 %v2527_v28  ;;  %v3376_v21 = vpop.eup %3375  ;;  %v2531_v19 = vadd.f32 1.0, %v3374_v10 }
 0x3c8   : > { %3393 = vrcp.f32 %v2528_v24  ;;  %v3378_v22 = vpop.eup %3377  ;;  %v2532_v47 = vadd.f32 1.0, %v3376_v21 }
 0x3c9   : > { %2817 = vrot.lane.b32.xlu1 %v2744_v15, %s3454_s8  ;;  %3395 = vpow2.f32 %v3069_v49  ;;  %v3380_v42 = vpop.eup %3379 }
 0x3ca   : > { %3397 = vpow2.f32 %v3070_v44  ;;  %v2533_v58 = vadd.f32 1.0, %v3380_v42 }
 0x3cb   : > { %2819 = vrot.lane.b32.xlu0 %v2745_v29, %s3454_s8  ;;  %3399 = vrcp.f32 %v2529_v40 }
 0x3cc   : > { %v3382_v23 = vpop.eup %3381  ;;  %3401 = vrcp.f32 %v2530_v27 }
 0x3cd   : > { %2821 = vrot.lane.b32.xlu1 %v2746_v45, %s3454_s8  ;;  %v3384_v33 = vpop.eup %3383  ;;  %3403 = vpow2.f32 %v3071_v51 }
 0x3ce   : > { %v3386_v0 = vpop.eup %3385  ;;  %3405 = vpow2.f32 %v3072_v50 }
 0x3cf   : > { %v3388_v62 = vpop.eup %3387  ;;  %3407 = vrcp.f32 %v2531_v19  ;;  %v2534_v59 = vadd.f32 1.0, %v3386_v0 }
 0x3d0   : > { %v3390_v52 = vpop.eup %3389  ;;  %3409 = vrcp.f32 %v2532_v47  ;;  %v2535_v45 = vadd.f32 1.0, %v3388_v62 }
 0x3d1   : > { %v3392_v14 = vpop.eup %3391  ;;  %3411 = vpow2.f32 %v3073_v53 }
 0x3d2   : > { %v3394_v29 = vpop.eup %3393  ;;  %3413 = vpow2.f32 %v3074_v35 }
 0x3d3   : > { %v3396_v30 = vpop.eup %3395  ;;  %3415 = vrcp.f32 %v2533_v58 }
 0x3d4   : > { %v3398_v39 = vpop.eup %3397  ;;  %3417 = vpow2.f32 %v3075_v46  ;;  %v2536_v43 = vadd.f32 1.0, %v3396_v30 }
 0x3d5   : > { %v3400_v17 = vpop.eup %3399  ;;  %3419 = vrcp.f32 %v2534_v59  ;;  %v2537_v2 = vadd.f32 1.0, %v3398_v39 }
 0x3d6   : > { %v3402_v41 = vpop.eup %3401  ;;  %3421 = vrcp.f32 %v2535_v45 }
 0x3d7   : > { %v3404_v20 = vpop.eup %3403  ;;  %3423 = vrcp.f32 %v2536_v43 }
 0x3d8   : > { %v3406_v26 = vpop.eup %3405  ;;  %v2538_v32 = vadd.f32 1.0, %v3404_v20  ;;  %3425 = vrcp.f32 %v2537_v2 }
 0x3d9   : > { %v3408_v36 = vpop.eup %3407  ;;  %v2539_v31 = vadd.f32 1.0, %v3406_v26 }
 0x3da   : > { %v3410_v11 = vpop.eup %3409  ;;  %3427 = vrcp.f32 %v2538_v32 }
 0x3db   : > { %v3412_v4 = vpop.eup %3411  ;;  %3429 = vrcp.f32 %v2539_v31 }
 0x3dc   : > { %v3414_v56 = vpop.eup %3413  ;;  %v2540_v48 = vadd.f32 1.0, %v3412_v4 }
 0x3dd   : > { %v3416_v7 = vpop.eup %3415  ;;  %v2541_v49 = vadd.f32 1.0, %v3414_v56 }
 0x3de   : > { %v3418_v13 = vpop.eup %3417  ;;  %3431 = vrcp.f32 %v2540_v48 }
 0x3df   : > { %v3420_v44 = vpop.eup %3419  ;;  %3433 = vrcp.f32 %v2541_v49 }
 0x3e0   : > { %v3422_v40 = vpop.eup %3421 }
 0x401   : > { %v2664_v63 = vpop.permute.xlu0 %2663 }
 0x402   : > { %v2747_v1 = vmul.f32 %v3378_v22, %v2664_v63  ;;  %v2542_v22 = vadd.f32 1.0, %v3418_v13  ;;  %v3424_v63 = vpop.eup %3423 }
 0x403   : > { %v2666_v25 = vpop.permute.xlu1 %2665 }
 0x404   : > { %2823 = vrot.lane.b32.xlu0 %v2747_v1, %s3454_s8  ;;  %v2748_v9 = vmul.f32 %v3382_v23, %v2666_v25  ;;  %v3426_v1 = vpop.eup %3425  ;;  %3435 = vrcp.f32 %v2542_v22 }
 0x405   : > { %v2668_v60 = vpop.permute.xlu0 %2667  ;;  %v3428_v47 = vpop.eup %3427 }
 0x406   : > { %v2749_v57 = vmul.f32 %v3384_v33, %v2668_v60  ;;  %2825 = vrot.lane.b32.xlu1 %v2748_v9, %s3454_s8  ;;  %v3430_v33 = vpop.eup %3429 }
 0x407   : > { %v2670_v38 = vpop.permute.xlu1 %2669  ;;  %v3432_v0 = vpop.eup %3431 }
 0x408   : > { %2827 = vrot.lane.b32.xlu0 %v2749_v57, %s3454_s8  ;;  %v2750_v34 = vmul.f32 %v3390_v52, %v2670_v38  ;;  %v3434_v57 = vpop.eup %3433 }
 0x409   : > { %v2672_v15 = vpop.permute.xlu0 %2671 }
 0x40a   : > { %v2751_v37 = vmul.f32 %v3392_v14, %v2672_v15  ;;  %2829 = vrot.lane.b32.xlu1 %v2750_v34, %s3454_s8 }
 0x40b   : > { %v2674_v3 = vpop.permute.xlu1 %2673 }
 0x40c   : > { %2831 = vrot.lane.b32.xlu0 %v2751_v37, %s3454_s8  ;;  %v2752_v18 = vmul.f32 %v3394_v29, %v2674_v3 }
 0x40d   : > { %v2676_v8 = vpop.permute.xlu0 %2675 }
 0x40e   : > { %v2753_v55 = vmul.f32 %v3400_v17, %v2676_v8  ;;  %2833 = vrot.lane.b32.xlu1 %v2752_v18, %s3454_s8  ;;  %v3436_v38 = vpop.eup %3435 }
 0x40f   : > { %v2678_v6 = vpop.permute.xlu1 %2677 }
 0x410   : > { %2835 = vrot.lane.b32.xlu0 %v2753_v55, %s3454_s8  ;;  %v2754_v61 = vmul.f32 %v3402_v41, %v2678_v6 }
 0x411   : > { %v2680_v5 = vpop.permute.xlu0 %2679 }
 0x412   : > { %v2755_v54 = vmul.f32 %v3408_v36, %v2680_v5  ;;  %2837 = vrot.lane.b32.xlu1 %v2754_v61, %s3454_s8 }
 0x413   : > { %v2682_v12 = vpop.permute.xlu1 %2681 }
 0x414   : > { %2839 = vrot.lane.b32.xlu0 %v2755_v54, %s3454_s8  ;;  %v2756_v16 = vmul.f32 %v3410_v11, %v2682_v12 }
 0x415   : > { %v2684_v28 = vpop.permute.xlu0 %2683 }
 0x416   : > { %v2757_v24 = vmul.f32 %v3416_v7, %v2684_v28  ;;  %2841 = vrot.lane.b32.xlu1 %v2756_v16, %s3454_s8 }
 0x417   : > { %v2686_v10 = vpop.permute.xlu1 %2685 }
 0x418   : > { %2843 = vrot.lane.b32.xlu0 %v2757_v24, %s3454_s8  ;;  %v2758_v21 = vmul.f32 %v3420_v44, %v2686_v10 }
 0x419   : > { %v2688_v27 = vpop.permute.xlu0 %2687 }
 0x41a   : > { %v2759_v51 = vmul.f32 %v3422_v40, %v2688_v27  ;;  %2845 = vrot.lane.b32.xlu1 %v2758_v21, %s3454_s8 }
 0x41b   : > { %v2690_v50 = vpop.permute.xlu1 %2689 }
 0x41c   : > { %2847 = vrot.lane.b32.xlu0 %v2759_v51, %s3454_s8  ;;  %v2760_v42 = vmul.f32 %v3424_v63, %v2690_v50 }
 0x41d   : > { %v2692_v19 = vpop.permute.xlu0 %2691 }
 0x41e   : > { %v2761_v23 = vmul.f32 %v3426_v1, %v2692_v19  ;;  %2849 = vrot.lane.b32.xlu1 %v2760_v42, %s3454_s8 }
 0x41f   : > { %v2694_v25 = vpop.permute.xlu1 %2693 }
 0x420   : > { %2851 = vrot.lane.b32.xlu0 %v2761_v23, %s3454_s8  ;;  %v2762_v53 = vmul.f32 %v3428_v47, %v2694_v25 }
 0x421   : > { %v2696_v9 = vpop.permute.xlu0 %2695 }
 0x422   : > { %v2763_v60 = vmul.f32 %v3430_v33, %v2696_v9  ;;  %2853 = vrot.lane.b32.xlu1 %v2762_v53, %s3454_s8 }
 0x423   : > { %v2698_v35 = vpop.permute.xlu1 %2697 }
 0x424   : > { %2855 = vrot.lane.b32.xlu0 %v2763_v60, %s3454_s8  ;;  %v2764_v62 = vmul.f32 %v3432_v0, %v2698_v35 }
 0x425   : > { %v2700_v58 = vpop.permute.xlu0 %2699 }
 0x426   : > { %v2765_v52 = vmul.f32 %v3434_v57, %v2700_v58  ;;  %2857 = vrot.lane.b32.xlu1 %v2764_v62, %s3454_s8 }
 0x427   : > { %v2702_v14 = vpop.permute.xlu1 %2701 }
 0x428   : > { %2859 = vrot.lane.b32.xlu0 %v2765_v52, %s3454_s8  ;;  %v2766_v46 = vmul.f32 %v3436_v38, %v2702_v14 }
 0x429   : > { %v2800_v34 = vpop.permute.xlu0 %2799 }
 0x42a   : > { %2896 = vst.msk [vmem:[%s4866_s14] sm:$0xff] %vm2895_vm12, %v2800_v34  ;;  %2861 = vrot.lane.b32.xlu1 %v2766_v46, %s3454_s8 }
 0x42b   : > { %v2802_v15 = vpop.permute.xlu1 %2801 }
 0x42c   : > { %2897 = vst.msk [vmem:[%s4866_s14 + $0x8] sm:$0xff] %vm2895_vm12, %v2802_v15 }
 0x42d   : > { %v2804_v29 = vpop.permute.xlu0 %2803 }
 0x42e   : > { %2898 = vst.msk [vmem:[%s4866_s14 + $0x10] sm:$0xff] %vm2895_vm12, %v2804_v29 }
 0x42f   : > { %v2806_v59 = vpop.permute.xlu1 %2805 }
 0x430   : > { %2899 = vst.msk [vmem:[%s4866_s14 + $0x18] sm:$0xff] %vm2895_vm12, %v2806_v59 }
 0x431   : > { %v2808_v37 = vpop.permute.xlu0 %2807 }
 0x432   : > { %2900 = vst.msk [vmem:[%s4866_s14 + $0x20] sm:$0xff] %vm2895_vm12, %v2808_v37 }
 0x433   : > { %v2810_v30 = vpop.permute.xlu1 %2809 }
 0x434   : > { %2901 = vst.msk [vmem:[%s4866_s14 + $0x28] sm:$0xff] %vm2895_vm12, %v2810_v30 }
 0x435   : > { %v2812_v45 = vpop.permute.xlu0 %2811 }
 0x436   : > { %2902 = vst.msk [vmem:[%s4866_s14 + $0x30] sm:$0xff] %vm2895_vm12, %v2812_v45 }
 0x437   : > { %v2814_v39 = vpop.permute.xlu1 %2813 }
 0x438   : > { %2903 = vst.msk [vmem:[%s4866_s14 + $0x38] sm:$0xff] %vm2895_vm12, %v2814_v39 }
 0x439   : > { %v2816_v3 = vpop.permute.xlu0 %2815 }
 0x43a   : > { %2904 = vst.msk [vmem:[%s4866_s14 + $0x40] sm:$0xff] %vm2895_vm12, %v2816_v3 }
 0x43b   : > { %v2818_v17 = vpop.permute.xlu1 %2817 }
 0x43c   : > { %2905 = vst.msk [vmem:[%s4866_s14 + $0x48] sm:$0xff] %vm2895_vm12, %v2818_v17 }
 0x43d   : > { %v2820_v18 = vpop.permute.xlu0 %2819 }
 0x43e   : > { %2906 = vst.msk [vmem:[%s4866_s14 + $0x50] sm:$0xff] %vm2895_vm12, %v2820_v18 }
 0x43f   : > { %v2822_v8 = vpop.permute.xlu1 %2821 }
 0x440   : > { %2907 = vst.msk [vmem:[%s4866_s14 + $0x58] sm:$0xff] %vm2895_vm12, %v2822_v8 }
 0x476   : > { %v2824_v41 = vpop.permute.xlu0 %2823 }
 0x477   : > { %2908 = vst.msk [vmem:[%s4866_s14 + $0x60] sm:$0xff] %vm2895_vm12, %v2824_v41 }
 0x478   : > { %v2826_v43 = vpop.permute.xlu1 %2825 }
 0x479   : > { %2909 = vst.msk [vmem:[%s4866_s14 + $0x68] sm:$0xff] %vm2895_vm12, %v2826_v43 }
 0x47a   : > { %v2828_v55 = vpop.permute.xlu0 %2827 }
 0x47b   : > { %2910 = vst.msk [vmem:[%s4866_s14 + $0x70] sm:$0xff] %vm2895_vm12, %v2828_v55 }
 0x47c   : > { %v2830_v20 = vpop.permute.xlu1 %2829 }
 0x47d   : > { %2911 = vst.msk [vmem:[%s4866_s14 + $0x78] sm:$0xff] %vm2895_vm12, %v2830_v20 }
 0x47e   : > { %v2832_v2 = vpop.permute.xlu0 %2831 }
 0x47f   : > { %2912 = vst.msk [vmem:[%s4866_s14 + $0x80] sm:$0xff] %vm2895_vm12, %v2832_v2 }
 0x480   : > { %v2834_v26 = vpop.permute.xlu1 %2833 }
 0x481   : > { %2913 = vst.msk [vmem:[%s4866_s14 + $0x88] sm:$0xff] %vm2895_vm12, %v2834_v26 }
 0x482   : > { %v2836_v6 = vpop.permute.xlu0 %2835 }
 0x483   : > { %2914 = vst.msk [vmem:[%s4866_s14 + $0x90] sm:$0xff] %vm2895_vm12, %v2836_v6 }
 0x484   : > { %v2838_v36 = vpop.permute.xlu1 %2837 }
 0x485   : > { %2915 = vst.msk [vmem:[%s4866_s14 + $0x98] sm:$0xff] %vm2895_vm12, %v2838_v36 }
 0x486   : > { %v2840_v61 = vpop.permute.xlu0 %2839 }
 0x487   : > { %2916 = vst.msk [vmem:[%s4866_s14 + $0xa0] sm:$0xff] %vm2895_vm12, %v2840_v61 }
 0x488   : > { %v2842_v5 = vpop.permute.xlu1 %2841 }
 0x489   : > { %2917 = vst.msk [vmem:[%s4866_s14 + $0xa8] sm:$0xff] %vm2895_vm12, %v2842_v5 }
 0x48a   : > { %v2844_v11 = vpop.permute.xlu0 %2843 }
 0x48b   : > { %2918 = vst.msk [vmem:[%s4866_s14 + $0xb0] sm:$0xff] %vm2895_vm12, %v2844_v11 }
 0x48c   : > { %v2846_v32 = vpop.permute.xlu1 %2845 }
 0x48d   : > { %2919 = vst.msk [vmem:[%s4866_s14 + $0xb8] sm:$0xff] %vm2895_vm12, %v2846_v32 }
 0x48e   : > { %v2848_v54 = vpop.permute.xlu0 %2847 }
 0x48f   : > { %2920 = vst.msk [vmem:[%s4866_s14 + $0xc0] sm:$0xff] %vm2895_vm12, %v2848_v54 }
 0x490   : > { %v2850_v4 = vpop.permute.xlu1 %2849 }
 0x491   : > { %2921 = vst.msk [vmem:[%s4866_s14 + $0xc8] sm:$0xff] %vm2895_vm12, %v2850_v4 }
 0x492   : > { %v2852_v31 = vpop.permute.xlu0 %2851 }
 0x493   : > { %2922 = vst.msk [vmem:[%s4866_s14 + $0xd0] sm:$0xff] %vm2895_vm12, %v2852_v31 }
 0x494   : > { %v2854_v56 = vpop.permute.xlu1 %2853 }
 0x495   : > { %2923 = vst.msk [vmem:[%s4866_s14 + $0xd8] sm:$0xff] %vm2895_vm12, %v2854_v56 }
 0x496   : > { %v2856_v12 = vpop.permute.xlu0 %2855 }
 0x497   : > { %2924 = vst.msk [vmem:[%s4866_s14 + $0xe0] sm:$0xff] %vm2895_vm12, %v2856_v12 }
 0x498   : > { %v2858_v7 = vpop.permute.xlu1 %2857 }
 0x499   : > { %2925 = vst.msk [vmem:[%s4866_s14 + $0xe8] sm:$0xff] %vm2895_vm12, %v2858_v7 }
 0x49a   : > { %v2860_v16 = vpop.permute.xlu0 %2859 }
 0x49b   : > { %2926 = vst.msk [vmem:[%s4866_s14 + $0xf0] sm:$0xff] %vm2895_vm12, %v2860_v16 }
 0x49c   : > { %v2862_v28 = vpop.permute.xlu1 %2861 }
 0x49d   : > { %2927 = vst.msk [vmem:[%s4866_s14 + $0xf8] sm:$0xff] %vm2895_vm12, %v2862_v28 }
 0x49e PF: > { %s13_s12 = sadd.s32 1, %s3443_s12  }
 0x49f   : > { %p10_p4 = scmp.ge.s32.totalorder %s13_s12, 4  }
 0x4a1   :  { %12 = sbr.rel (!%p10_p4) target bundleno = 1 (0x1), region = 64 }

</bundles_post_ra>
